<compile_context>
chip_gen: v6e
topology: v6e:2x2x1
jax: 0.10.0
libtpu: 0.0.40
codegen_flags: <defaults>
</compile_context>

<pallas_src>
import functools

import jax
import jax.numpy as jnp
from jax import lax
from jax.experimental import pallas as pl
from jax.experimental.pallas import tpu as pltpu

KSIZE = 4
STRIDE = 2
PAD = 1
BN_EPS = 1e-5
LANE = 128


def _round_up(x, m):
    return (x + m - 1) // m * m


# ----------------------------------------------------------------------------
# Fused per-layer Pallas kernel:
#   conv (matmul) + bias + [BatchNorm batch-stats] + LeakyReLU + [Sigmoid]
# ----------------------------------------------------------------------------
def _fused_layer_kernel(x_ref, w_ref, b_ref, o_ref, *, has_norm,
                        negative_slope, apply_sigmoid):
    # MXU matmul: bf16 operands, f32 accumulation.
    y = jnp.dot(x_ref[...], w_ref[...], preferred_element_type=jnp.float32)
    y = y + b_ref[...]                                   # (M, N) + (1, N)

    if has_norm:
        # Training-mode BatchNorm2d over (N, H, W) == rows of the conv output.
        # gamma = 1, beta = 0, biased variance (matches PyTorch normalization).
        mean = jnp.mean(y, axis=0, keepdims=True)        # XLU cross-sublane reduce
        centered = y - mean
        var = jnp.mean(centered * centered, axis=0, keepdims=True)
        y = centered * lax.rsqrt(var + BN_EPS)           # rsqrt -> EUP slot

    # LeakyReLU(negative_slope) with slope < 1  <=>  max(y, slope*y).
    y = jnp.maximum(y, negative_slope * y)

    if apply_sigmoid:
        y = 1.0 / (1.0 + jnp.exp(-y))                    # exp -> EUP slot

    o_ref[...] = y.astype(o_ref.dtype)


def fused_cbr_layer(patches, w_pad, b_pad, *, has_norm, negative_slope,
                    apply_sigmoid, out_dtype, m_tile=256):
    """patches: (M, K) bf16, w_pad: (K, N) bf16, b_pad: (1, N) f32 -> (M, N)."""
    M, K = patches.shape
    N = w_pad.shape[1]

    if (not has_norm) and (M % m_tile == 0) and (M > m_tile):
        # No cross-row statistics needed -> tile M and let the grid axis shard
        # across TensorCores on v7x (no-op on single-TC v5e/v6e).
        grid = (M // m_tile,)
        m_blk = m_tile
        dim_sem = ("parallel",)
    else:
        # BatchNorm needs full-column stats -> whole output resident in VMEM.
        grid = (1,)
        m_blk = M
        dim_sem = ("arbitrary",)

    kernel = functools.partial(
        _fused_layer_kernel,
        has_norm=has_norm,
        negative_slope=negative_slope,
        apply_sigmoid=apply_sigmoid,
    )
    return pl.pallas_call(
        kernel,
        grid=grid,
        in_specs=[
            pl.BlockSpec((m_blk, K), lambda i: (i, 0)),
            pl.BlockSpec((K, N), lambda i: (0, 0)),
            pl.BlockSpec((1, N), lambda i: (0, 0)),
        ],
        out_specs=pl.BlockSpec((m_blk, N), lambda i: (i, 0)),
        out_shape=jax.ShapeDtypeStruct((M, N), out_dtype),
        compiler_params=pltpu.CompilerParams(dimension_semantics=dim_sem),
    )(patches, w_pad, b_pad)


# ----------------------------------------------------------------------------
# im2col glue (tiny XLA ops between the fused layer kernels)
# ----------------------------------------------------------------------------
def im2col(x):
    """x: (N, H, W, C) -> ((N*Hout*Wout, 16*C), (N, Hout, Wout)) for k=4,s=2,p=1."""
    n, h, w, c = x.shape
    xp = jnp.pad(x, ((0, 0), (PAD, PAD), (PAD, PAD), (0, 0)))
    h_out = (h + 2 * PAD - KSIZE) // STRIDE + 1
    w_out = (w + 2 * PAD - KSIZE) // STRIDE + 1
    taps = [
        xp[:, kh:kh + STRIDE * h_out:STRIDE, kw:kw + STRIDE * w_out:STRIDE, :]
        for kh in range(KSIZE) for kw in range(KSIZE)
    ]
    patches = jnp.concatenate(taps, axis=-1)             # (n, ho, wo, 16*C)
    return patches.reshape(n * h_out * w_out, KSIZE * KSIZE * c), (n, h_out, w_out)


# ----------------------------------------------------------------------------
# Layer metadata + one-time parameter padding (done at init, not per forward)
# ----------------------------------------------------------------------------
def build_layer_meta(layer_specs):
    metas = []
    carried = None
    for idx, (cin, cout, has_norm) in enumerate(layer_specs):
        cin_carried = _round_up(cin, 8) if idx == 0 else carried
        cout_pad = _round_up(cout, LANE)
        metas.append(dict(cin_real=cin, cout_real=cout, has_norm=has_norm,
                          cin_carried=cin_carried, cout_pad=cout_pad))
        carried = cout_pad
    return metas


def prepare_params(raw_params, layer_meta):
    """Embed raw (4,4,cin,cout) weights into lane-dense padded bf16 matrices."""
    prepared = []
    for (w, b), meta in zip(raw_params, layer_meta):
        cin, cout = meta["cin_real"], meta["cout_real"]
        cin_c, cout_p = meta["cin_carried"], meta["cout_pad"]
        w_full = jnp.zeros((KSIZE * KSIZE, cin_c, cout_p), jnp.float32)
        w_full = w_full.at[:, :cin, :cout].set(w.reshape(KSIZE * KSIZE, cin, cout))
        w_pad = w_full.reshape(KSIZE * KSIZE * cin_c, cout_p).astype(jnp.bfloat16)
        b_pad = jnp.zeros((1, cout_p), jnp.float32).at[0, :cout].set(b)
        prepared.append((w_pad, b_pad))
    return prepared


# ----------------------------------------------------------------------------
# Forward pass
# ----------------------------------------------------------------------------
def discriminator_forward(x, params, layer_meta):
    x = x.astype(jnp.float32)            # mirrors torch.tensor(x.clone(), float32)
    n, h, w, c = x.shape
    cin0 = layer_meta[0]["cin_carried"]
    if c < cin0:                         # pad input channels once (6 -> 8)
        x = jnp.pad(x, ((0, 0), (0, 0), (0, 0), (0, cin0 - c)))
    act = x.astype(jnp.bfloat16)         # carry channel-padded bf16 activations

    n_layers = len(params)
    for i, ((w_pad, b_pad), meta) in enumerate(zip(params, layer_meta)):
        last = i == n_layers - 1
        patches, (nn_, ho, wo) = im2col(act)
        out = fused_cbr_layer(
            patches, w_pad, b_pad,
            has_norm=meta["has_norm"],
            negative_slope=0.2,
            apply_sigmoid=last,          # final nn.Sigmoid fused into last layer
            out_dtype=jnp.float32 if last else jnp.bfloat16,
        )
        act = out.reshape(nn_, ho, wo, w_pad.shape[1])

    # Slice off the channel padding of the final (cout=1) layer.
    return act[..., :layer_meta[-1]["cout_real"]].astype(jnp.float32)


# ----------------------------------------------------------------------------
# Deterministic parameter init + run
# ----------------------------------------------------------------------------
if __name__ == "__main__":
    factor = 1
    channel = 64
    # (in_channels, out_channels, has_batchnorm) — matches Discriminator(factor)
    layer_specs = [
        (6, channel, False),                                 # cbr1, norm=None
        (channel, channel * factor, True),                   # cbr2
        (channel * factor, channel * factor * 2, True),      # cbr3
        (channel * factor * 2, channel * factor * 4, True),  # cbr4
        (channel * factor * 4, 1, True),                     # cbr5
    ]
    metas = build_layer_meta(layer_specs)

    key = jax.random.PRNGKey(0)
    raw_params = []
    for cin, cout, _ in layer_specs:
        key, kw, kb = jax.random.split(key, 3)
        w = jax.random.normal(kw, (KSIZE, KSIZE, cin, cout), jnp.float32) * 0.05
        b = jax.random.normal(kb, (cout,), jnp.float32) * 0.05
        raw_params.append((w, b))
    params = prepare_params(raw_params, metas)    # padded bf16, built once

    key, kx = jax.random.split(key)
    # NHWC input; equivalent PyTorch NCHW input shape is (2, 6, 32, 32).
    x = jax.random.normal(kx, (2, 32, 32, 6), jnp.float32)

    forward = jax.jit(functools.partial(discriminator_forward, layer_meta=metas))
    y = forward(x, params)
    y = jax.block_until_ready(y)

    assert y.shape == (2, 1, 1, 1), y.shape
    assert bool(jnp.all((y >= 0.0) & (y <= 1.0)))
    print("KERNEL_OK")
</pallas_src>

<mosaic_0001>
module attributes {stable_mosaic.version = 11 : i64} {
  func.func @_fused_layer_kernel(%arg0: i32, %arg1: memref<256x128xbf16, #tpu.memory_space<vmem>>, %arg2: memref<128x128xbf16, #tpu.memory_space<vmem>>, %arg3: memref<1x128xf32, #tpu.memory_space<vmem>>, %arg4: memref<256x128xbf16, #tpu.memory_space<vmem>>) attributes {dimension_semantics = [#tpu.dimension_semantics<parallel>], iteration_bounds = array<i64: 2>, scalar_prefetch = 0 : i64, scratch_operands = 0 : i64, tpu.core_type = #tpu.core_type<tc>, window_params = [{transform_indices = @transform_0, window_bounds = array<i64: 256, 128>}, {pipeline_mode = #tpu.pipeline_mode<synchronous>, transform_indices = @transform_1, window_bounds = array<i64: 128, 128>}, {pipeline_mode = #tpu.pipeline_mode<synchronous>, transform_indices = @transform_2, window_bounds = array<i64: 1, 128>}, {transform_indices = @transform_3, window_bounds = array<i64: 256, 128>}]} {
    %c0 = arith.constant 0 : index
    %c0_0 = arith.constant 0 : index
    %0 = vector.load %arg1[%c0, %c0_0] : memref<256x128xbf16, #tpu.memory_space<vmem>>, vector<256x128xbf16>
    %c0_1 = arith.constant 0 : index
    %c0_2 = arith.constant 0 : index
    %1 = vector.load %arg2[%c0_1, %c0_2] : memref<128x128xbf16, #tpu.memory_space<vmem>>, vector<128x128xbf16>
    %cst = arith.constant dense<0.000000e+00> : vector<256x128xf32>
    %2 = tpu.matmul %0, %1, %cst {dimension_numbers = #tpu.dot_dimension_numbers<[1], [0], [0], [1], [0, 0, 1, 1], [], []>} : vector<256x128xbf16>, vector<128x128xbf16>, vector<256x128xf32> -> vector<256x128xf32>
    %c0_3 = arith.constant 0 : index
    %c0_4 = arith.constant 0 : index
    %3 = vector.load %arg3[%c0_3, %c0_4] : memref<1x128xf32, #tpu.memory_space<vmem>>, vector<1x128xf32>
    %4 = vector.broadcast %3 : vector<1x128xf32> to vector<256x128xf32>
    %5 = arith.addf %2, %4 : vector<256x128xf32>
    %cst_5 = arith.constant 2.000000e-01 : f32
    %6 = vector.broadcast %cst_5 : f32 to vector<256x128xf32>
    %7 = arith.mulf %6, %5 : vector<256x128xf32>
    %8 = arith.maximumf %5, %7 : vector<256x128xf32>
    %9 = arith.truncf %8 : vector<256x128xf32> to vector<256x128xbf16>
    %c0_6 = arith.constant 0 : index
    %c0_7 = arith.constant 0 : index
    %10 = vector.load %arg4[%c0_6, %c0_7] : memref<256x128xbf16, #tpu.memory_space<vmem>>, vector<256x128xbf16>
    tpu.vector_store %arg4[%c0_6, %c0_7], %9 {strides = array<i32>} : memref<256x128xbf16, #tpu.memory_space<vmem>>, vector<256x128xbf16>,
    return
  }
  func.func @transform_0(%arg0: i32) -> (i32, i32) {
    %c0_i32 = arith.constant 0 : i32
    %c0_i32_0 = arith.constant 0 : i32
    return %arg0, %c0_i32 : i32, i32
  }
  func.func @transform_1(%arg0: i32) -> (i32, i32) {
    %c0_i32 = arith.constant 0 : i32
    %c0_i32_0 = arith.constant 0 : i32
    %c0_i32_1 = arith.constant 0 : i32
    return %c0_i32, %c0_i32_0 : i32, i32
  }
  func.func @transform_2(%arg0: i32) -> (i32, i32) {
    %c0_i32 = arith.constant 0 : i32
    %c0_i32_0 = arith.constant 0 : i32
    %c0_i32_1 = arith.constant 0 : i32
    return %c0_i32, %c0_i32_0 : i32, i32
  }
  func.func @transform_3(%arg0: i32) -> (i32, i32) {
    %c0_i32 = arith.constant 0 : i32
    %c0_i32_0 = arith.constant 0 : i32
    return %arg0, %c0_i32 : i32, i32
  }
}

module attributes {stable_mosaic.version = 11 : i64} {
  func.func @_fused_layer_kernel(%arg0: i32, %arg1: memref<128x2048xbf16, #tpu.memory_space<vmem>>, %arg2: memref<2048x128xbf16, #tpu.memory_space<vmem>>, %arg3: memref<1x128xf32, #tpu.memory_space<vmem>>, %arg4: memref<128x128xbf16, #tpu.memory_space<vmem>>) attributes {dimension_semantics = [#tpu.dimension_semantics<arbitrary>], iteration_bounds = array<i64: 1>, scalar_prefetch = 0 : i64, scratch_operands = 0 : i64, tpu.core_type = #tpu.core_type<tc>, window_params = [{transform_indices = @transform_0, window_bounds = array<i64: 128, 2048>}, {pipeline_mode = #tpu.pipeline_mode<synchronous>, transform_indices = @transform_1, window_bounds = array<i64: 2048, 128>}, {pipeline_mode = #tpu.pipeline_mode<synchronous>, transform_indices = @transform_2, window_bounds = array<i64: 1, 128>}, {transform_indices = @transform_3, window_bounds = array<i64: 128, 128>}]} {
    %c0 = arith.constant 0 : index
    %c0_0 = arith.constant 0 : index
    %0 = vector.load %arg1[%c0, %c0_0] : memref<128x2048xbf16, #tpu.memory_space<vmem>>, vector<128x2048xbf16>
    %c0_1 = arith.constant 0 : index
    %c0_2 = arith.constant 0 : index
    %1 = vector.load %arg2[%c0_1, %c0_2] : memref<2048x128xbf16, #tpu.memory_space<vmem>>, vector<2048x128xbf16>
    %cst = arith.constant dense<0.000000e+00> : vector<128x128xf32>
    %2 = tpu.matmul %0, %1, %cst {dimension_numbers = #tpu.dot_dimension_numbers<[1], [0], [0], [1], [0, 0, 1, 1], [], []>} : vector<128x2048xbf16>, vector<2048x128xbf16>, vector<128x128xf32> -> vector<128x128xf32>
    %c0_3 = arith.constant 0 : index
    %c0_4 = arith.constant 0 : index
    %3 = vector.load %arg3[%c0_3, %c0_4] : memref<1x128xf32, #tpu.memory_space<vmem>>, vector<1x128xf32>
    %4 = vector.broadcast %3 : vector<1x128xf32> to vector<128x128xf32>
    %5 = arith.addf %2, %4 : vector<128x128xf32>
    %cst_5 = arith.constant dense<0.000000e+00> : vector<128xf32>
    %6 = vector.multi_reduction <add>, %5, %cst_5 [0] : vector<128x128xf32> to vector<128xf32>
    %7 = vector.shape_cast %6 : vector<128xf32> to vector<1x128xf32>
    %cst_6 = arith.constant 1.280000e+02 : f32
    %8 = vector.broadcast %cst_6 : f32 to vector<1x128xf32>
    %9 = arith.divf %7, %8 : vector<1x128xf32>
    %10 = vector.broadcast %9 : vector<1x128xf32> to vector<128x128xf32>
    %11 = arith.subf %5, %10 : vector<128x128xf32>
    %12 = arith.mulf %11, %11 : vector<128x128xf32>
    %cst_7 = arith.constant dense<0.000000e+00> : vector<128xf32>
    %13 = vector.multi_reduction <add>, %12, %cst_7 [0] : vector<128x128xf32> to vector<128xf32>
    %14 = vector.shape_cast %13 : vector<128xf32> to vector<1x128xf32>
    %cst_8 = arith.constant 1.280000e+02 : f32
    %15 = vector.broadcast %cst_8 : f32 to vector<1x128xf32>
    %16 = arith.divf %14, %15 : vector<1x128xf32>
    %cst_9 = arith.constant 9.99999974E-6 : f32
    %17 = vector.broadcast %cst_9 : f32 to vector<1x128xf32>
    %18 = arith.addf %16, %17 : vector<1x128xf32>
    %19 = math.rsqrt %18 : vector<1x128xf32>
    %20 = vector.broadcast %19 : vector<1x128xf32> to vector<128x128xf32>
    %21 = arith.mulf %11, %20 : vector<128x128xf32>
    %cst_10 = arith.constant 2.000000e-01 : f32
    %22 = vector.broadcast %cst_10 : f32 to vector<128x128xf32>
    %23 = arith.mulf %22, %21 : vector<128x128xf32>
    %24 = arith.maximumf %21, %23 : vector<128x128xf32>
    %25 = arith.truncf %24 : vector<128x128xf32> to vector<128x128xbf16>
    %c0_11 = arith.constant 0 : index
    %c0_12 = arith.constant 0 : index
    %26 = vector.load %arg4[%c0_11, %c0_12] : memref<128x128xbf16, #tpu.memory_space<vmem>>, vector<128x128xbf16>
    tpu.vector_store %arg4[%c0_11, %c0_12], %25 {strides = array<i32>} : memref<128x128xbf16, #tpu.memory_space<vmem>>, vector<128x128xbf16>,
    return
  }
  func.func @transform_0(%arg0: i32) -> (i32, i32) {
    %c0_i32 = arith.constant 0 : i32
    %c0_i32_0 = arith.constant 0 : i32
    return %arg0, %c0_i32 : i32, i32
  }
  func.func @transform_1(%arg0: i32) -> (i32, i32) {
    %c0_i32 = arith.constant 0 : i32
    %c0_i32_0 = arith.constant 0 : i32
    %c0_i32_1 = arith.constant 0 : i32
    return %c0_i32, %c0_i32_0 : i32, i32
  }
  func.func @transform_2(%arg0: i32) -> (i32, i32) {
    %c0_i32 = arith.constant 0 : i32
    %c0_i32_0 = arith.constant 0 : i32
    %c0_i32_1 = arith.constant 0 : i32
    return %c0_i32, %c0_i32_0 : i32, i32
  }
  func.func @transform_3(%arg0: i32) -> (i32, i32) {
    %c0_i32 = arith.constant 0 : i32
    %c0_i32_0 = arith.constant 0 : i32
    return %arg0, %c0_i32 : i32, i32
  }
}

module attributes {stable_mosaic.version = 11 : i64} {
  func.func @_fused_layer_kernel(%arg0: i32, %arg1: memref<32x2048xbf16, #tpu.memory_space<vmem>>, %arg2: memref<2048x128xbf16, #tpu.memory_space<vmem>>, %arg3: memref<1x128xf32, #tpu.memory_space<vmem>>, %arg4: memref<32x128xbf16, #tpu.memory_space<vmem>>) attributes {dimension_semantics = [#tpu.dimension_semantics<arbitrary>], iteration_bounds = array<i64: 1>, scalar_prefetch = 0 : i64, scratch_operands = 0 : i64, tpu.core_type = #tpu.core_type<tc>, window_params = [{transform_indices = @transform_0, window_bounds = array<i64: 32, 2048>}, {pipeline_mode = #tpu.pipeline_mode<synchronous>, transform_indices = @transform_1, window_bounds = array<i64: 2048, 128>}, {pipeline_mode = #tpu.pipeline_mode<synchronous>, transform_indices = @transform_2, window_bounds = array<i64: 1, 128>}, {transform_indices = @transform_3, window_bounds = array<i64: 32, 128>}]} {
    %c0 = arith.constant 0 : index
    %c0_0 = arith.constant 0 : index
    %0 = vector.load %arg1[%c0, %c0_0] : memref<32x2048xbf16, #tpu.memory_space<vmem>>, vector<32x2048xbf16>
    %c0_1 = arith.constant 0 : index
    %c0_2 = arith.constant 0 : index
    %1 = vector.load %arg2[%c0_1, %c0_2] : memref<2048x128xbf16, #tpu.memory_space<vmem>>, vector<2048x128xbf16>
    %cst = arith.constant dense<0.000000e+00> : vector<32x128xf32>
    %2 = tpu.matmul %0, %1, %cst {dimension_numbers = #tpu.dot_dimension_numbers<[1], [0], [0], [1], [0, 0, 1, 1], [], []>} : vector<32x2048xbf16>, vector<2048x128xbf16>, vector<32x128xf32> -> vector<32x128xf32>
    %c0_3 = arith.constant 0 : index
    %c0_4 = arith.constant 0 : index
    %3 = vector.load %arg3[%c0_3, %c0_4] : memref<1x128xf32, #tpu.memory_space<vmem>>, vector<1x128xf32>
    %4 = vector.broadcast %3 : vector<1x128xf32> to vector<32x128xf32>
    %5 = arith.addf %2, %4 : vector<32x128xf32>
    %cst_5 = arith.constant dense<0.000000e+00> : vector<128xf32>
    %6 = vector.multi_reduction <add>, %5, %cst_5 [0] : vector<32x128xf32> to vector<128xf32>
    %7 = vector.shape_cast %6 : vector<128xf32> to vector<1x128xf32>
    %cst_6 = arith.constant 3.200000e+01 : f32
    %8 = vector.broadcast %cst_6 : f32 to vector<1x128xf32>
    %9 = arith.divf %7, %8 : vector<1x128xf32>
    %10 = vector.broadcast %9 : vector<1x128xf32> to vector<32x128xf32>
    %11 = arith.subf %5, %10 : vector<32x128xf32>
    %12 = arith.mulf %11, %11 : vector<32x128xf32>
    %cst_7 = arith.constant dense<0.000000e+00> : vector<128xf32>
    %13 = vector.multi_reduction <add>, %12, %cst_7 [0] : vector<32x128xf32> to vector<128xf32>
    %14 = vector.shape_cast %13 : vector<128xf32> to vector<1x128xf32>
    %cst_8 = arith.constant 3.200000e+01 : f32
    %15 = vector.broadcast %cst_8 : f32 to vector<1x128xf32>
    %16 = arith.divf %14, %15 : vector<1x128xf32>
    %cst_9 = arith.constant 9.99999974E-6 : f32
    %17 = vector.broadcast %cst_9 : f32 to vector<1x128xf32>
    %18 = arith.addf %16, %17 : vector<1x128xf32>
    %19 = math.rsqrt %18 : vector<1x128xf32>
    %20 = vector.broadcast %19 : vector<1x128xf32> to vector<32x128xf32>
    %21 = arith.mulf %11, %20 : vector<32x128xf32>
    %cst_10 = arith.constant 2.000000e-01 : f32
    %22 = vector.broadcast %cst_10 : f32 to vector<32x128xf32>
    %23 = arith.mulf %22, %21 : vector<32x128xf32>
    %24 = arith.maximumf %21, %23 : vector<32x128xf32>
    %25 = arith.truncf %24 : vector<32x128xf32> to vector<32x128xbf16>
    %c0_11 = arith.constant 0 : index
    %c0_12 = arith.constant 0 : index
    %26 = vector.load %arg4[%c0_11, %c0_12] : memref<32x128xbf16, #tpu.memory_space<vmem>>, vector<32x128xbf16>
    tpu.vector_store %arg4[%c0_11, %c0_12], %25 {strides = array<i32>} : memref<32x128xbf16, #tpu.memory_space<vmem>>, vector<32x128xbf16>,
    return
  }
  func.func @transform_0(%arg0: i32) -> (i32, i32) {
    %c0_i32 = arith.constant 0 : i32
    %c0_i32_0 = arith.constant 0 : i32
    return %arg0, %c0_i32 : i32, i32
  }
  func.func @transform_1(%arg0: i32) -> (i32, i32) {
    %c0_i32 = arith.constant 0 : i32
    %c0_i32_0 = arith.constant 0 : i32
    %c0_i32_1 = arith.constant 0 : i32
    return %c0_i32, %c0_i32_0 : i32, i32
  }
  func.func @transform_2(%arg0: i32) -> (i32, i32) {
    %c0_i32 = arith.constant 0 : i32
    %c0_i32_0 = arith.constant 0 : i32
    %c0_i32_1 = arith.constant 0 : i32
    return %c0_i32, %c0_i32_0 : i32, i32
  }
  func.func @transform_3(%arg0: i32) -> (i32, i32) {
    %c0_i32 = arith.constant 0 : i32
    %c0_i32_0 = arith.constant 0 : i32
    return %arg0, %c0_i32 : i32, i32
  }
}

module attributes {stable_mosaic.version = 11 : i64} {
  func.func @_fused_layer_kernel(%arg0: i32, %arg1: memref<8x2048xbf16, #tpu.memory_space<vmem>>, %arg2: memref<2048x256xbf16, #tpu.memory_space<vmem>>, %arg3: memref<1x256xf32, #tpu.memory_space<vmem>>, %arg4: memref<8x256xbf16, #tpu.memory_space<vmem>>) attributes {dimension_semantics = [#tpu.dimension_semantics<arbitrary>], iteration_bounds = array<i64: 1>, scalar_prefetch = 0 : i64, scratch_operands = 0 : i64, tpu.core_type = #tpu.core_type<tc>, window_params = [{transform_indices = @transform_0, window_bounds = array<i64: 8, 2048>}, {pipeline_mode = #tpu.pipeline_mode<synchronous>, transform_indices = @transform_1, window_bounds = array<i64: 2048, 256>}, {pipeline_mode = #tpu.pipeline_mode<synchronous>, transform_indices = @transform_2, window_bounds = array<i64: 1, 256>}, {transform_indices = @transform_3, window_bounds = array<i64: 8, 256>}]} {
    %c0 = arith.constant 0 : index
    %c0_0 = arith.constant 0 : index
    %0 = vector.load %arg1[%c0, %c0_0] : memref<8x2048xbf16, #tpu.memory_space<vmem>>, vector<8x2048xbf16>
    %c0_1 = arith.constant 0 : index
    %c0_2 = arith.constant 0 : index
    %1 = vector.load %arg2[%c0_1, %c0_2] : memref<2048x256xbf16, #tpu.memory_space<vmem>>, vector<2048x256xbf16>
    %cst = arith.constant dense<0.000000e+00> : vector<8x256xf32>
    %2 = tpu.matmul %0, %1, %cst {dimension_numbers = #tpu.dot_dimension_numbers<[1], [0], [0], [1], [0, 0, 1, 1], [], []>} : vector<8x2048xbf16>, vector<2048x256xbf16>, vector<8x256xf32> -> vector<8x256xf32>
    %c0_3 = arith.constant 0 : index
    %c0_4 = arith.constant 0 : index
    %3 = vector.load %arg3[%c0_3, %c0_4] : memref<1x256xf32, #tpu.memory_space<vmem>>, vector<1x256xf32>
    %4 = vector.broadcast %3 : vector<1x256xf32> to vector<8x256xf32>
    %5 = arith.addf %2, %4 : vector<8x256xf32>
    %cst_5 = arith.constant dense<0.000000e+00> : vector<256xf32>
    %6 = vector.multi_reduction <add>, %5, %cst_5 [0] : vector<8x256xf32> to vector<256xf32>
    %7 = vector.shape_cast %6 : vector<256xf32> to vector<1x256xf32>
    %cst_6 = arith.constant 8.000000e+00 : f32
    %8 = vector.broadcast %cst_6 : f32 to vector<1x256xf32>
    %9 = arith.divf %7, %8 : vector<1x256xf32>
    %10 = vector.broadcast %9 : vector<1x256xf32> to vector<8x256xf32>
    %11 = arith.subf %5, %10 : vector<8x256xf32>
    %12 = arith.mulf %11, %11 : vector<8x256xf32>
    %cst_7 = arith.constant dense<0.000000e+00> : vector<256xf32>
    %13 = vector.multi_reduction <add>, %12, %cst_7 [0] : vector<8x256xf32> to vector<256xf32>
    %14 = vector.shape_cast %13 : vector<256xf32> to vector<1x256xf32>
    %cst_8 = arith.constant 8.000000e+00 : f32
    %15 = vector.broadcast %cst_8 : f32 to vector<1x256xf32>
    %16 = arith.divf %14, %15 : vector<1x256xf32>
    %cst_9 = arith.constant 9.99999974E-6 : f32
    %17 = vector.broadcast %cst_9 : f32 to vector<1x256xf32>
    %18 = arith.addf %16, %17 : vector<1x256xf32>
    %19 = math.rsqrt %18 : vector<1x256xf32>
    %20 = vector.broadcast %19 : vector<1x256xf32> to vector<8x256xf32>
    %21 = arith.mulf %11, %20 : vector<8x256xf32>
    %cst_10 = arith.constant 2.000000e-01 : f32
    %22 = vector.broadcast %cst_10 : f32 to vector<8x256xf32>
    %23 = arith.mulf %22, %21 : vector<8x256xf32>
    %24 = arith.maximumf %21, %23 : vector<8x256xf32>
    %25 = arith.truncf %24 : vector<8x256xf32> to vector<8x256xbf16>
    %c0_11 = arith.constant 0 : index
    %c0_12 = arith.constant 0 : index
    %26 = vector.load %arg4[%c0_11, %c0_12] : memref<8x256xbf16, #tpu.memory_space<vmem>>, vector<8x256xbf16>
    tpu.vector_store %arg4[%c0_11, %c0_12], %25 {strides = array<i32>} : memref<8x256xbf16, #tpu.memory_space<vmem>>, vector<8x256xbf16>,
    return
  }
  func.func @transform_0(%arg0: i32) -> (i32, i32) {
    %c0_i32 = arith.constant 0 : i32
    %c0_i32_0 = arith.constant 0 : i32
    return %arg0, %c0_i32 : i32, i32
  }
  func.func @transform_1(%arg0: i32) -> (i32, i32) {
    %c0_i32 = arith.constant 0 : i32
    %c0_i32_0 = arith.constant 0 : i32
    %c0_i32_1 = arith.constant 0 : i32
    return %c0_i32, %c0_i32_0 : i32, i32
  }
  func.func @transform_2(%arg0: i32) -> (i32, i32) {
    %c0_i32 = arith.constant 0 : i32
    %c0_i32_0 = arith.constant 0 : i32
    %c0_i32_1 = arith.constant 0 : i32
    return %c0_i32, %c0_i32_0 : i32, i32
  }
  func.func @transform_3(%arg0: i32) -> (i32, i32) {
    %c0_i32 = arith.constant 0 : i32
    %c0_i32_0 = arith.constant 0 : i32
    return %arg0, %c0_i32 : i32, i32
  }
}

module attributes {stable_mosaic.version = 11 : i64} {
  func.func @_fused_layer_kernel(%arg0: i32, %arg1: memref<2x4096xbf16, #tpu.memory_space<vmem>>, %arg2: memref<4096x128xbf16, #tpu.memory_space<vmem>>, %arg3: memref<1x128xf32, #tpu.memory_space<vmem>>, %arg4: memref<2x128xf32, #tpu.memory_space<vmem>>) attributes {dimension_semantics = [#tpu.dimension_semantics<arbitrary>], iteration_bounds = array<i64: 1>, scalar_prefetch = 0 : i64, scratch_operands = 0 : i64, tpu.core_type = #tpu.core_type<tc>, window_params = [{transform_indices = @transform_0, window_bounds = array<i64: 2, 4096>}, {pipeline_mode = #tpu.pipeline_mode<synchronous>, transform_indices = @transform_1, window_bounds = array<i64: 4096, 128>}, {pipeline_mode = #tpu.pipeline_mode<synchronous>, transform_indices = @transform_2, window_bounds = array<i64: 1, 128>}, {transform_indices = @transform_3, window_bounds = array<i64: 2, 128>}]} {
    %c0 = arith.constant 0 : index
    %c0_0 = arith.constant 0 : index
    %0 = vector.load %arg1[%c0, %c0_0] : memref<2x4096xbf16, #tpu.memory_space<vmem>>, vector<2x4096xbf16>
    %c0_1 = arith.constant 0 : index
    %c0_2 = arith.constant 0 : index
    %1 = vector.load %arg2[%c0_1, %c0_2] : memref<4096x128xbf16, #tpu.memory_space<vmem>>, vector<4096x128xbf16>
    %cst = arith.constant dense<0.000000e+00> : vector<2x128xf32>
    %2 = tpu.matmul %0, %1, %cst {dimension_numbers = #tpu.dot_dimension_numbers<[1], [0], [0], [1], [0, 0, 1, 1], [], []>} : vector<2x4096xbf16>, vector<4096x128xbf16>, vector<2x128xf32> -> vector<2x128xf32>
    %c0_3 = arith.constant 0 : index
    %c0_4 = arith.constant 0 : index
    %3 = vector.load %arg3[%c0_3, %c0_4] : memref<1x128xf32, #tpu.memory_space<vmem>>, vector<1x128xf32>
    %4 = vector.broadcast %3 : vector<1x128xf32> to vector<2x128xf32>
    %5 = arith.addf %2, %4 : vector<2x128xf32>
    %cst_5 = arith.constant dense<0.000000e+00> : vector<128xf32>
    %6 = vector.multi_reduction <add>, %5, %cst_5 [0] : vector<2x128xf32> to vector<128xf32>
    %7 = vector.shape_cast %6 : vector<128xf32> to vector<1x128xf32>
    %cst_6 = arith.constant 2.000000e+00 : f32
    %8 = vector.broadcast %cst_6 : f32 to vector<1x128xf32>
    %9 = arith.divf %7, %8 : vector<1x128xf32>
    %10 = vector.broadcast %9 : vector<1x128xf32> to vector<2x128xf32>
    %11 = arith.subf %5, %10 : vector<2x128xf32>
    %12 = arith.mulf %11, %11 : vector<2x128xf32>
    %cst_7 = arith.constant dense<0.000000e+00> : vector<128xf32>
    %13 = vector.multi_reduction <add>, %12, %cst_7 [0] : vector<2x128xf32> to vector<128xf32>
    %14 = vector.shape_cast %13 : vector<128xf32> to vector<1x128xf32>
    %cst_8 = arith.constant 2.000000e+00 : f32
    %15 = vector.broadcast %cst_8 : f32 to vector<1x128xf32>
    %16 = arith.divf %14, %15 : vector<1x128xf32>
    %cst_9 = arith.constant 9.99999974E-6 : f32
    %17 = vector.broadcast %cst_9 : f32 to vector<1x128xf32>
    %18 = arith.addf %16, %17 : vector<1x128xf32>
    %19 = math.rsqrt %18 : vector<1x128xf32>
    %20 = vector.broadcast %19 : vector<1x128xf32> to vector<2x128xf32>
    %21 = arith.mulf %11, %20 : vector<2x128xf32>
    %cst_10 = arith.constant 2.000000e-01 : f32
    %22 = vector.broadcast %cst_10 : f32 to vector<2x128xf32>
    %23 = arith.mulf %22, %21 : vector<2x128xf32>
    %24 = arith.maximumf %21, %23 : vector<2x128xf32>
    %cst_11 = arith.constant 0.000000e+00 : f32
    %25 = vector.broadcast %cst_11 : f32 to vector<2x128xf32>
    %26 = arith.subf %25, %24 : vector<2x128xf32>
    %27 = math.exp %26 : vector<2x128xf32>
    %cst_12 = arith.constant 1.000000e+00 : f32
    %28 = vector.broadcast %cst_12 : f32 to vector<2x128xf32>
    %29 = arith.addf %28, %27 : vector<2x128xf32>
    %cst_13 = arith.constant 1.000000e+00 : f32
    %30 = vector.broadcast %cst_13 : f32 to vector<2x128xf32>
    %31 = arith.divf %30, %29 : vector<2x128xf32>
    %c0_14 = arith.constant 0 : index
    %c0_15 = arith.constant 0 : index
    %32 = vector.load %arg4[%c0_14, %c0_15] : memref<2x128xf32, #tpu.memory_space<vmem>>, vector<2x128xf32>
    tpu.vector_store %arg4[%c0_14, %c0_15], %31 {strides = array<i32>} : memref<2x128xf32, #tpu.memory_space<vmem>>, vector<2x128xf32>,
    return
  }
  func.func @transform_0(%arg0: i32) -> (i32, i32) {
    %c0_i32 = arith.constant 0 : i32
    %c0_i32_0 = arith.constant 0 : i32
    return %arg0, %c0_i32 : i32, i32
  }
  func.func @transform_1(%arg0: i32) -> (i32, i32) {
    %c0_i32 = arith.constant 0 : i32
    %c0_i32_0 = arith.constant 0 : i32
    %c0_i32_1 = arith.constant 0 : i32
    return %c0_i32, %c0_i32_0 : i32, i32
  }
  func.func @transform_2(%arg0: i32) -> (i32, i32) {
    %c0_i32 = arith.constant 0 : i32
    %c0_i32_0 = arith.constant 0 : i32
    %c0_i32_1 = arith.constant 0 : i32
    return %c0_i32, %c0_i32_0 : i32, i32
  }
  func.func @transform_3(%arg0: i32) -> (i32, i32) {
    %c0_i32 = arith.constant 0 : i32
    %c0_i32_0 = arith.constant 0 : i32
    return %arg0, %c0_i32 : i32, i32
  }
}

</mosaic_0001>

<bundles_post_ra>
// kernel: discriminator_forward.5
= control target key start
LH: loop header
LB: loop body
LE: loop exit
PB: predicated region body
PF: predicated region fallthrough
CT: control target
= control target key end

     0   :  { %s1158_s12 = smov 0   ;;  %s1279_s0 = inlined_call_operand.vmem [shape: bf16[512,128], index: 0, kind: input, shape index: {}]   ;;  %s1280_s1 = inlined_call_operand.vmem [shape: bf16[128,128], index: 1, kind: input, shape index: {}]   ;;  %s1281_s2 = inlined_call_operand.vmem [shape: f32[1,128], index: 2, kind: input, shape index: {}]   ;;  %s1282_s3 = inlined_call_operand.vmem [shape: bf16[512,128], index: 3, kind: output, shape index: {}]  }
   0x1 LB: > { %s815_s13 = sadd.s32 4294967295, %s1136_s12   ;;  %p819_p0 = scmp.ge.s32.totalorder %s1136_s12, 1  ;;  %s1136_s12 = sphi %s1158_s12, %s13_s12  }
   0x2   : > { %p138_p1 = scmp.lt.s32.totalorder %s1136_s12, 3 }
   0x4   : > { %p139_p2 = pnand %p819_p0, %p138_p1 }
   0x5   : > { %s820_s16 = sshll.u32 (!%p139_p2), %s815_s13, 5 }
   0x6   : > { %142 = sbr.rel (%p139_p2) target bundleno = 276 (0x114), region = 32  ;;  %p163_p3 = scmp.lt.s32.totalorder (!%p139_p2), %s820_s16, 63 }
   0xb   : > { %v1106_v0 = vld [vmem:[%s1280_s1 + $0x38] sm:$0xff]   ;;  %v1107_v1 = vld [vmem:[%s1280_s1 + $0x30] sm:$0xff]   ;;  %s1284_s16 = smov (!%p163_p3, %s820_s16), 63  ;;  %v1108_v2 = vld [vmem:[%s1280_s1 + $0x28] sm:$0xff]  }
   0xc   : > { %1034 = vmatprep.subr.bf16.mxu0 %v1106_v0  ;;  %1082 = vmatprep.subr.bf16.mxu1 %v1106_v0  ;;  %s821_s21 = sshll.u32 %s1284_s16, 2  ;;  %v1109_v3 = vld [vmem:[%s1280_s1 + $0x20] sm:$0xff]   ;;  %v1110_v6 = vld [vmem:[%s1280_s1 + $0x18] sm:$0xff]   ;;  %v1111_v7 = vld [vmem:[%s1280_s1 + $0x10] sm:$0xff]  }
   0xd   : > { %1035 = vmatpush3.bf16.msra.mxu0 %v1106_v0  ;;  %1090 = vmatpush3.bf16.msra.mxu1 %v1106_v0  ;;  %s1183_s24 = scalar_lea.vmem %s1279_s0, %s821_s21  ;;  %v1112_v8 = vld [vmem:[%s1280_s1 + $0x8] sm:$0xff]   ;;  %v1113_v9 = vld [vmem:[%s1280_s1] sm:$0xff]   ;;  %s1236_s13 = scalar_lea.vmem %s1282_s3, %s821_s21 }
   0xe   : > { %1036 = vmatprep.subr.bf16.mxu0 %v1107_v1  ;;  %1083 = vmatprep.subr.bf16.mxu1 %v1107_v1  ;;  %v1114_v4 = vld [vmem:[%s1183_s24] sm:$0xff]   ;;  %v1116_v10 = vld [vmem:[%s1183_s24 + $0x8] sm:$0xff]   ;;  %v1118_v12 = vld [vmem:[%s1183_s24 + $0x10] sm:$0xff]  }
   0xf   : > { %v1115_v5 = vld [vmem:[%s1183_s24 + $0x40] sm:$0xff]   ;;  %1050 = vmatprep.mubr.bf16.mxu0 %v1114_v4  ;;  %v1117_v11 = vld [vmem:[%s1183_s24 + $0x48] sm:$0xff]   ;;  %v1119_v13 = vld [vmem:[%s1183_s24 + $0x50] sm:$0xff]  }
  0x10   : > { %1066 = vmatprep.mubr.bf16.mxu1 %v1115_v5  ;;  %v1120_v14 = vld [vmem:[%s1183_s24 + $0x18] sm:$0xff]   ;;  %v1122_v16 = vld [vmem:[%s1183_s24 + $0x20] sm:$0xff]   ;;  %v1124_v18 = vld [vmem:[%s1183_s24 + $0x28] sm:$0xff]  }
  0x11   : > { %1037 = vmatpush3.bf16.msra.mxu0 %v1107_v1  ;;  %1091 = vmatpush3.bf16.msra.mxu1 %v1107_v1  ;;  %v1121_v15 = vld [vmem:[%s1183_s24 + $0x58] sm:$0xff]   ;;  %v1123_v17 = vld [vmem:[%s1183_s24 + $0x60] sm:$0xff]   ;;  %v1125_v19 = vld [vmem:[%s1183_s24 + $0x68] sm:$0xff]  }
  0x12   : > { %1038 = vmatprep.subr.bf16.mxu0 %v1108_v2  ;;  %1084 = vmatprep.subr.bf16.mxu1 %v1108_v2  ;;  %v1126_v20 = vld [vmem:[%s1183_s24 + $0x30] sm:$0xff]   ;;  %v1128_v22 = vld [vmem:[%s1183_s24 + $0x38] sm:$0xff]   ;;  %v1219_v24 = vld [vmem:[%s1281_s2] ss:$0 sm:$0xff] }
  0x13   : > { %v1127_v21 = vld [vmem:[%s1183_s24 + $0x70] sm:$0xff]   ;;  %v1129_v23 = vld [vmem:[%s1183_s24 + $0x78] sm:$0xff]  }
  0x15   : > { %1039 = vmatpush3.bf16.msra.mxu0 %v1108_v2  ;;  %1092 = vmatpush3.bf16.msra.mxu1 %v1108_v2 }
  0x16   : > { %1040 = vmatprep.subr.bf16.mxu0 %v1109_v3  ;;  %1085 = vmatprep.subr.bf16.mxu1 %v1109_v3 }
  0x19   : > { %1041 = vmatpush3.bf16.msra.mxu0 %v1109_v3  ;;  %1093 = vmatpush3.bf16.msra.mxu1 %v1109_v3 }
  0x1a   : > { %1042 = vmatprep.subr.bf16.mxu0 %v1110_v6  ;;  %1086 = vmatprep.subr.bf16.mxu1 %v1110_v6 }
  0x1d   : > { %1043 = vmatpush3.bf16.msra.mxu0 %v1110_v6  ;;  %1094 = vmatpush3.bf16.msra.mxu1 %v1110_v6 }
  0x1e   : > { %1044 = vmatprep.subr.bf16.mxu0 %v1111_v7  ;;  %1087 = vmatprep.subr.bf16.mxu1 %v1111_v7 }
  0x21   : > { %1045 = vmatpush3.bf16.msra.mxu0 %v1111_v7  ;;  %1095 = vmatpush3.bf16.msra.mxu1 %v1111_v7 }
  0x22   : > { %1046 = vmatprep.subr.bf16.mxu0 %v1112_v8  ;;  %1088 = vmatprep.subr.bf16.mxu1 %v1112_v8 }
  0x25   : > { %1047 = vmatpush3.bf16.msra.mxu0 %v1112_v8  ;;  %1096 = vmatpush3.bf16.msra.mxu1 %v1112_v8 }
  0x26   : > { %1048 = vmatprep.subr.bf16.mxu0 %v1113_v9  ;;  %1089 = vmatprep.subr.bf16.mxu1 %v1113_v9 }
  0x29   : > { %1049 = vmatpush3.bf16.msra.mxu0 %v1113_v9  ;;  %1097 = vmatpush3.bf16.msra.mxu1 %v1113_v9 }
  0x2c   : > { %1051 = vmatmul.mubr.bf16.vlgmr.msra.gmra.mxu0 %v1116_v10  ;;  %1067 = vmatmul.mubr.bf16.vlgmr.msra.gmra.mxu1 %v1117_v11 }
  0x2d   : > { %1054 = vmatprep.mubr.bf16.mxu0 %v1118_v12  ;;  %1070 = vmatprep.mubr.bf16.mxu1 %v1119_v13 }
  0x34   : > { %1055 = vmatmul.mubr.bf16.gmra.mxu0 %v1120_v14  ;;  %1071 = vmatmul.mubr.bf16.gmra.mxu1 %v1121_v15 }
  0x35   : > { %1058 = vmatprep.mubr.bf16.mxu0 %v1122_v16  ;;  %1074 = vmatprep.mubr.bf16.mxu1 %v1123_v17 }
  0x3c   : > { %1059 = vmatmul.mubr.bf16.gmra.mxu0 %v1124_v18  ;;  %1075 = vmatmul.mubr.bf16.gmra.mxu1 %v1125_v19 }
  0x3d   : > { %1062 = vmatprep.mubr.bf16.mxu0 %v1126_v20  ;;  %1078 = vmatprep.mubr.bf16.mxu1 %v1127_v21 }
  0x44   : > { %1063 = vmatmul.mubr.bf16.gmra.mxu0 %v1128_v22  ;;  %1079 = vmatmul.mubr.bf16.gmra.mxu1 %v1129_v23 }
  0xec   : > { %v1052_v25 = vpop.f32.mrf.mxu0  ;;  %v1068_v26 = vpop.f32.mrf.mxu1 }
  0xed   : > { %v417_v27 = vadd.f32 %v1052_v25, %v1219_v24  ;;  %v481_v28 = vadd.f32 %v1068_v26, %v1219_v24 }
  0xee   : > { %v408_v29 = vpop.f32.mrf.mxu0  ;;  %v472_v30 = vpop.f32.mrf.mxu1 }
  0xef   : > { %v409_v31 = vadd.f32 %v1219_v24, %v408_v29  ;;  %v473_v32 = vadd.f32 %v1219_v24, %v472_v30  ;;  %v537_v35 = vmul.f32 0.2, %v417_v27  ;;  %v553_v36 = vmul.f32 0.2, %v481_v28 }
  0xf0   : > { %v1053_v33 = vpop.f32.mrf.mxu0  ;;  %v1069_v34 = vpop.f32.mrf.mxu1 }
  0xf1   : > { %v420_v37 = vadd.f32 %v1053_v33, %v1219_v24  ;;  %v484_v38 = vadd.f32 %v1069_v34, %v1219_v24  ;;  %v535_v41 = vmul.f32 0.2, %v409_v31  ;;  %v551_v42 = vmul.f32 0.2, %v473_v32 }
  0xf2   : > { %v411_v39 = vpop.f32.mrf.mxu0  ;;  %v475_v40 = vpop.f32.mrf.mxu1  ;;  %v569_v49 = vmax.f32 %v417_v27, %v537_v35  ;;  %v585_v50 = vmax.f32 %v481_v28, %v553_v36 }
  0xf3   : > { %v412_v43 = vadd.f32 %v1219_v24, %v411_v39  ;;  %v476_v44 = vadd.f32 %v1219_v24, %v475_v40  ;;  %v538_v45 = vmul.f32 0.2, %v420_v37  ;;  %v554_v46 = vmul.f32 0.2, %v484_v38 }
  0xf4   : > { %v1056_v47 = vpop.f32.mrf.mxu0  ;;  %v1072_v48 = vpop.f32.mrf.mxu1  ;;  %v567_v59 = vmax.f32 %v409_v31, %v535_v41  ;;  %v583_v60 = vmax.f32 %v473_v32, %v551_v42 }
  0xf5   : > { %v536_v51 = vmul.f32 0.2, %v412_v43  ;;  %v552_v52 = vmul.f32 0.2, %v476_v44  ;;  %v570_v53 = vmax.f32 %v420_v37, %v538_v45  ;;  %v586_v54 = vmax.f32 %v484_v38, %v554_v46 }
  0xf6   : > { %v433_v55 = vadd.f32 %v1056_v47, %v1219_v24  ;;  %v497_v56 = vadd.f32 %v1072_v48, %v1219_v24  ;;  %v424_v57 = vpop.f32.mrf.mxu0  ;;  %v488_v58 = vpop.f32.mrf.mxu1 }
  0xf7   : > { %v568_v61 = vmax.f32 %v412_v43, %v536_v51  ;;  %v584_v62 = vmax.f32 %v476_v44, %v552_v52  ;;  %v923_v63 = vpack.c.bf16 %v570_v53, %v569_v49  ;;  %v963_v0 = vpack.c.bf16 %v586_v54, %v585_v50 }
  0xf8   : > { %v425_v1 = vadd.f32 %v1219_v24, %v424_v57  ;;  %v489_v2 = vadd.f32 %v1219_v24, %v488_v58  ;;  %v1057_v3 = vpop.f32.mrf.mxu0  ;;  %v1073_v4 = vpop.f32.mrf.mxu1  ;;  %v541_v7 = vmul.f32 0.2, %v433_v55  ;;  %v557_v8 = vmul.f32 0.2, %v497_v56 }
  0xf9   : > { %v918_v5 = vpack.c.bf16 %v568_v61, %v567_v59  ;;  %v958_v6 = vpack.c.bf16 %v584_v62, %v583_v60  ;;  %995 = vst [vmem:[%s1236_s13 + $0x8] sm:$0xff] %v923_v63   ;;  %1003 = vst [vmem:[%s1236_s13 + $0x48] sm:$0xff] %v963_v0   ;;  %v436_v9 = vadd.f32 %v1057_v3, %v1219_v24 }
  0xfa   : > { %v500_v10 = vadd.f32 %v1073_v4, %v1219_v24  ;;  %v427_v11 = vpop.f32.mrf.mxu0  ;;  %v491_v12 = vpop.f32.mrf.mxu1  ;;  %v539_v13 = vmul.f32 0.2, %v425_v1  ;;  %v555_v14 = vmul.f32 0.2, %v489_v2  ;;  %v573_v26 = vmax.f32 %v433_v55, %v541_v7 }
  0xfb   : > { %919 = vst [vmem:[%s1236_s13] sm:$0xff] %v918_v5   ;;  %1002 = vst [vmem:[%s1236_s13 + $0x40] sm:$0xff] %v958_v6   ;;  %v428_v15 = vadd.f32 %v1219_v24, %v427_v11  ;;  %v492_v16 = vadd.f32 %v1219_v24, %v491_v12  ;;  %v542_v17 = vmul.f32 0.2, %v436_v9  ;;  %v589_v27 = vmax.f32 %v497_v56, %v557_v8 }
  0xfc   : > { %v558_v18 = vmul.f32 0.2, %v500_v10  ;;  %v1060_v19 = vpop.f32.mrf.mxu0  ;;  %v1076_v20 = vpop.f32.mrf.mxu1  ;;  %v571_v32 = vmax.f32 %v425_v1, %v539_v13  ;;  %v587_v33 = vmax.f32 %v489_v2, %v555_v14 }
  0xfd   : > { %v540_v21 = vmul.f32 0.2, %v428_v15  ;;  %v556_v22 = vmul.f32 0.2, %v492_v16  ;;  %v449_v23 = vadd.f32 %v1060_v19, %v1219_v24  ;;  %v513_v25 = vadd.f32 %v1076_v20, %v1219_v24 }
  0xfe   : > { %v574_v28 = vmax.f32 %v436_v9, %v542_v17  ;;  %v590_v29 = vmax.f32 %v500_v10, %v558_v18  ;;  %v440_v30 = vpop.f32.mrf.mxu0  ;;  %v504_v31 = vpop.f32.mrf.mxu1 }
  0xff   : > { %v572_v34 = vmax.f32 %v428_v15, %v540_v21  ;;  %v588_v35 = vmax.f32 %v492_v16, %v556_v22  ;;  %v441_v38 = vadd.f32 %v1219_v24, %v440_v30  ;;  %v505_v39 = vadd.f32 %v1219_v24, %v504_v31 }
 0x100   : > { %v933_v36 = vpack.c.bf16 %v574_v28, %v573_v26  ;;  %v973_v37 = vpack.c.bf16 %v590_v29, %v589_v27  ;;  %v1061_v40 = vpop.f32.mrf.mxu0  ;;  %v1077_v41 = vpop.f32.mrf.mxu1  ;;  %v545_v44 = vmul.f32 0.2, %v449_v23  ;;  %v561_v45 = vmul.f32 0.2, %v513_v25 }
 0x101   : > { %v928_v42 = vpack.c.bf16 %v572_v34, %v571_v32  ;;  %v968_v43 = vpack.c.bf16 %v588_v35, %v587_v33  ;;  %v452_v46 = vadd.f32 %v1061_v40, %v1219_v24  ;;  %v516_v47 = vadd.f32 %v1077_v41, %v1219_v24 }
 0x102   : > { %997 = vst [vmem:[%s1236_s13 + $0x18] sm:$0xff] %v933_v36   ;;  %1005 = vst [vmem:[%s1236_s13 + $0x58] sm:$0xff] %v973_v37   ;;  %v443_v48 = vpop.f32.mrf.mxu0  ;;  %v507_v49 = vpop.f32.mrf.mxu1  ;;  %v543_v50 = vmul.f32 0.2, %v441_v38  ;;  %v559_v51 = vmul.f32 0.2, %v505_v39  ;;  %v577_v58 = vmax.f32 %v449_v23, %v545_v44  ;;  %v593_v59 = vmax.f32 %v513_v25, %v561_v45 }
 0x103   : > { %996 = vst [vmem:[%s1236_s13 + $0x10] sm:$0xff] %v928_v42   ;;  %1004 = vst [vmem:[%s1236_s13 + $0x50] sm:$0xff] %v968_v43   ;;  %v444_v52 = vadd.f32 %v1219_v24, %v443_v48  ;;  %v508_v53 = vadd.f32 %v1219_v24, %v507_v49  ;;  %v546_v54 = vmul.f32 0.2, %v452_v46  ;;  %v562_v55 = vmul.f32 0.2, %v516_v47 }
 0x104   : > { %v1064_v56 = vpop.f32.mrf.mxu0  ;;  %v1080_v57 = vpop.f32.mrf.mxu1  ;;  %v575_v4 = vmax.f32 %v441_v38, %v543_v50  ;;  %v591_v5 = vmax.f32 %v505_v39, %v559_v51 }
 0x105   : > { %v544_v60 = vmul.f32 0.2, %v444_v52  ;;  %v560_v61 = vmul.f32 0.2, %v508_v53  ;;  %v578_v62 = vmax.f32 %v452_v46, %v546_v54  ;;  %v594_v63 = vmax.f32 %v516_v47, %v562_v55 }
 0x106   : > { %v465_v0 = vadd.f32 %v1064_v56, %v1219_v24  ;;  %v529_v1 = vadd.f32 %v1080_v57, %v1219_v24  ;;  %v456_v2 = vpop.f32.mrf.mxu0  ;;  %v520_v3 = vpop.f32.mrf.mxu1 }
 0x107   : > { %v576_v6 = vmax.f32 %v444_v52, %v544_v60  ;;  %v592_v7 = vmax.f32 %v508_v53, %v560_v61  ;;  %v943_v8 = vpack.c.bf16 %v578_v62, %v577_v58  ;;  %v983_v9 = vpack.c.bf16 %v594_v63, %v593_v59 }
 0x108   : > { %v457_v10 = vadd.f32 %v1219_v24, %v456_v2  ;;  %v521_v11 = vadd.f32 %v1219_v24, %v520_v3  ;;  %v1065_v12 = vpop.f32.mrf.mxu0  ;;  %v1081_v13 = vpop.f32.mrf.mxu1  ;;  %v549_v16 = vmul.f32 0.2, %v465_v0  ;;  %v565_v17 = vmul.f32 0.2, %v529_v1 }
 0x109   : > { %v938_v14 = vpack.c.bf16 %v576_v6, %v575_v4  ;;  %v978_v15 = vpack.c.bf16 %v592_v7, %v591_v5  ;;  %999 = vst [vmem:[%s1236_s13 + $0x28] sm:$0xff] %v943_v8   ;;  %1007 = vst [vmem:[%s1236_s13 + $0x68] sm:$0xff] %v983_v9   ;;  %v468_v18 = vadd.f32 %v1065_v12, %v1219_v24 }
 0x10a   : > { %v532_v19 = vadd.f32 %v1081_v13, %v1219_v24  ;;  %v459_v20 = vpop.f32.mrf.mxu0  ;;  %v523_v21 = vpop.f32.mrf.mxu1  ;;  %v547_v22 = vmul.f32 0.2, %v457_v10  ;;  %v563_v23 = vmul.f32 0.2, %v521_v11  ;;  %v581_v31 = vmax.f32 %v465_v0, %v549_v16 }
 0x10b   : > { %998 = vst [vmem:[%s1236_s13 + $0x20] sm:$0xff] %v938_v14   ;;  %1006 = vst [vmem:[%s1236_s13 + $0x60] sm:$0xff] %v978_v15   ;;  %v460_v25 = vadd.f32 %v1219_v24, %v459_v20  ;;  %v524_v26 = vadd.f32 %v1219_v24, %v523_v21  ;;  %v550_v27 = vmul.f32 0.2, %v468_v18  ;;  %v597_v32 = vmax.f32 %v529_v1, %v565_v17 }
 0x10c   : > { %v566_v28 = vmul.f32 0.2, %v532_v19  ;;  %v579_v35 = vmax.f32 %v457_v10, %v547_v22  ;;  %v595_v36 = vmax.f32 %v521_v11, %v563_v23 }
 0x10d   : > { %v548_v29 = vmul.f32 0.2, %v460_v25  ;;  %v564_v30 = vmul.f32 0.2, %v524_v26  ;;  %v582_v33 = vmax.f32 %v468_v18, %v550_v27 }
 0x10e   : > { %v598_v34 = vmax.f32 %v532_v19, %v566_v28 }
 0x10f   : > { %v580_v37 = vmax.f32 %v460_v25, %v548_v29  ;;  %v596_v38 = vmax.f32 %v524_v26, %v564_v30  ;;  %v953_v39 = vpack.c.bf16 %v582_v33, %v581_v31 }
 0x110   : > { %v993_v40 = vpack.c.bf16 %v598_v34, %v597_v32 }
 0x111   : > { %v948_v41 = vpack.c.bf16 %v580_v37, %v579_v35  ;;  %v988_v24 = vpack.c.bf16 %v596_v38, %v595_v36  ;;  %1001 = vst [vmem:[%s1236_s13 + $0x38] sm:$0xff] %v953_v39  }
 0x112   : > { %1009 = vst [vmem:[%s1236_s13 + $0x78] sm:$0xff] %v993_v40  }
 0x113   : > { %1000 = vst [vmem:[%s1236_s13 + $0x30] sm:$0xff] %v948_v41   ;;  %1008 = vst [vmem:[%s1236_s13 + $0x70] sm:$0xff] %v988_v24  }
 0x114 PF: > { %s13_s12 = sadd.s32 1, %s1136_s12  }
 0x115   : > { %p10_p4 = scmp.ge.s32.totalorder %s13_s12, 4  }
 0x117   :  { %12 = sbr.rel (!%p10_p4) target bundleno = 1 (0x1), region = 62 }

// kernel: discriminator_forward.6
= control target key start
LH: loop header
LB: loop body
LE: loop exit
PB: predicated region body
PF: predicated region fallthrough
CT: control target
= control target key end

     0   :  { %s4809_s1 = inlined_call_operand.vmem [shape: bf16[2048,128], index: 1, kind: input, shape index: {}]   ;;  %s4810_s0 = inlined_call_operand.vmem [shape: bf16[128,2048], index: 0, kind: input, shape index: {}]   ;;  %s4811_s2 = inlined_call_operand.vmem [shape: f32[1,128], index: 2, kind: input, shape index: {}]   ;;  %s4812_s3 = inlined_call_operand.vmem [shape: bf16[128,128], index: 3, kind: output, shape index: {}]  }
   0x1   :  { %v3649_v0 = vld [vmem:[%s4809_s1 + $0x78] sm:$0xff]   ;;  %v3653_v4 = vld [vmem:[%s4809_s1 + $0x70] sm:$0xff]   ;;  %v3657_v8 = vld [vmem:[%s4809_s1 + $0x68] sm:$0xff]  }
   0x2   :  { %v3650_v1 = vld [vmem:[%s4809_s1 + $0xf8] sm:$0xff]   ;;  %3137 = vmatprep.subr.bf16.mxu0 %v3649_v0  ;;  %v3654_v5 = vld [vmem:[%s4809_s1 + $0xf0] sm:$0xff]   ;;  %v3658_v9 = vld [vmem:[%s4809_s1 + $0xe8] sm:$0xff]  }
   0x3   :  { %v3651_v2 = vld [vmem:[%s4809_s1 + $0x38] sm:$0xff]   ;;  %3201 = vmatprep.subr.bf16.mxu1 %v3650_v1  ;;  %v3655_v6 = vld [vmem:[%s4809_s1 + $0x30] sm:$0xff]   ;;  %v3659_v10 = vld [vmem:[%s4809_s1 + $0x28] sm:$0xff]  }
   0x4   :  { %v3652_v3 = vld [vmem:[%s4809_s1 + $0xb8] sm:$0xff]   ;;  %3138 = vmatpush3.bf16.msra.mxu0 %v3651_v2  ;;  %v3656_v7 = vld [vmem:[%s4809_s1 + $0xb0] sm:$0xff]   ;;  %v3660_v11 = vld [vmem:[%s4809_s1 + $0xa8] sm:$0xff]  }
   0x5   :  { %3202 = vmatpush3.bf16.msra.mxu1 %v3652_v3  ;;  %3139 = vmatprep.subr.bf16.mxu0 %v3653_v4  ;;  %v3661_v12 = vld [vmem:[%s4809_s1 + $0x60] sm:$0xff]   ;;  %v3665_v16 = vld [vmem:[%s4809_s1 + $0x58] sm:$0xff]   ;;  %v3669_v20 = vld [vmem:[%s4809_s1 + $0x50] sm:$0xff]  }
   0x6   :  { %3203 = vmatprep.subr.bf16.mxu1 %v3654_v5  ;;  %v3662_v13 = vld [vmem:[%s4809_s1 + $0xe0] sm:$0xff]   ;;  %v3666_v17 = vld [vmem:[%s4809_s1 + $0xd8] sm:$0xff]   ;;  %v3670_v21 = vld [vmem:[%s4809_s1 + $0xd0] sm:$0xff]  }
   0x7   :  { %v3663_v14 = vld [vmem:[%s4809_s1 + $0x20] sm:$0xff]   ;;  %v3667_v18 = vld [vmem:[%s4809_s1 + $0x18] sm:$0xff]   ;;  %v3671_v22 = vld [vmem:[%s4809_s1 + $0x10] sm:$0xff]  }
   0x8   :  { %3140 = vmatpush3.bf16.msra.mxu0 %v3655_v6  ;;  %v3664_v15 = vld [vmem:[%s4809_s1 + $0xa0] sm:$0xff]   ;;  %v3668_v19 = vld [vmem:[%s4809_s1 + $0x98] sm:$0xff]   ;;  %v3672_v23 = vld [vmem:[%s4809_s1 + $0x90] sm:$0xff]  }
   0x9   :  { %3204 = vmatpush3.bf16.msra.mxu1 %v3656_v7  ;;  %3141 = vmatprep.subr.bf16.mxu0 %v3657_v8  ;;  %v3673_v24 = vld [vmem:[%s4809_s1 + $0x48] sm:$0xff]   ;;  %v3677_v28 = vld [vmem:[%s4809_s1 + $0x40] sm:$0xff]   ;;  %v3681_v40 = vld [vmem:[%s4809_s1 + $0x178] sm:$0xff]  }
   0xa   :  { %3205 = vmatprep.subr.bf16.mxu1 %v3658_v9  ;;  %v3674_v25 = vld [vmem:[%s4809_s1 + $0xc8] sm:$0xff]   ;;  %v3678_v29 = vld [vmem:[%s4809_s1 + $0xc0] sm:$0xff]   ;;  %v3682_v41 = vld [vmem:[%s4809_s1 + $0x138] sm:$0xff]  }
   0xb   :  { %v3675_v26 = vld [vmem:[%s4809_s1 + $0x8] sm:$0xff]   ;;  %v3679_v30 = vld [vmem:[%s4809_s1] sm:$0xff]   ;;  %v3683_v42 = vld [vmem:[%s4809_s1 + $0x1f8] sm:$0xff]  }
   0xc   :  { %3142 = vmatpush3.bf16.msra.mxu0 %v3659_v10  ;;  %v3676_v27 = vld [vmem:[%s4809_s1 + $0x88] sm:$0xff]   ;;  %v3680_v31 = vld [vmem:[%s4809_s1 + $0x80] sm:$0xff]   ;;  %v3684_v43 = vld [vmem:[%s4809_s1 + $0x1b8] sm:$0xff]  }
   0xd   :  { %3206 = vmatpush3.bf16.msra.mxu1 %v3660_v11  ;;  %3143 = vmatprep.subr.bf16.mxu0 %v3661_v12  ;;  %v15_v32 = vld [vmem:[%s4810_s0] sm:$0xff]  ;;  %v16_v34 = vld [vmem:[%s4810_s0 + $0x8] sm:$0xff]  ;;  %v3685_v50 = vld [vmem:[%s4809_s1 + $0x170] sm:$0xff]  }
   0xe   :  { %3207 = vmatprep.subr.bf16.mxu1 %v3662_v13  ;;  %v23_v33 = vld [vmem:[%s4810_s0 + $0x40] sm:$0xff]  ;;  %v24_v37 = vld [vmem:[%s4810_s0 + $0x48] sm:$0xff]  ;;  %v3686_v52 = vld [vmem:[%s4809_s1 + $0x130] sm:$0xff]  }
   0xf   :  { %v2802_v35 = vcombine.low %v15_v32, %v23_v33  ;;  %v2803_v36 = vcombine.high %v15_v32, %v23_v33  ;;  %v2804_v38 = vcombine.low %v16_v34, %v24_v37  ;;  %v2805_v39 = vcombine.high %v16_v34, %v24_v37  ;;  %v31_v44 = vld [vmem:[%s4810_s0 + $0x80] sm:$0xff]  ;;  %v32_v47 = vld [vmem:[%s4810_s0 + $0x88] sm:$0xff]  ;;  %v3687_v54 = vld [vmem:[%s4809_s1 + $0x1f0] sm:$0xff]  }
  0x10   :  { %3144 = vmatpush3.bf16.msra.mxu0 %v3663_v14  ;;  %v39_v45 = vld [vmem:[%s4810_s0 + $0xc0] sm:$0xff]  ;;  %v40_v48 = vld [vmem:[%s4810_s0 + $0xc8] sm:$0xff]  ;;  %v3688_v55 = vld [vmem:[%s4809_s1 + $0x1b0] sm:$0xff]  }
  0x11   :  { %3208 = vmatpush3.bf16.msra.mxu1 %v3664_v15  ;;  %3145 = vmatprep.subr.bf16.mxu0 %v3665_v16  ;;  %v2819_v46 = vcombine.high %v31_v44, %v39_v45  ;;  %v2821_v49 = vcombine.high %v32_v47, %v40_v48  ;;  %v2818_v51 = vcombine.low %v31_v44, %v39_v45  ;;  %v47_v56 = vld [vmem:[%s4810_s0 + $0x100] sm:$0xff]  ;;  %v48_v58 = vld [vmem:[%s4810_s0 + $0x108] sm:$0xff]  ;;  %v3703_v32 = vld [vmem:[%s4809_s1 + $0x1d0] sm:$0xff]  }
  0x12   :  { %3209 = vmatprep.subr.bf16.mxu1 %v3666_v17  ;;  %1846 = vmatprep.mubr.bf16.mxu0 %v2803_v36  ;;  %v2820_v53 = vcombine.low %v32_v47, %v40_v48  ;;  %v55_v57 = vld [vmem:[%s4810_s0 + $0x140] sm:$0xff]  ;;  %v56_v59 = vld [vmem:[%s4810_s0 + $0x148] sm:$0xff]  ;;  %v3704_v33 = vld [vmem:[%s4809_s1 + $0x190] sm:$0xff]  }
  0x13   :  { %1943 = vmatprep.mubr.bf16.mxu1 %v2805_v39  ;;  %v2835_v60 = vcombine.high %v47_v56, %v55_v57  ;;  %v2837_v61 = vcombine.high %v48_v58, %v56_v59  ;;  %v3689_v62 = vld [vmem:[%s4809_s1 + $0x168] sm:$0xff]   ;;  %v2834_v2 = vcombine.low %v47_v56, %v55_v57  ;;  %v63_v3 = vld [vmem:[%s4810_s0 + $0x180] sm:$0xff]  ;;  %v2836_v6 = vcombine.low %v48_v58, %v56_v59  ;;  %v3713_v56 = vld [vmem:[%s4809_s1 + $0x278] sm:$0xff]  }
  0x14   :  { %3146 = vmatpush3.bf16.msra.mxu0 %v3667_v18  ;;  %v3690_v63 = vld [vmem:[%s4809_s1 + $0x128] sm:$0xff]   ;;  %v71_v4 = vld [vmem:[%s4810_s0 + $0x1c0] sm:$0xff]  ;;  %v3697_v18 = vld [vmem:[%s4809_s1 + $0x158] sm:$0xff]  }
  0x15   :  { %3210 = vmatpush3.bf16.msra.mxu1 %v3668_v19  ;;  %3147 = vmatprep.subr.bf16.mxu0 %v3669_v20  ;;  %v3691_v0 = vld [vmem:[%s4809_s1 + $0x1e8] sm:$0xff]   ;;  %v2851_v7 = vcombine.high %v63_v3, %v71_v4  ;;  %v3693_v10 = vld [vmem:[%s4809_s1 + $0x160] sm:$0xff]   ;;  %v2850_v19 = vcombine.low %v63_v3, %v71_v4  ;;  %v3698_v20 = vld [vmem:[%s4809_s1 + $0x118] sm:$0xff]  }
  0x16   :  { %3211 = vmatprep.subr.bf16.mxu1 %v3670_v21  ;;  %v3692_v1 = vld [vmem:[%s4809_s1 + $0x1a8] sm:$0xff]   ;;  %v3694_v11 = vld [vmem:[%s4809_s1 + $0x120] sm:$0xff]   ;;  %v3715_v58 = vld [vmem:[%s4809_s1 + $0x2f8] sm:$0xff]  }
  0x17   :  { %v64_v5 = vld [vmem:[%s4810_s0 + $0x188] sm:$0xff]  ;;  %v3695_v12 = vld [vmem:[%s4809_s1 + $0x1e0] sm:$0xff]   ;;  %v26_v3 = vld [vmem:[%s4810_s0 + $0x58] sm:$0xff] }
  0x18   :  { %3148 = vmatpush3.bf16.msra.mxu0 %v3671_v22  ;;  %v72_v8 = vld [vmem:[%s4810_s0 + $0x1c8] sm:$0xff]  ;;  %v3696_v13 = vld [vmem:[%s4809_s1 + $0x1a0] sm:$0xff]  }
  0x19   :  { %3212 = vmatpush3.bf16.msra.mxu1 %v3672_v23  ;;  %3149 = vmatprep.subr.bf16.mxu0 %v3673_v24  ;;  %v2853_v9 = vcombine.high %v64_v5, %v72_v8  ;;  %v79_v14 = vld [vmem:[%s4810_s0 + $0x200] sm:$0xff]  ;;  %v80_v16 = vld [vmem:[%s4810_s0 + $0x208] sm:$0xff]  ;;  %v2852_v21 = vcombine.low %v64_v5, %v72_v8  ;;  %v3699_v23 = vld [vmem:[%s4809_s1 + $0x1d8] sm:$0xff]  }
  0x1a   :  { %3213 = vmatprep.subr.bf16.mxu1 %v3674_v25  ;;  %v87_v15 = vld [vmem:[%s4810_s0 + $0x240] sm:$0xff]  ;;  %v88_v17 = vld [vmem:[%s4810_s0 + $0x248] sm:$0xff]  ;;  %v3700_v25 = vld [vmem:[%s4809_s1 + $0x198] sm:$0xff]  }
  0x1b   :  { %v2867_v22 = vcombine.high %v79_v14, %v87_v15  ;;  %v2869_v24 = vcombine.high %v80_v16, %v88_v17  ;;  %v2866_v34 = vcombine.low %v79_v14, %v87_v15  ;;  %v3706_v39 = vld [vmem:[%s4809_s1 + $0x108] sm:$0xff]   ;;  %v3710_v48 = vld [vmem:[%s4809_s1 + $0x100] sm:$0xff]   ;;  %v33_v8 = vld [vmem:[%s4810_s0 + $0x90] sm:$0xff] }
  0x1c   :  { %3150 = vmatpush3.bf16.msra.mxu0 %v3675_v26  ;;  %v95_v26 = vld [vmem:[%s4810_s0 + $0x280] sm:$0xff]  ;;  %v112_v44 = vld [vmem:[%s4810_s0 + $0x308] sm:$0xff]  ;;  %v3716_v15 = vld [vmem:[%s4809_s1 + $0x2b8] sm:$0xff]  }
  0x1d   :  { %3214 = vmatpush3.bf16.msra.mxu1 %v3676_v27  ;;  %3151 = vmatprep.subr.bf16.mxu0 %v3677_v28  ;;  %v103_v27 = vld [vmem:[%s4810_s0 + $0x2c0] sm:$0xff]  ;;  %v3701_v28 = vld [vmem:[%s4809_s1 + $0x150] sm:$0xff]   ;;  %v120_v45 = vld [vmem:[%s4810_s0 + $0x348] sm:$0xff] }
  0x1e   :  { %3215 = vmatprep.subr.bf16.mxu1 %v3678_v29  ;;  %v96_v29 = vld [vmem:[%s4810_s0 + $0x288] sm:$0xff]  ;;  %v2883_v36 = vcombine.high %v95_v26, %v103_v27  ;;  %v2882_v47 = vcombine.low %v95_v26, %v103_v27 }
  0x1f   :  { %v128_v57 = vld [vmem:[%s4810_s0 + $0x388] sm:$0xff] }
  0x20   :  { %3152 = vmatpush3.bf16.msra.mxu0 %v3679_v30  ;;  %v104_v30 = vld [vmem:[%s4810_s0 + $0x2c8] sm:$0xff] }
  0x21   :  { %3216 = vmatpush3.bf16.msra.mxu1 %v3680_v31  ;;  %3265 = vmatprep.subr.bf16.mxu0 %v3681_v40  ;;  %v3702_v31 = vld [vmem:[%s4809_s1 + $0x110] sm:$0xff]   ;;  %v2885_v37 = vcombine.high %v96_v29, %v104_v30  ;;  %v3707_v40 = vld [vmem:[%s4809_s1 + $0x1c8] sm:$0xff]  }
  0x22   :  { %3329 = vmatprep.subr.bf16.mxu1 %v3683_v42  ;;  %v119_v42 = vld [vmem:[%s4810_s0 + $0x340] sm:$0xff]  ;;  %v136_v59 = vld [vmem:[%s4810_s0 + $0x3c8] sm:$0xff] }
  0x23   :  { %1847 = vmatmul.mubr.bf16.vlgmr.msra.gmra.mxu0 %v2802_v35  ;;  %v2868_v35 = vcombine.low %v80_v16, %v88_v17  ;;  %v2916_v5 = vcombine.low %v128_v57, %v136_v59  ;;  %v3717_v17 = vld [vmem:[%s4809_s1 + $0x270] sm:$0xff]   ;;  %v3721_v26 = vld [vmem:[%s4809_s1 + $0x268] sm:$0xff]  }
  0x24   :  { %1944 = vmatmul.mubr.bf16.vlgmr.msra.gmra.mxu1 %v2804_v38  ;;  %3266 = vmatpush3.bf16.msra.mxu0 %v3682_v41  ;;  %v3705_v38 = vld [vmem:[%s4809_s1 + $0x148] sm:$0xff]   ;;  %v111_v41 = vld [vmem:[%s4810_s0 + $0x300] sm:$0xff] }
  0x25   :  { %3330 = vmatpush3.bf16.msra.mxu1 %v3684_v43  ;;  %1854 = vmatprep.mubr.bf16.mxu0 %v2819_v46  ;;  %v3708_v43 = vld [vmem:[%s4809_s1 + $0x188] sm:$0xff]   ;;  %v3709_v46 = vld [vmem:[%s4809_s1 + $0x140] sm:$0xff]  }
  0x26   :  { %1951 = vmatprep.mubr.bf16.mxu1 %v2821_v49  ;;  %3267 = vmatprep.subr.bf16.mxu0 %v3685_v50  ;;  %v2884_v49 = vcombine.low %v96_v29, %v104_v30  ;;  %v2899_v50 = vcombine.high %v111_v41, %v119_v42  ;;  %v3723_v27 = vld [vmem:[%s4809_s1 + $0x2e8] sm:$0xff]  }
  0x27   :  { %3331 = vmatprep.subr.bf16.mxu1 %v3687_v54  ;;  %v127_v54 = vld [vmem:[%s4810_s0 + $0x380] sm:$0xff] }
  0x28   :  { %3268 = vmatpush3.bf16.msra.mxu0 %v3686_v52  ;;  %v2901_v52 = vcombine.high %v112_v44, %v120_v45 }
  0x29   :  { %3332 = vmatpush3.bf16.msra.mxu1 %v3688_v55  ;;  %3269 = vmatprep.subr.bf16.mxu0 %v3689_v62  ;;  %v135_v55 = vld [vmem:[%s4810_s0 + $0x3c0] sm:$0xff] }
  0x2a   :  { %3333 = vmatprep.subr.bf16.mxu1 %v3691_v0  ;;  %v2915_v62 = vcombine.high %v127_v54, %v135_v55  ;;  %v17_v0 = vld [vmem:[%s4810_s0 + $0x10] sm:$0xff]  ;;  %v2914_v4 = vcombine.low %v127_v54, %v135_v55  ;;  %v82_v54 = vld [vmem:[%s4810_s0 + $0x218] sm:$0xff] }
  0x2b   :  { %1855 = vmatmul.mubr.bf16.gmra.mxu0 %v2818_v51  ;;  %v3711_v51 = vld [vmem:[%s4809_s1 + $0x1c0] sm:$0xff]   ;;  %v90_v55 = vld [vmem:[%s4810_s0 + $0x258] sm:$0xff] }
  0x2c   :  { %1952 = vmatmul.mubr.bf16.gmra.mxu1 %v2820_v53  ;;  %1862 = vmatprep.mubr.bf16.mxu0 %v2835_v60  ;;  %v3712_v53 = vld [vmem:[%s4809_s1 + $0x180] sm:$0xff]   ;;  %v2898_v60 = vcombine.low %v111_v41, %v119_v42  ;;  %v3729_v42 = vld [vmem:[%s4809_s1 + $0x258] sm:$0xff]  }
  0x2d   :  { %1959 = vmatprep.mubr.bf16.mxu1 %v2837_v61  ;;  %3270 = vmatpush3.bf16.msra.mxu0 %v3690_v63  ;;  %v2900_v61 = vcombine.low %v112_v44, %v120_v45  ;;  %v2917_v63 = vcombine.high %v128_v57, %v136_v59  ;;  %v3728_v41 = vld [vmem:[%s4809_s1 + $0x2a0] sm:$0xff]   ;;  %v3731_v44 = vld [vmem:[%s4809_s1 + $0x2d8] sm:$0xff]   ;;  %v3736_v57 = vld [vmem:[%s4809_s1 + $0x290] sm:$0xff]  }
  0x2e   :  { %3334 = vmatpush3.bf16.msra.mxu1 %v3692_v1  ;;  %3271 = vmatprep.subr.bf16.mxu0 %v3693_v10  ;;  %v25_v1 = vld [vmem:[%s4810_s0 + $0x50] sm:$0xff] }
  0x2f   :  { %3335 = vmatprep.subr.bf16.mxu1 %v3695_v12  ;;  %v2806_v10 = vcombine.low %v17_v0, %v25_v1  ;;  %v34_v12 = vld [vmem:[%s4810_s0 + $0x98] sm:$0xff] }
  0x31   :  { %3272 = vmatpush3.bf16.msra.mxu0 %v3694_v11  ;;  %v3714_v11 = vld [vmem:[%s4809_s1 + $0x238] sm:$0xff]  }
  0x32   :  { %3336 = vmatpush3.bf16.msra.mxu1 %v3696_v13  ;;  %3273 = vmatprep.subr.bf16.mxu0 %v3697_v18  ;;  %v42_v13 = vld [vmem:[%s4810_s0 + $0xd8] sm:$0xff] }
  0x33   :  { %1863 = vmatmul.mubr.bf16.gmra.mxu0 %v2834_v2  ;;  %3337 = vmatprep.subr.bf16.mxu1 %v3699_v23  ;;  %v18_v2 = vld [vmem:[%s4810_s0 + $0x18] sm:$0xff]  ;;  %v2825_v18 = vcombine.high %v34_v12, %v42_v13  ;;  %v57_v23 = vld [vmem:[%s4810_s0 + $0x150] sm:$0xff]  ;;  %v2824_v29 = vcombine.low %v34_v12, %v42_v13  ;;  %v2872_v13 = vcombine.low %v82_v54, %v90_v55 }
  0x34   :  { %1960 = vmatmul.mubr.bf16.gmra.mxu1 %v2836_v6  ;;  %1870 = vmatprep.mubr.bf16.mxu0 %v2851_v7  ;;  %v2807_v6 = vcombine.high %v17_v0, %v25_v1  ;;  %v2809_v7 = vcombine.high %v18_v2, %v26_v3  ;;  %v2808_v14 = vcombine.low %v18_v2, %v26_v3  ;;  %v3738_v0 = vld [vmem:[%s4809_s1 + $0x208] sm:$0xff]   ;;  %v3741_v2 = vld [vmem:[%s4809_s1 + $0x240] sm:$0xff]   ;;  %v97_v3 = vld [vmem:[%s4810_s0 + $0x290] sm:$0xff] }
  0x35   :  { %1967 = vmatprep.mubr.bf16.mxu1 %v2853_v9  ;;  %3274 = vmatpush3.bf16.msra.mxu0 %v3698_v20  ;;  %v41_v9 = vld [vmem:[%s4810_s0 + $0xd0] sm:$0xff]  ;;  %v3740_v1 = vld [vmem:[%s4809_s1 + $0x288] sm:$0xff]   ;;  %v3747_v12 = vld [vmem:[%s4809_s1 + $0x3f8] sm:$0xff]  }
  0x36   :  { %3338 = vmatpush3.bf16.msra.mxu1 %v3700_v25  ;;  %3275 = vmatprep.subr.bf16.mxu0 %v3701_v28  ;;  %v2823_v16 = vcombine.high %v33_v8, %v41_v9  ;;  %v3719_v20 = vld [vmem:[%s4809_s1 + $0x2f0] sm:$0xff]   ;;  %v58_v25 = vld [vmem:[%s4810_s0 + $0x158] sm:$0xff]  ;;  %v2822_v28 = vcombine.low %v33_v8, %v41_v9  ;;  %v3742_v8 = vld [vmem:[%s4809_s1 + $0x200] sm:$0xff]  }
  0x37   :  { %3339 = vmatprep.subr.bf16.mxu1 %v3703_v32  ;;  %v3722_v32 = vld [vmem:[%s4809_s1 + $0x228] sm:$0xff]   ;;  %v3744_v9 = vld [vmem:[%s4809_s1 + $0x280] sm:$0xff]  }
  0x39   :  { %3276 = vmatpush3.bf16.msra.mxu0 %v3702_v31 }
  0x3a   :  { %3340 = vmatpush3.bf16.msra.mxu1 %v3704_v33  ;;  %3277 = vmatprep.subr.bf16.mxu0 %v3705_v38  ;;  %v3724_v33 = vld [vmem:[%s4809_s1 + $0x2a8] sm:$0xff]   ;;  %v66_v38 = vld [vmem:[%s4810_s0 + $0x198] sm:$0xff] }
  0x3b   :  { %1871 = vmatmul.mubr.bf16.gmra.mxu0 %v2850_v19  ;;  %3341 = vmatprep.subr.bf16.mxu1 %v3707_v40  ;;  %v3718_v19 = vld [vmem:[%s4809_s1 + $0x230] sm:$0xff]   ;;  %v3726_v40 = vld [vmem:[%s4809_s1 + $0x220] sm:$0xff]  }
  0x3c   :  { %1968 = vmatmul.mubr.bf16.gmra.mxu1 %v2852_v21  ;;  %1878 = vmatprep.mubr.bf16.mxu0 %v2867_v22  ;;  %v3720_v21 = vld [vmem:[%s4809_s1 + $0x2b0] sm:$0xff]  }
  0x3d   :  { %1975 = vmatprep.mubr.bf16.mxu1 %v2869_v24  ;;  %3278 = vmatpush3.bf16.msra.mxu0 %v3706_v39  ;;  %v49_v22 = vld [vmem:[%s4810_s0 + $0x110] sm:$0xff]  ;;  %v50_v24 = vld [vmem:[%s4810_s0 + $0x118] sm:$0xff] }
  0x3e   :  { %3342 = vmatpush3.bf16.msra.mxu1 %v3708_v43  ;;  %3279 = vmatprep.subr.bf16.mxu0 %v3709_v46  ;;  %v2839_v30 = vcombine.high %v49_v22, %v57_v23  ;;  %v2841_v31 = vcombine.high %v50_v24, %v58_v25  ;;  %v74_v39 = vld [vmem:[%s4810_s0 + $0x1d8] sm:$0xff]  ;;  %v2838_v43 = vcombine.low %v49_v22, %v57_v23 }
  0x3f   :  { %3343 = vmatprep.subr.bf16.mxu1 %v3711_v51  ;;  %v2840_v45 = vcombine.low %v50_v24, %v58_v25  ;;  %v81_v51 = vld [vmem:[%s4810_s0 + $0x210] sm:$0xff] }
  0x40   :  { %v129_v24 = vld [vmem:[%s4810_s0 + $0x390] sm:$0xff] }
  0x41   :  { %3280 = vmatpush3.bf16.msra.mxu0 %v3710_v48  ;;  %v2857_v48 = vcombine.high %v66_v38, %v74_v39  ;;  %v137_v25 = vld [vmem:[%s4810_s0 + $0x3d0] sm:$0xff] }
  0x42   :  { %3344 = vmatpush3.bf16.msra.mxu1 %v3712_v53  ;;  %3393 = vmatprep.subr.bf16.mxu0 %v3713_v56  ;;  %v89_v53 = vld [vmem:[%s4810_s0 + $0x250] sm:$0xff] }
  0x43   :  { %1879 = vmatmul.mubr.bf16.gmra.mxu0 %v2866_v34  ;;  %3457 = vmatprep.subr.bf16.mxu1 %v3715_v58  ;;  %v3725_v34 = vld [vmem:[%s4809_s1 + $0x260] sm:$0xff]   ;;  %v3734_v56 = vld [vmem:[%s4809_s1 + $0x210] sm:$0xff]   ;;  %v3737_v58 = vld [vmem:[%s4809_s1 + $0x248] sm:$0xff]  }
  0x44   :  { %1976 = vmatmul.mubr.bf16.gmra.mxu1 %v2868_v35  ;;  %1886 = vmatprep.mubr.bf16.mxu0 %v2883_v36  ;;  %v65_v35 = vld [vmem:[%s4810_s0 + $0x190] sm:$0xff] }
  0x45   :  { %1983 = vmatprep.mubr.bf16.mxu1 %v2885_v37  ;;  %v73_v36 = vld [vmem:[%s4810_s0 + $0x1d0] sm:$0xff]  ;;  %v3727_v37 = vld [vmem:[%s4809_s1 + $0x2e0] sm:$0xff]  }
  0x46   :  { %v2855_v46 = vcombine.high %v65_v35, %v73_v36  ;;  %v2854_v59 = vcombine.low %v65_v35, %v73_v36  ;;  %v28_v35 = vld [vmem:[%s4810_s0 + $0x68] sm:$0xff]  ;;  %v2918_v36 = vcombine.low %v129_v24, %v137_v25 }
  0x4b   :  { %1887 = vmatmul.mubr.bf16.gmra.mxu0 %v2882_v47  ;;  %v3730_v47 = vld [vmem:[%s4809_s1 + $0x218] sm:$0xff]  }
  0x4c   :  { %1984 = vmatmul.mubr.bf16.gmra.mxu1 %v2884_v49  ;;  %1894 = vmatprep.mubr.bf16.mxu0 %v2899_v50  ;;  %v3732_v49 = vld [vmem:[%s4809_s1 + $0x298] sm:$0xff]   ;;  %v3733_v50 = vld [vmem:[%s4809_s1 + $0x250] sm:$0xff]  }
  0x4d   :  { %1991 = vmatprep.mubr.bf16.mxu1 %v2901_v52  ;;  %v3735_v52 = vld [vmem:[%s4809_s1 + $0x2d0] sm:$0xff]  }
  0x53   :  { %1895 = vmatmul.mubr.bf16.gmra.mxu0 %v2898_v60  ;;  %v3739_v60 = vld [vmem:[%s4809_s1 + $0x2c8] sm:$0xff]  }
  0x54   :  { %1992 = vmatmul.mubr.bf16.gmra.mxu1 %v2900_v61  ;;  %1902 = vmatprep.mubr.bf16.mxu0 %v2915_v62  ;;  %v2856_v61 = vcombine.low %v66_v38, %v74_v39  ;;  %v2871_v62 = vcombine.high %v81_v51, %v89_v53 }
  0x55   :  { %1999 = vmatprep.mubr.bf16.mxu1 %v2917_v63  ;;  %v2873_v63 = vcombine.high %v82_v54, %v90_v55  ;;  %v51_v54 = vld [vmem:[%s4810_s0 + $0x120] sm:$0xff] }
  0x56   :  { %v59_v55 = vld [vmem:[%s4810_s0 + $0x160] sm:$0xff] }
  0x5b   :  { %1903 = vmatmul.mubr.bf16.gmra.mxu0 %v2914_v4  ;;  %v105_v4 = vld [vmem:[%s4810_s0 + $0x2d0] sm:$0xff] }
  0x5c   :  { %2000 = vmatmul.mubr.bf16.gmra.mxu1 %v2916_v5  ;;  %2040 = vmatprep.mubr.bf16.mxu0 %v2807_v6  ;;  %v3743_v5 = vld [vmem:[%s4809_s1 + $0x2c0] sm:$0xff]   ;;  %v98_v6 = vld [vmem:[%s4810_s0 + $0x298] sm:$0xff] }
  0x5d   :  { %2137 = vmatprep.mubr.bf16.mxu1 %v2809_v7  ;;  %v106_v7 = vld [vmem:[%s4810_s0 + $0x2d8] sm:$0xff] }
  0x63   :  { %2041 = vmatmul.mubr.bf16.vlgmr.msra.gmra.mxu0 %v2806_v10  ;;  %v3745_v10 = vld [vmem:[%s4809_s1 + $0x378] sm:$0xff]  }
  0x64   :  { %2138 = vmatmul.mubr.bf16.vlgmr.msra.gmra.mxu1 %v2808_v14  ;;  %3394 = vmatpush3.bf16.msra.mxu0 %v3714_v11  ;;  %v2870_v11 = vcombine.low %v81_v51, %v89_v53  ;;  %v2887_v14 = vcombine.high %v97_v3, %v105_v4  ;;  %v3751_v51 = vld [vmem:[%s4809_s1 + $0x3f0] sm:$0xff]  }
  0x65   :  { %3458 = vmatpush3.bf16.msra.mxu1 %v3716_v15  ;;  %2048 = vmatprep.mubr.bf16.mxu0 %v2823_v16  ;;  %v2889_v15 = vcombine.high %v98_v6, %v106_v7  ;;  %v113_v16 = vld [vmem:[%s4810_s0 + $0x310] sm:$0xff] }
  0x66   :  { %2145 = vmatprep.mubr.bf16.mxu1 %v2825_v18  ;;  %3395 = vmatprep.subr.bf16.mxu0 %v3717_v17  ;;  %v121_v17 = vld [vmem:[%s4810_s0 + $0x350] sm:$0xff]  ;;  %v114_v18 = vld [vmem:[%s4810_s0 + $0x318] sm:$0xff] }
  0x67   :  { %3459 = vmatprep.subr.bf16.mxu1 %v3719_v20  ;;  %v2886_v20 = vcombine.low %v97_v3, %v105_v4  ;;  %v2903_v22 = vcombine.high %v113_v16, %v121_v17  ;;  %v3752_v53 = vld [vmem:[%s4809_s1 + $0x3b0] sm:$0xff]   ;;  %v3759_v3 = vld [vmem:[%s4809_s1 + $0x3e0] sm:$0xff]  }
  0x68   :  { %3396 = vmatpush3.bf16.msra.mxu0 %v3718_v19  ;;  %v122_v19 = vld [vmem:[%s4810_s0 + $0x358] sm:$0xff]  ;;  %v67_v4 = vld [vmem:[%s4810_s0 + $0x1a0] sm:$0xff] }
  0x69   :  { %3460 = vmatpush3.bf16.msra.mxu1 %v3720_v21  ;;  %3397 = vmatprep.subr.bf16.mxu0 %v3721_v26  ;;  %v2888_v21 = vcombine.low %v98_v6, %v106_v7  ;;  %v2905_v23 = vcombine.high %v114_v18, %v122_v19  ;;  %v130_v26 = vld [vmem:[%s4810_s0 + $0x398] sm:$0xff]  ;;  %v68_v6 = vld [vmem:[%s4810_s0 + $0x1a8] sm:$0xff]  ;;  %v3758_v7 = vld [vmem:[%s4809_s1 + $0x320] sm:$0xff]  }
  0x6a   :  { %3461 = vmatprep.subr.bf16.mxu1 %v3723_v27  ;;  %v138_v27 = vld [vmem:[%s4810_s0 + $0x3d8] sm:$0xff] }
  0x6b   :  { %2049 = vmatmul.mubr.bf16.gmra.mxu0 %v2822_v28  ;;  %v2902_v28 = vcombine.low %v113_v16, %v121_v17  ;;  %v3762_v16 = vld [vmem:[%s4809_s1 + $0x318] sm:$0xff]  }
  0x6c   :  { %2146 = vmatmul.mubr.bf16.gmra.mxu1 %v2824_v29  ;;  %2056 = vmatprep.mubr.bf16.mxu0 %v2839_v30  ;;  %v2904_v29 = vcombine.low %v114_v18, %v122_v19  ;;  %v2919_v30 = vcombine.high %v129_v24, %v137_v25  ;;  %v3764_v17 = vld [vmem:[%s4809_s1 + $0x398] sm:$0xff]   ;;  %v3765_v18 = vld [vmem:[%s4809_s1 + $0x350] sm:$0xff]   ;;  %v92_v24 = vld [vmem:[%s4810_s0 + $0x268] sm:$0xff] }
  0x6d   :  { %2153 = vmatprep.mubr.bf16.mxu1 %v2841_v31  ;;  %3398 = vmatpush3.bf16.msra.mxu0 %v3722_v32  ;;  %v2921_v31 = vcombine.high %v130_v26, %v138_v27  ;;  %v19_v32 = vld [vmem:[%s4810_s0 + $0x20] sm:$0xff]  ;;  %v3767_v19 = vld [vmem:[%s4809_s1 + $0x3d0] sm:$0xff]  }
  0x6e   :  { %3462 = vmatpush3.bf16.msra.mxu1 %v3724_v33  ;;  %3399 = vmatprep.subr.bf16.mxu0 %v3725_v34  ;;  %v27_v33 = vld [vmem:[%s4810_s0 + $0x60] sm:$0xff]  ;;  %v20_v34 = vld [vmem:[%s4810_s0 + $0x28] sm:$0xff]  ;;  %v3768_v25 = vld [vmem:[%s4809_s1 + $0x390] sm:$0xff]  }
  0x6f   :  { %3463 = vmatprep.subr.bf16.mxu1 %v3727_v37  ;;  %v2920_v37 = vcombine.low %v130_v26, %v138_v27  ;;  %v2811_v38 = vcombine.high %v19_v32, %v27_v33  ;;  %v2813_v39 = vcombine.high %v20_v34, %v28_v35  ;;  %v3769_v26 = vld [vmem:[%s4809_s1 + $0x348] sm:$0xff]  }
  0x71   :  { %3400 = vmatpush3.bf16.msra.mxu0 %v3726_v40  ;;  %v35_v40 = vld [vmem:[%s4810_s0 + $0xa0] sm:$0xff] }
  0x72   :  { %3464 = vmatpush3.bf16.msra.mxu1 %v3728_v41  ;;  %3401 = vmatprep.subr.bf16.mxu0 %v3729_v42  ;;  %v43_v41 = vld [vmem:[%s4810_s0 + $0xe0] sm:$0xff]  ;;  %v2810_v42 = vcombine.low %v19_v32, %v27_v33  ;;  %v3770_v32 = vld [vmem:[%s4809_s1 + $0x308] sm:$0xff]  }
  0x73   :  { %2057 = vmatmul.mubr.bf16.gmra.mxu0 %v2838_v43  ;;  %3465 = vmatprep.subr.bf16.mxu1 %v3731_v44  ;;  %v36_v43 = vld [vmem:[%s4810_s0 + $0xa8] sm:$0xff] }
  0x74   :  { %2154 = vmatmul.mubr.bf16.gmra.mxu1 %v2840_v45  ;;  %2064 = vmatprep.mubr.bf16.mxu0 %v2855_v46  ;;  %v44_v44 = vld [vmem:[%s4810_s0 + $0xe8] sm:$0xff]  ;;  %v2812_v45 = vcombine.low %v20_v34, %v28_v35  ;;  %v3746_v46 = vld [vmem:[%s4809_s1 + $0x338] sm:$0xff]   ;;  %v3773_v34 = vld [vmem:[%s4809_s1 + $0x340] sm:$0xff]  }
  0x75   :  { %2161 = vmatprep.mubr.bf16.mxu1 %v2857_v48  ;;  %3402 = vmatpush3.bf16.msra.mxu0 %v3730_v47  ;;  %v3748_v47 = vld [vmem:[%s4809_s1 + $0x3b8] sm:$0xff]   ;;  %v2827_v48 = vcombine.high %v35_v40, %v43_v41  ;;  %v3772_v33 = vld [vmem:[%s4809_s1 + $0x388] sm:$0xff]   ;;  %v3775_v35 = vld [vmem:[%s4809_s1 + $0x3c0] sm:$0xff]  }
  0x76   :  { %3466 = vmatpush3.bf16.msra.mxu1 %v3732_v49  ;;  %3403 = vmatprep.subr.bf16.mxu0 %v3733_v50  ;;  %v2829_v49 = vcombine.high %v36_v43, %v44_v44  ;;  %v3749_v50 = vld [vmem:[%s4809_s1 + $0x370] sm:$0xff]  }
  0x77   :  { %3467 = vmatprep.subr.bf16.mxu1 %v3735_v52  ;;  %v3750_v52 = vld [vmem:[%s4809_s1 + $0x330] sm:$0xff]  }
  0x79   :  { %3404 = vmatpush3.bf16.msra.mxu0 %v3734_v56  ;;  %v3753_v56 = vld [vmem:[%s4809_s1 + $0x368] sm:$0xff]  }
  0x7a   :  { %3468 = vmatpush3.bf16.msra.mxu1 %v3736_v57  ;;  %3405 = vmatprep.subr.bf16.mxu0 %v3737_v58  ;;  %v52_v57 = vld [vmem:[%s4810_s0 + $0x128] sm:$0xff] }
  0x7b   :  { %2065 = vmatmul.mubr.bf16.gmra.mxu0 %v2854_v59  ;;  %3469 = vmatprep.subr.bf16.mxu1 %v3739_v60  ;;  %v60_v58 = vld [vmem:[%s4810_s0 + $0x168] sm:$0xff]  ;;  %v2826_v60 = vcombine.low %v35_v40, %v43_v41  ;;  %v3776_v41 = vld [vmem:[%s4809_s1 + $0x380] sm:$0xff]  }
  0x7c   :  { %2162 = vmatmul.mubr.bf16.gmra.mxu1 %v2856_v61  ;;  %2072 = vmatprep.mubr.bf16.mxu0 %v2871_v62  ;;  %v3755_v59 = vld [vmem:[%s4809_s1 + $0x3e8] sm:$0xff]   ;;  %v2828_v61 = vcombine.low %v36_v43, %v44_v44  ;;  %v2843_v62 = vcombine.high %v51_v54, %v59_v55 }
  0x7d   :  { %2169 = vmatprep.mubr.bf16.mxu1 %v2873_v63  ;;  %3406 = vmatpush3.bf16.msra.mxu0 %v3738_v0  ;;  %v2845_v63 = vcombine.high %v52_v57, %v60_v58  ;;  %v3754_v0 = vld [vmem:[%s4809_s1 + $0x328] sm:$0xff]  }
  0x7e   :  { %3470 = vmatpush3.bf16.msra.mxu1 %v3740_v1  ;;  %3407 = vmatprep.subr.bf16.mxu0 %v3741_v2  ;;  %v3756_v1 = vld [vmem:[%s4809_s1 + $0x3a8] sm:$0xff]   ;;  %v3757_v2 = vld [vmem:[%s4809_s1 + $0x360] sm:$0xff]  }
  0x7f   :  { %3471 = vmatprep.subr.bf16.mxu1 %v3743_v5  ;;  %v75_v5 = vld [vmem:[%s4810_s0 + $0x1e0] sm:$0xff]  ;;  %v108_v40 = vld [vmem:[%s4810_s0 + $0x2e8] sm:$0xff] }
  0x80   :  { %v2858_v27 = vcombine.low %v67_v4, %v75_v5 }
  0x81   :  { %3408 = vmatpush3.bf16.msra.mxu0 %v3742_v8  ;;  %v76_v8 = vld [vmem:[%s4810_s0 + $0x1e8] sm:$0xff] }
  0x82   :  { %3472 = vmatpush3.bf16.msra.mxu1 %v3744_v9  ;;  %3521 = vmatprep.subr.bf16.mxu0 %v3745_v10  ;;  %v3760_v9 = vld [vmem:[%s4809_s1 + $0x3a0] sm:$0xff]   ;;  %v3761_v10 = vld [vmem:[%s4809_s1 + $0x358] sm:$0xff]  }
  0x83   :  { %2073 = vmatmul.mubr.bf16.gmra.mxu0 %v2870_v11  ;;  %3585 = vmatprep.subr.bf16.mxu1 %v3747_v12  ;;  %v2842_v11 = vcombine.low %v51_v54, %v59_v55  ;;  %v3763_v12 = vld [vmem:[%s4809_s1 + $0x3d8] sm:$0xff]   ;;  %v131_v54 = vld [vmem:[%s4810_s0 + $0x3a0] sm:$0xff] }
  0x84   :  { %2170 = vmatmul.mubr.bf16.gmra.mxu1 %v2872_v13  ;;  %2080 = vmatprep.mubr.bf16.mxu0 %v2887_v14  ;;  %v2844_v13 = vcombine.low %v52_v57, %v60_v58  ;;  %v2859_v14 = vcombine.high %v67_v4, %v75_v5  ;;  %v139_v55 = vld [vmem:[%s4810_s0 + $0x3e0] sm:$0xff]  ;;  %v140_v57 = vld [vmem:[%s4810_s0 + $0x3e8] sm:$0xff] }
  0x85   :  { %2177 = vmatprep.mubr.bf16.mxu1 %v2889_v15  ;;  %v2861_v15 = vcombine.high %v68_v6, %v76_v8 }
  0x8b   :  { %2081 = vmatmul.mubr.bf16.gmra.mxu0 %v2886_v20  ;;  %v83_v20 = vld [vmem:[%s4810_s0 + $0x220] sm:$0xff] }
  0x8c   :  { %2178 = vmatmul.mubr.bf16.gmra.mxu1 %v2888_v21  ;;  %2088 = vmatprep.mubr.bf16.mxu0 %v2903_v22  ;;  %v91_v21 = vld [vmem:[%s4810_s0 + $0x260] sm:$0xff]  ;;  %v84_v22 = vld [vmem:[%s4810_s0 + $0x228] sm:$0xff] }
  0x8d   :  { %2185 = vmatprep.mubr.bf16.mxu1 %v2905_v23  ;;  %v3766_v23 = vld [vmem:[%s4809_s1 + $0x310] sm:$0xff]   ;;  %v2876_v43 = vcombine.low %v84_v22, %v92_v24 }
  0x93   :  { %2089 = vmatmul.mubr.bf16.gmra.mxu0 %v2902_v28  ;;  %v3771_v28 = vld [vmem:[%s4809_s1 + $0x3c8] sm:$0xff]  }
  0x94   :  { %2186 = vmatmul.mubr.bf16.gmra.mxu1 %v2904_v29  ;;  %2096 = vmatprep.mubr.bf16.mxu0 %v2919_v30  ;;  %v2860_v29 = vcombine.low %v68_v6, %v76_v8  ;;  %v2875_v30 = vcombine.high %v83_v20, %v91_v21  ;;  %v37_v6 = vld [vmem:[%s4810_s0 + $0xb0] sm:$0xff]  ;;  %v38_v8 = vld [vmem:[%s4810_s0 + $0xb8] sm:$0xff] }
  0x95   :  { %2193 = vmatprep.mubr.bf16.mxu1 %v2921_v31  ;;  %v2877_v31 = vcombine.high %v84_v22, %v92_v24  ;;  %v54_v22 = vld [vmem:[%s4810_s0 + $0x138] sm:$0xff] }
  0x9b   :  { %2097 = vmatmul.mubr.bf16.gmra.mxu0 %v2918_v36  ;;  %v99_v36 = vld [vmem:[%s4810_s0 + $0x2a0] sm:$0xff] }
  0x9c   :  { %2194 = vmatmul.mubr.bf16.gmra.mxu1 %v2920_v37  ;;  %2234 = vmatprep.mubr.bf16.mxu0 %v2811_v38  ;;  %v107_v37 = vld [vmem:[%s4810_s0 + $0x2e0] sm:$0xff] }
  0x9d   :  { %2331 = vmatprep.mubr.bf16.mxu1 %v2813_v39  ;;  %v3774_v38 = vld [vmem:[%s4809_s1 + $0x300] sm:$0xff]   ;;  %v100_v39 = vld [vmem:[%s4810_s0 + $0x2a8] sm:$0xff]  ;;  %v2891_v44 = vcombine.high %v99_v36, %v107_v37 }
  0xa3   :  { %2235 = vmatmul.mubr.bf16.vlgmr.msra.gmra.mxu0 %v2810_v42  ;;  %v2874_v42 = vcombine.low %v83_v20, %v91_v21 }
  0xa4   :  { %2332 = vmatmul.mubr.bf16.vlgmr.msra.gmra.mxu1 %v2812_v45  ;;  %3522 = vmatpush3.bf16.msra.mxu0 %v3746_v46  ;;  %v2893_v45 = vcombine.high %v100_v39, %v108_v40  ;;  %v115_v46 = vld [vmem:[%s4810_s0 + $0x320] sm:$0xff] }
  0xa5   :  { %3586 = vmatpush3.bf16.msra.mxu1 %v3748_v47  ;;  %2242 = vmatprep.mubr.bf16.mxu0 %v2827_v48  ;;  %v123_v47 = vld [vmem:[%s4810_s0 + $0x360] sm:$0xff]  ;;  %v116_v48 = vld [vmem:[%s4810_s0 + $0x328] sm:$0xff] }
  0xa6   :  { %2339 = vmatprep.mubr.bf16.mxu1 %v2829_v49  ;;  %3523 = vmatprep.subr.bf16.mxu0 %v3749_v50  ;;  %v124_v49 = vld [vmem:[%s4810_s0 + $0x368] sm:$0xff]  ;;  %v2890_v50 = vcombine.low %v99_v36, %v107_v37  ;;  %v2906_v58 = vcombine.low %v115_v46, %v123_v47 }
  0xa7   :  { %3587 = vmatprep.subr.bf16.mxu1 %v3751_v51  ;;  %v2892_v51 = vcombine.low %v100_v39, %v108_v40 }
  0xa8   :  { %3524 = vmatpush3.bf16.msra.mxu0 %v3750_v52  ;;  %v2907_v52 = vcombine.high %v115_v46, %v123_v47  ;;  %v70_v46 = vld [vmem:[%s4810_s0 + $0x1b8] sm:$0xff] }
  0xa9   :  { %3588 = vmatpush3.bf16.msra.mxu1 %v3752_v53  ;;  %3525 = vmatprep.subr.bf16.mxu0 %v3753_v56  ;;  %v2909_v53 = vcombine.high %v116_v48, %v124_v49  ;;  %v132_v56 = vld [vmem:[%s4810_s0 + $0x3a8] sm:$0xff]  ;;  %v78_v47 = vld [vmem:[%s4810_s0 + $0x1f8] sm:$0xff] }
  0xaa   :  { %3589 = vmatprep.subr.bf16.mxu1 %v3755_v59  ;;  %v2908_v59 = vcombine.low %v116_v48, %v124_v49 }
  0xab   :  { %2243 = vmatmul.mubr.bf16.gmra.mxu0 %v2826_v60  ;;  %v2923_v60 = vcombine.high %v131_v54, %v139_v55 }
  0xac   :  { %2340 = vmatmul.mubr.bf16.gmra.mxu1 %v2828_v61  ;;  %2250 = vmatprep.mubr.bf16.mxu0 %v2843_v62  ;;  %v2925_v61 = vcombine.high %v132_v56, %v140_v57  ;;  %v21_v62 = vld [vmem:[%s4810_s0 + $0x30] sm:$0xff] }
  0xad   :  { %2347 = vmatprep.mubr.bf16.mxu1 %v2845_v63  ;;  %3526 = vmatpush3.bf16.msra.mxu0 %v3754_v0  ;;  %v29_v63 = vld [vmem:[%s4810_s0 + $0x70] sm:$0xff]  ;;  %v22_v0 = vld [vmem:[%s4810_s0 + $0x38] sm:$0xff] }
  0xae   :  { %3590 = vmatpush3.bf16.msra.mxu1 %v3756_v1  ;;  %3527 = vmatprep.subr.bf16.mxu0 %v3757_v2  ;;  %v30_v1 = vld [vmem:[%s4810_s0 + $0x78] sm:$0xff]  ;;  %v2922_v2 = vcombine.low %v131_v54, %v139_v55  ;;  %v2815_v4 = vcombine.high %v21_v62, %v29_v63 }
  0xaf   :  { %3591 = vmatprep.subr.bf16.mxu1 %v3759_v3  ;;  %v2924_v3 = vcombine.low %v132_v56, %v140_v57  ;;  %v2817_v5 = vcombine.high %v22_v0, %v30_v1  ;;  %v2865_v56 = vcombine.high %v70_v46, %v78_v47 }
  0xb1   :  { %3528 = vmatpush3.bf16.msra.mxu0 %v3758_v7  ;;  %v45_v7 = vld [vmem:[%s4810_s0 + $0xf0] sm:$0xff] }
  0xb2   :  { %3592 = vmatpush3.bf16.msra.mxu1 %v3760_v9  ;;  %3529 = vmatprep.subr.bf16.mxu0 %v3761_v10  ;;  %v46_v9 = vld [vmem:[%s4810_s0 + $0xf8] sm:$0xff]  ;;  %v2814_v10 = vcombine.low %v21_v62, %v29_v63 }
  0xb3   :  { %2251 = vmatmul.mubr.bf16.gmra.mxu0 %v2842_v11  ;;  %3593 = vmatprep.subr.bf16.mxu1 %v3763_v12  ;;  %v2816_v11 = vcombine.low %v22_v0, %v30_v1  ;;  %v2831_v12 = vcombine.high %v37_v6, %v45_v7  ;;  %v85_v1 = vld [vmem:[%s4810_s0 + $0x230] sm:$0xff] }
  0xb4   :  { %2348 = vmatmul.mubr.bf16.gmra.mxu1 %v2844_v13  ;;  %2258 = vmatprep.mubr.bf16.mxu0 %v2859_v14  ;;  %v2833_v13 = vcombine.high %v38_v8, %v46_v9 }
  0xb5   :  { %2355 = vmatprep.mubr.bf16.mxu1 %v2861_v15  ;;  %3530 = vmatpush3.bf16.msra.mxu0 %v3762_v16  ;;  %v4498_v16 = vld [vmem:[%s4811_s2] ss:$0 sm:$0xff] }
  0xb6   :  { %3594 = vmatpush3.bf16.msra.mxu1 %v3764_v17  ;;  %3531 = vmatprep.subr.bf16.mxu0 %v3765_v18  ;;  %v53_v18 = vld [vmem:[%s4810_s0 + $0x130] sm:$0xff] }
  0xb7   :  { %3595 = vmatprep.subr.bf16.mxu1 %v3767_v19  ;;  %v61_v19 = vld [vmem:[%s4810_s0 + $0x170] sm:$0xff] }
  0xb9   :  { %3532 = vmatpush3.bf16.msra.mxu0 %v3766_v23  ;;  %v62_v23 = vld [vmem:[%s4810_s0 + $0x178] sm:$0xff] }
  0xba   :  { %3596 = vmatpush3.bf16.msra.mxu1 %v3768_v25  ;;  %3533 = vmatprep.subr.bf16.mxu0 %v3769_v26  ;;  %v2830_v26 = vcombine.low %v37_v6, %v45_v7  ;;  %v86_v6 = vld [vmem:[%s4810_s0 + $0x238] sm:$0xff] }
  0xbb   :  { %2259 = vmatmul.mubr.bf16.gmra.mxu0 %v2858_v27  ;;  %3597 = vmatprep.subr.bf16.mxu1 %v3771_v28  ;;  %v94_v7 = vld [vmem:[%s4810_s0 + $0x278] sm:$0xff] }
  0xbc   :  { %2356 = vmatmul.mubr.bf16.gmra.mxu1 %v2860_v29  ;;  %2266 = vmatprep.mubr.bf16.mxu0 %v2875_v30  ;;  %v2832_v29 = vcombine.low %v38_v8, %v46_v9  ;;  %v2847_v30 = vcombine.high %v53_v18, %v61_v19 }
  0xbd   :  { %2363 = vmatprep.mubr.bf16.mxu1 %v2877_v31  ;;  %3534 = vmatpush3.bf16.msra.mxu0 %v3770_v32  ;;  %v2849_v32 = vcombine.high %v54_v22, %v62_v23 }
  0xbe   :  { %3598 = vmatpush3.bf16.msra.mxu1 %v3772_v33  ;;  %3535 = vmatprep.subr.bf16.mxu0 %v3773_v34 }
  0xbf   :  { %3599 = vmatprep.subr.bf16.mxu1 %v3775_v35 }
  0xc1   :  { %3536 = vmatpush3.bf16.msra.mxu0 %v3774_v38 }
  0xc2   :  { %3600 = vmatpush3.bf16.msra.mxu1 %v3776_v41  ;;  %v69_v41 = vld [vmem:[%s4810_s0 + $0x1b0] sm:$0xff] }
  0xc3   :  { %2267 = vmatmul.mubr.bf16.gmra.mxu0 %v2874_v42  ;;  %v77_v42 = vld [vmem:[%s4810_s0 + $0x1f0] sm:$0xff] }
  0xc4   :  { %2364 = vmatmul.mubr.bf16.gmra.mxu1 %v2876_v43  ;;  %2274 = vmatprep.mubr.bf16.mxu0 %v2891_v44  ;;  %v2863_v54 = vcombine.high %v69_v41, %v77_v42 }
  0xc5   :  { %2371 = vmatprep.mubr.bf16.mxu1 %v2893_v45 }
  0xcb   :  { %2275 = vmatmul.mubr.bf16.gmra.mxu0 %v2890_v50  ;;  %v2846_v50 = vcombine.low %v53_v18, %v61_v19 }
  0xcc   :  { %2372 = vmatmul.mubr.bf16.gmra.mxu1 %v2892_v51  ;;  %2282 = vmatprep.mubr.bf16.mxu0 %v2907_v52 }
  0xcd   :  { %2379 = vmatprep.mubr.bf16.mxu1 %v2909_v53  ;;  %v2848_v53 = vcombine.low %v54_v22, %v62_v23 }
  0xd3   :  { %2283 = vmatmul.mubr.bf16.gmra.mxu0 %v2906_v58 }
  0xd4   :  { %2380 = vmatmul.mubr.bf16.gmra.mxu1 %v2908_v59  ;;  %2290 = vmatprep.mubr.bf16.mxu0 %v2923_v60 }
  0xd5   :  { %2387 = vmatprep.mubr.bf16.mxu1 %v2925_v61 }
  0xdb   :  { %2291 = vmatmul.mubr.bf16.gmra.mxu0 %v2922_v2  ;;  %v93_v2 = vld [vmem:[%s4810_s0 + $0x270] sm:$0xff] }
  0xdc   :  { %2388 = vmatmul.mubr.bf16.gmra.mxu1 %v2924_v3  ;;  %2428 = vmatprep.mubr.bf16.mxu0 %v2815_v4 }
  0xdd   :  { %2525 = vmatprep.mubr.bf16.mxu1 %v2817_v5 }
  0xe3   :  { %v3153_v14 = vpop.f32.mrf.mxu0  ;;  %2429 = vmatmul.mubr.bf16.vlgmr.msra.gmra.mxu0 %v2814_v10  ;;  %v2862_v10 = vcombine.low %v69_v41, %v77_v42 }
  0xe4   :  { %v3217_v15 = vpop.f32.mrf.mxu1  ;;  %2526 = vmatmul.mubr.bf16.vlgmr.msra.gmra.mxu1 %v2816_v11  ;;  %2436 = vmatprep.mubr.bf16.mxu0 %v2831_v12 }
  0xe5   :  { %v3154_v17 = vpop.f32.mrf.mxu0  ;;  %2533 = vmatprep.mubr.bf16.mxu1 %v2833_v13  ;;  %v2864_v13 = vcombine.low %v70_v46, %v78_v47 }
  0xe6   :  { %v3155_v20 = vadd.f32 %v3154_v17, %v3153_v14  ;;  %v3218_v21 = vpop.f32.mrf.mxu1  ;;  %v2879_v14 = vcombine.high %v85_v1, %v93_v2  ;;  %v2881_v17 = vcombine.high %v86_v6, %v94_v7 }
  0xe7   :  { %v3219_v24 = vadd.f32 %v3218_v21, %v3217_v15  ;;  %v3156_v25 = vpop.f32.mrf.mxu0 }
  0xe8   :  { %v1849_v27 = vadd.f32 %v3155_v20, %v4498_v16  ;;  %v3220_v28 = vpop.f32.mrf.mxu1 }
  0xe9   :  { %v3157_v31 = vpop.f32.mrf.mxu0 }
  0xea   :  { %v4513_v33 = vadd.f32 %v3219_v24, %v1849_v27  ;;  %v3158_v34 = vadd.f32 %v3157_v31, %v3156_v25  ;;  %v3221_v35 = vpop.f32.mrf.mxu1  ;;  %v109_v27 = vld [vmem:[%s4810_s0 + $0x2f0] sm:$0xff]  ;;  %v102_v31 = vld [vmem:[%s4810_s0 + $0x2b8] sm:$0xff] }
  0xeb   :  { %v3222_v36 = vadd.f32 %v3221_v35, %v3220_v28  ;;  %v3159_v37 = vpop.f32.mrf.mxu0  ;;  %2437 = vmatmul.mubr.bf16.gmra.mxu0 %v2830_v26  ;;  %v101_v26 = vld [vmem:[%s4810_s0 + $0x2b0] sm:$0xff] }
  0xec   :  { %v1852_v38 = vadd.f32 %v3158_v34, %v4498_v16  ;;  %v3223_v39 = vpop.f32.mrf.mxu1  ;;  %2534 = vmatmul.mubr.bf16.gmra.mxu1 %v2832_v29  ;;  %2444 = vmatprep.mubr.bf16.mxu0 %v2847_v30 }
  0xed   :  { %v3160_v40 = vpop.f32.mrf.mxu0  ;;  %2541 = vmatprep.mubr.bf16.mxu1 %v2849_v32  ;;  %v110_v32 = vld [vmem:[%s4810_s0 + $0x2f8] sm:$0xff] }
  0xee   :  { %v4522_v43 = vadd.f32 %v3222_v36, %v1852_v38  ;;  %v3161_v44 = vadd.f32 %v3160_v40, %v3159_v37  ;;  %v3224_v45 = vpop.f32.mrf.mxu1  ;;  %v2878_v36 = vcombine.low %v85_v1, %v93_v2  ;;  %v2895_v40 = vcombine.high %v101_v26, %v109_v27 }
  0xef   :  { %v3225_v48 = vadd.f32 %v3224_v45, %v3223_v39  ;;  %v3162_v49 = vpop.f32.mrf.mxu0  ;;  %v2880_v39 = vcombine.low %v86_v6, %v94_v7  ;;  %v2897_v42 = vcombine.high %v102_v31, %v110_v32  ;;  %v2896_v1 = vcombine.low %v102_v31, %v110_v32 }
  0xf0   :  { %v1857_v51 = vadd.f32 %v3161_v44, %v4498_v16  ;;  %v3226_v52 = vpop.f32.mrf.mxu1 }
  0xf1   :  { %v3163_v55 = vpop.f32.mrf.mxu0 }
  0xf2   :  { %v4531_v57 = vadd.f32 %v3225_v48, %v1857_v51  ;;  %v3164_v58 = vadd.f32 %v3163_v55, %v3162_v49  ;;  %v3227_v59 = vpop.f32.mrf.mxu1 }
  0xf3   :  { %v3228_v60 = vadd.f32 %v3227_v59, %v3226_v52  ;;  %v3165_v61 = vpop.f32.mrf.mxu0  ;;  %2445 = vmatmul.mubr.bf16.gmra.mxu0 %v2846_v50  ;;  %v117_v52 = vld [vmem:[%s4810_s0 + $0x330] sm:$0xff]  ;;  %v126_v59 = vld [vmem:[%s4810_s0 + $0x378] sm:$0xff] }
  0xf4   :  { %v1860_v62 = vadd.f32 %v3164_v58, %v4498_v16  ;;  %v3229_v63 = vpop.f32.mrf.mxu1  ;;  %2542 = vmatmul.mubr.bf16.gmra.mxu1 %v2848_v53  ;;  %2452 = vmatprep.mubr.bf16.mxu0 %v2863_v54  ;;  %v125_v53 = vld [vmem:[%s4810_s0 + $0x370] sm:$0xff]  ;;  %v118_v58 = vld [vmem:[%s4810_s0 + $0x338] sm:$0xff] }
  0xf5   :  { %v3166_v0 = vpop.f32.mrf.mxu0  ;;  %2549 = vmatprep.mubr.bf16.mxu1 %v2865_v56  ;;  %v2911_v2 = vcombine.high %v117_v52, %v125_v53 }
  0xf6   :  { %v4540_v3 = vadd.f32 %v3228_v60, %v1860_v62  ;;  %v3167_v4 = vadd.f32 %v3166_v0, %v3165_v61  ;;  %v3230_v5 = vpop.f32.mrf.mxu1  ;;  %v2894_v62 = vcombine.low %v101_v26, %v109_v27 }
  0xf7   :  { %v3231_v8 = vadd.f32 %v3230_v5, %v3229_v63  ;;  %v3168_v9 = vpop.f32.mrf.mxu0  ;;  %v2913_v5 = vcombine.high %v118_v58, %v126_v59 }
  0xf8   :  { %v1865_v11 = vadd.f32 %v3167_v4, %v4498_v16  ;;  %v3232_v12 = vpop.f32.mrf.mxu1 }
  0xf9   :  { %v3169_v15 = vpop.f32.mrf.mxu0 }
  0xfa   :  { %v4549_v18 = vadd.f32 %v3231_v8, %v1865_v11  ;;  %v3170_v19 = vadd.f32 %v3169_v15, %v3168_v9  ;;  %v3233_v20 = vpop.f32.mrf.mxu1  ;;  %v141_v15 = vld [vmem:[%s4810_s0 + $0x3f0] sm:$0xff] }
  0xfb   :  { %v3234_v21 = vadd.f32 %v3233_v20, %v3232_v12  ;;  %v3171_v22 = vpop.f32.mrf.mxu0  ;;  %2453 = vmatmul.mubr.bf16.gmra.mxu0 %v2862_v10 }
  0xfc   :  { %v1868_v23 = vadd.f32 %v3170_v19, %v4498_v16  ;;  %v3235_v24 = vpop.f32.mrf.mxu1  ;;  %2550 = vmatmul.mubr.bf16.gmra.mxu1 %v2864_v13  ;;  %2460 = vmatprep.mubr.bf16.mxu0 %v2879_v14  ;;  %v133_v14 = vld [vmem:[%s4810_s0 + $0x3b0] sm:$0xff] }
  0xfd   :  { %v3172_v25 = vpop.f32.mrf.mxu0  ;;  %2557 = vmatprep.mubr.bf16.mxu1 %v2881_v17 }
  0xfe   :  { %v4558_v28 = vadd.f32 %v3234_v21, %v1868_v23  ;;  %v3173_v29 = vadd.f32 %v3172_v25, %v3171_v22  ;;  %v3236_v30 = vpop.f32.mrf.mxu1  ;;  %v134_v21 = vld [vmem:[%s4810_s0 + $0x3b8] sm:$0xff]  ;;  %v2910_v25 = vcombine.low %v117_v52, %v125_v53 }
  0xff   :  { %v3237_v34 = vadd.f32 %v3236_v30, %v3235_v24  ;;  %v3174_v35 = vpop.f32.mrf.mxu0  ;;  %v142_v22 = vld [vmem:[%s4810_s0 + $0x3f8] sm:$0xff]  ;;  %v2927_v30 = vcombine.high %v133_v14, %v141_v15 }
 0x100   :  { %v1873_v37 = vadd.f32 %v3173_v29, %v4498_v16  ;;  %v3238_v38 = vpop.f32.mrf.mxu1  ;;  %v2912_v29 = vcombine.low %v118_v58, %v126_v59  ;;  %v2929_v32 = vcombine.high %v134_v21, %v142_v22  ;;  %v2928_v52 = vcombine.low %v134_v21, %v142_v22 }
 0x101   :  { %v3175_v41 = vpop.f32.mrf.mxu0 }
 0x102   :  { %v4567_v44 = vadd.f32 %v3237_v34, %v1873_v37  ;;  %v3176_v45 = vadd.f32 %v3175_v41, %v3174_v35  ;;  %v3239_v46 = vpop.f32.mrf.mxu1 }
 0x103   :  { %v3240_v47 = vadd.f32 %v3239_v46, %v3238_v38  ;;  %v3177_v48 = vpop.f32.mrf.mxu0  ;;  %2461 = vmatmul.mubr.bf16.gmra.mxu0 %v2878_v36 }
 0x104   :  { %v1876_v49 = vadd.f32 %v3176_v45, %v4498_v16  ;;  %v3241_v50 = vpop.f32.mrf.mxu1  ;;  %2558 = vmatmul.mubr.bf16.gmra.mxu1 %v2880_v39  ;;  %2468 = vmatprep.mubr.bf16.mxu0 %v2895_v40 }
 0x105   :  { %v3178_v51 = vpop.f32.mrf.mxu0  ;;  %2565 = vmatprep.mubr.bf16.mxu1 %v2897_v42 }
 0x106   :  { %v4576_v54 = vadd.f32 %v3240_v47, %v1876_v49  ;;  %v3179_v55 = vadd.f32 %v3178_v51, %v3177_v48  ;;  %v3242_v56 = vpop.f32.mrf.mxu1  ;;  %v2926_v49 = vcombine.low %v133_v14, %v141_v15 }
 0x107   :  { %v3243_v60 = vadd.f32 %v3242_v56, %v3241_v50  ;;  %v3180_v61 = vpop.f32.mrf.mxu0 }
 0x108   :  { %v1881_v63 = vadd.f32 %v3179_v55, %v4498_v16  ;;  %v3244_v0 = vpop.f32.mrf.mxu1 }
 0x109   :  { %v3181_v4 = vpop.f32.mrf.mxu0 }
 0x10a   :  { %v4585_v6 = vadd.f32 %v3243_v60, %v1881_v63  ;;  %v3182_v7 = vadd.f32 %v3181_v4, %v3180_v61  ;;  %v3245_v8 = vpop.f32.mrf.mxu1 }
 0x10b   :  { %v3246_v9 = vadd.f32 %v3245_v8, %v3244_v0  ;;  %v3183_v10 = vpop.f32.mrf.mxu0  ;;  %2469 = vmatmul.mubr.bf16.gmra.mxu0 %v2894_v62 }
 0x10c   :  { %v1884_v11 = vadd.f32 %v3182_v7, %v4498_v16  ;;  %v3247_v12 = vpop.f32.mrf.mxu1  ;;  %2566 = vmatmul.mubr.bf16.gmra.mxu1 %v2896_v1  ;;  %2476 = vmatprep.mubr.bf16.mxu0 %v2911_v2 }
 0x10d   :  { %v3184_v13 = vpop.f32.mrf.mxu0  ;;  %2573 = vmatprep.mubr.bf16.mxu1 %v2913_v5 }
 0x10e   :  { %v4594_v17 = vadd.f32 %v3246_v9, %v1884_v11  ;;  %v3185_v19 = vadd.f32 %v3184_v13, %v3183_v10  ;;  %v3248_v20 = vpop.f32.mrf.mxu1 }
 0x10f   :  { %v3249_v23 = vadd.f32 %v3248_v20, %v3247_v12  ;;  %v3186_v24 = vpop.f32.mrf.mxu0 }
 0x110   :  { %v1889_v26 = vadd.f32 %v3185_v19, %v4498_v16  ;;  %v3250_v27 = vpop.f32.mrf.mxu1 }
 0x111   :  { %v3187_v31 = vpop.f32.mrf.mxu0 }
 0x112   :  { %v4603_v34 = vadd.f32 %v3249_v23, %v1889_v26  ;;  %v3188_v35 = vadd.f32 %v3187_v31, %v3186_v24  ;;  %v3251_v36 = vpop.f32.mrf.mxu1 }
 0x113   :  { %v3252_v37 = vadd.f32 %v3251_v36, %v3250_v27  ;;  %v3189_v38 = vpop.f32.mrf.mxu0  ;;  %2477 = vmatmul.mubr.bf16.gmra.mxu0 %v2910_v25 }
 0x114   :  { %v1892_v39 = vadd.f32 %v3188_v35, %v4498_v16  ;;  %v3253_v40 = vpop.f32.mrf.mxu1  ;;  %2574 = vmatmul.mubr.bf16.gmra.mxu1 %v2912_v29  ;;  %2484 = vmatprep.mubr.bf16.mxu0 %v2927_v30 }
 0x115   :  { %v3190_v41 = vpop.f32.mrf.mxu0  ;;  %2581 = vmatprep.mubr.bf16.mxu1 %v2929_v32 }
 0x116   :  { %v4606_v42 = vadd.f32 %v3252_v37, %v1892_v39  ;;  %v3191_v45 = vadd.f32 %v3190_v41, %v3189_v38  ;;  %v3254_v46 = vpop.f32.mrf.mxu1 }
 0x117   :  { %v3255_v47 = vadd.f32 %v3254_v46, %v3253_v40  ;;  %v3192_v48 = vpop.f32.mrf.mxu0 }
 0x118   :  { %v1897_v50 = vadd.f32 %v3191_v45, %v4498_v16  ;;  %v3256_v51 = vpop.f32.mrf.mxu1 }
 0x119   :  { %v3193_v53 = vpop.f32.mrf.mxu0 }
 0x11a   :  { %v4609_v55 = vadd.f32 %v3255_v47, %v1897_v50  ;;  %v3194_v56 = vadd.f32 %v3193_v53, %v3192_v48  ;;  %v3257_v58 = vpop.f32.mrf.mxu1 }
 0x11b   :  { %v3258_v59 = vadd.f32 %v3257_v58, %v3256_v51  ;;  %v3195_v60 = vpop.f32.mrf.mxu0  ;;  %2485 = vmatmul.mubr.bf16.gmra.mxu0 %v2926_v49 }
 0x11c   :  { %v1900_v61 = vadd.f32 %v3194_v56, %v4498_v16  ;;  %v3259_v62 = vpop.f32.mrf.mxu1  ;;  %2582 = vmatmul.mubr.bf16.gmra.mxu1 %v2928_v52 }
 0x11d   :  { %v3196_v63 = vpop.f32.mrf.mxu0 }
 0x11e   :  { %v4612_v0 = vadd.f32 %v3258_v59, %v1900_v61  ;;  %v3197_v1 = vadd.f32 %v3196_v63, %v3195_v60  ;;  %v3260_v2 = vpop.f32.mrf.mxu1 }
 0x11f   :  { %v3261_v4 = vadd.f32 %v3260_v2, %v3259_v62  ;;  %v3198_v5 = vpop.f32.mrf.mxu0 }
 0x120   :  { %v1905_v7 = vadd.f32 %v3197_v1, %v4498_v16  ;;  %v3262_v8 = vpop.f32.mrf.mxu1 }
 0x121   :  { %v3199_v9 = vpop.f32.mrf.mxu0 }
 0x122   :  { %v4615_v10 = vadd.f32 %v3261_v4, %v1905_v7  ;;  %v3200_v11 = vadd.f32 %v3199_v9, %v3198_v5  ;;  %v3263_v12 = vpop.f32.mrf.mxu1 }
 0x123   :  { %v3264_v13 = vadd.f32 %v3263_v12, %v3262_v8  ;;  %v3281_v14 = vpop.f32.mrf.mxu0 }
 0x124   :  { %v1908_v15 = vadd.f32 %v3200_v11, %v4498_v16  ;;  %v3345_v19 = vpop.f32.mrf.mxu1 }
 0x125   :  { %v3282_v20 = vpop.f32.mrf.mxu0 }
 0x126   :  { %v4618_v21 = vadd.f32 %v3264_v13, %v1908_v15  ;;  %v3283_v22 = vadd.f32 %v3282_v20, %v3281_v14  ;;  %v3346_v23 = vpop.f32.mrf.mxu1 }
 0x127   :  { %v3347_v24 = vadd.f32 %v3346_v23, %v3345_v19  ;;  %v3284_v25 = vpop.f32.mrf.mxu0 }
 0x128   :  { %v2043_v26 = vadd.f32 %v3283_v22, %v4513_v33  ;;  %v3348_v27 = vpop.f32.mrf.mxu1 }
 0x129   :  { %v3285_v29 = vpop.f32.mrf.mxu0 }
 0x12a   :  { %v4621_v30 = vadd.f32 %v3347_v24, %v2043_v26  ;;  %v3286_v31 = vadd.f32 %v3285_v29, %v3284_v25  ;;  %v3349_v32 = vpop.f32.mrf.mxu1 }
 0x12b   :  { %v3350_v35 = vadd.f32 %v3349_v32, %v3348_v27  ;;  %v3287_v36 = vpop.f32.mrf.mxu0 }
 0x12c   :  { %v2046_v16 = vadd.f32 %v3286_v31, %v4522_v43  ;;  %v3351_v37 = vpop.f32.mrf.mxu1 }
 0x12d   :  { %v3288_v38 = vpop.f32.mrf.mxu0 }
 0x12e   :  { %v4624_v39 = vadd.f32 %v3350_v35, %v2046_v16  ;;  %v3289_v40 = vadd.f32 %v3288_v38, %v3287_v36  ;;  %v3352_v41 = vpop.f32.mrf.mxu1 }
 0x12f   :  { %v3353_v45 = vadd.f32 %v3352_v41, %v3351_v37  ;;  %v3290_v46 = vpop.f32.mrf.mxu0 }
 0x130   :  { %v2051_v33 = vadd.f32 %v3289_v40, %v4531_v57  ;;  %v3354_v47 = vpop.f32.mrf.mxu1 }
 0x131   :  { %v3291_v48 = vpop.f32.mrf.mxu0 }
 0x132   :  { %v4627_v49 = vadd.f32 %v3353_v45, %v2051_v33  ;;  %v3292_v50 = vadd.f32 %v3291_v48, %v3290_v46  ;;  %v3355_v51 = vpop.f32.mrf.mxu1 }
 0x133   :  { %v3356_v52 = vadd.f32 %v3355_v51, %v3354_v47  ;;  %v3293_v53 = vpop.f32.mrf.mxu0 }
 0x134   :  { %v2054_v43 = vadd.f32 %v3292_v50, %v4540_v3  ;;  %v3357_v56 = vpop.f32.mrf.mxu1 }
 0x135   :  { %v3294_v58 = vpop.f32.mrf.mxu0 }
 0x136   :  { %v4630_v59 = vadd.f32 %v3356_v52, %v2054_v43  ;;  %v3295_v60 = vadd.f32 %v3294_v58, %v3293_v53  ;;  %v3358_v61 = vpop.f32.mrf.mxu1 }
 0x137   :  { %v3359_v62 = vadd.f32 %v3358_v61, %v3357_v56  ;;  %v3296_v63 = vpop.f32.mrf.mxu0 }
 0x138   :  { %v2059_v57 = vadd.f32 %v3295_v60, %v4549_v18  ;;  %v3360_v1 = vpop.f32.mrf.mxu1 }
 0x139   :  { %v3297_v2 = vpop.f32.mrf.mxu0 }
 0x13a   :  { %v4633_v4 = vadd.f32 %v3359_v62, %v2059_v57  ;;  %v3298_v5 = vadd.f32 %v3297_v2, %v3296_v63  ;;  %v3361_v7 = vpop.f32.mrf.mxu1 }
 0x13b   :  { %v3362_v8 = vadd.f32 %v3361_v7, %v3360_v1  ;;  %v3299_v9 = vpop.f32.mrf.mxu0 }
 0x13c   :  { %v2062_v3 = vadd.f32 %v3298_v5, %v4558_v28  ;;  %v3363_v11 = vpop.f32.mrf.mxu1 }
 0x13d   :  { %v3300_v12 = vpop.f32.mrf.mxu0 }
 0x13e   :  { %v4636_v13 = vadd.f32 %v3362_v8, %v2062_v3  ;;  %v3301_v14 = vadd.f32 %v3300_v12, %v3299_v9  ;;  %v3364_v15 = vpop.f32.mrf.mxu1 }
 0x13f   :  { %v3365_v19 = vadd.f32 %v3364_v15, %v3363_v11  ;;  %v3302_v20 = vpop.f32.mrf.mxu0 }
 0x140   :  { %v2067_v18 = vadd.f32 %v3301_v14, %v4567_v44  ;;  %v3366_v22 = vpop.f32.mrf.mxu1 }
 0x141   :  { %v3303_v23 = vpop.f32.mrf.mxu0 }
 0x142   :  { %v4639_v24 = vadd.f32 %v3365_v19, %v2067_v18  ;;  %v3304_v25 = vadd.f32 %v3303_v23, %v3302_v20  ;;  %v3367_v26 = vpop.f32.mrf.mxu1 }
 0x143   :  { %v3368_v27 = vadd.f32 %v3367_v26, %v3366_v22  ;;  %v3305_v29 = vpop.f32.mrf.mxu0 }
 0x144   :  { %v2070_v28 = vadd.f32 %v3304_v25, %v4576_v54  ;;  %v3369_v31 = vpop.f32.mrf.mxu1 }
 0x145   :  { %v3306_v32 = vpop.f32.mrf.mxu0 }
 0x146   :  { %v4642_v35 = vadd.f32 %v3368_v27, %v2070_v28  ;;  %v3307_v36 = vadd.f32 %v3306_v32, %v3305_v29  ;;  %v3370_v16 = vpop.f32.mrf.mxu1 }
 0x147   :  { %v3371_v37 = vadd.f32 %v3370_v16, %v3369_v31  ;;  %v3308_v38 = vpop.f32.mrf.mxu0 }
 0x148   :  { %v2075_v44 = vadd.f32 %v3307_v36, %v4585_v6  ;;  %v3372_v40 = vpop.f32.mrf.mxu1 }
 0x149   :  { %v3309_v41 = vpop.f32.mrf.mxu0 }
 0x14a   :  { %v4645_v45 = vadd.f32 %v3371_v37, %v2075_v44  ;;  %v3310_v46 = vadd.f32 %v3309_v41, %v3308_v38  ;;  %v3373_v33 = vpop.f32.mrf.mxu1 }
 0x14b   :  { %v3374_v47 = vadd.f32 %v3373_v33, %v3372_v40  ;;  %v3311_v48 = vpop.f32.mrf.mxu0 }
 0x14c   :  { %v2078_v54 = vadd.f32 %v3310_v46, %v4594_v17  ;;  %v3375_v50 = vpop.f32.mrf.mxu1 }
 0x14d   :  { %v3312_v51 = vpop.f32.mrf.mxu0 }
 0x14e   :  { %v4648_v52 = vadd.f32 %v3374_v47, %v2078_v54  ;;  %v3313_v53 = vadd.f32 %v3312_v51, %v3311_v48  ;;  %v3376_v43 = vpop.f32.mrf.mxu1 }
 0x14f   :  { %v3377_v56 = vadd.f32 %v3376_v43, %v3375_v50  ;;  %v3314_v58 = vpop.f32.mrf.mxu0 }
 0x150   :  { %v2083_v6 = vadd.f32 %v3313_v53, %v4603_v34  ;;  %v3378_v60 = vpop.f32.mrf.mxu1 }
 0x151   :  { %v3315_v61 = vpop.f32.mrf.mxu0 }
 0x152   :  { %v4651_v62 = vadd.f32 %v3377_v56, %v2083_v6  ;;  %v3316_v63 = vadd.f32 %v3315_v61, %v3314_v58  ;;  %v3379_v57 = vpop.f32.mrf.mxu1 }
 0x153   :  { %v3380_v1 = vadd.f32 %v3379_v57, %v3378_v60  ;;  %v3317_v2 = vpop.f32.mrf.mxu0 }
 0x154   :  { %v2086_v17 = vadd.f32 %v3316_v63, %v4606_v42  ;;  %v3381_v5 = vpop.f32.mrf.mxu1 }
 0x155   :  { %v3318_v7 = vpop.f32.mrf.mxu0 }
 0x156   :  { %v4654_v8 = vadd.f32 %v3380_v1, %v2086_v17  ;;  %v3319_v9 = vadd.f32 %v3318_v7, %v3317_v2  ;;  %v3382_v3 = vpop.f32.mrf.mxu1 }
 0x157   :  { %v3383_v11 = vadd.f32 %v3382_v3, %v3381_v5  ;;  %v3320_v12 = vpop.f32.mrf.mxu0 }
 0x158   :  { %v2091_v34 = vadd.f32 %v3319_v9, %v4609_v55  ;;  %v3384_v14 = vpop.f32.mrf.mxu1 }
 0x159   :  { %v3321_v15 = vpop.f32.mrf.mxu0 }
 0x15a   :  { %v4657_v19 = vadd.f32 %v3383_v11, %v2091_v34  ;;  %v3322_v20 = vadd.f32 %v3321_v15, %v3320_v12  ;;  %v3385_v18 = vpop.f32.mrf.mxu1 }
 0x15b   :  { %v3386_v22 = vadd.f32 %v3385_v18, %v3384_v14  ;;  %v3323_v23 = vpop.f32.mrf.mxu0 }
 0x15c   :  { %v2094_v42 = vadd.f32 %v3322_v20, %v4612_v0  ;;  %v3387_v25 = vpop.f32.mrf.mxu1 }
 0x15d   :  { %v3324_v26 = vpop.f32.mrf.mxu0 }
 0x15e   :  { %v4660_v27 = vadd.f32 %v3386_v22, %v2094_v42  ;;  %v3325_v29 = vadd.f32 %v3324_v26, %v3323_v23  ;;  %v3388_v28 = vpop.f32.mrf.mxu1 }
 0x15f   :  { %v3389_v31 = vadd.f32 %v3388_v28, %v3387_v25  ;;  %v3326_v32 = vpop.f32.mrf.mxu0 }
 0x160   :  { %v2099_v55 = vadd.f32 %v3325_v29, %v4615_v10  ;;  %v3390_v36 = vpop.f32.mrf.mxu1 }
 0x161   :  { %v3327_v16 = vpop.f32.mrf.mxu0 }
 0x162   :  { %v4663_v37 = vadd.f32 %v3389_v31, %v2099_v55  ;;  %v3328_v38 = vadd.f32 %v3327_v16, %v3326_v32  ;;  %v3391_v44 = vpop.f32.mrf.mxu1 }
 0x163   :  { %v3392_v40 = vadd.f32 %v3391_v44, %v3390_v36  ;;  %v3409_v41 = vpop.f32.mrf.mxu0 }
 0x164   :  { %v2102_v0 = vadd.f32 %v3328_v38, %v4618_v21  ;;  %v3473_v46 = vpop.f32.mrf.mxu1 }
 0x165   :  { %v3410_v33 = vpop.f32.mrf.mxu0 }
 0x166   :  { %v4666_v47 = vadd.f32 %v3392_v40, %v2102_v0  ;;  %v3411_v48 = vadd.f32 %v3410_v33, %v3409_v41  ;;  %v3474_v54 = vpop.f32.mrf.mxu1 }
 0x167   :  { %v3475_v50 = vadd.f32 %v3474_v54, %v3473_v46  ;;  %v3412_v51 = vpop.f32.mrf.mxu0 }
 0x168   :  { %v2237_v10 = vadd.f32 %v3411_v48, %v4621_v30  ;;  %v3476_v53 = vpop.f32.mrf.mxu1 }
 0x169   :  { %v3413_v43 = vpop.f32.mrf.mxu0 }
 0x16a   :  { %v4669_v56 = vadd.f32 %v3475_v50, %v2237_v10  ;;  %v3414_v58 = vadd.f32 %v3413_v43, %v3412_v51  ;;  %v3477_v6 = vpop.f32.mrf.mxu1 }
 0x16b   :  { %v3478_v60 = vadd.f32 %v3477_v6, %v3476_v53  ;;  %v3415_v61 = vpop.f32.mrf.mxu0 }
 0x16c   :  { %v2240_v21 = vadd.f32 %v3414_v58, %v4624_v39  ;;  %v3479_v63 = vpop.f32.mrf.mxu1 }
 0x16d   :  { %v3416_v57 = vpop.f32.mrf.mxu0 }
 0x16e   :  { %v4672_v1 = vadd.f32 %v3478_v60, %v2240_v21  ;;  %v3417_v2 = vadd.f32 %v3416_v57, %v3415_v61  ;;  %v3480_v17 = vpop.f32.mrf.mxu1 }
 0x16f   :  { %v3481_v5 = vadd.f32 %v3480_v17, %v3479_v63  ;;  %v3418_v7 = vpop.f32.mrf.mxu0 }
 0x170   :  { %v2245_v30 = vadd.f32 %v3417_v2, %v4627_v49  ;;  %v3482_v9 = vpop.f32.mrf.mxu1 }
 0x171   :  { %v3419_v3 = vpop.f32.mrf.mxu0 }
 0x172   :  { %v4675_v11 = vadd.f32 %v3481_v5, %v2245_v30  ;;  %v3420_v12 = vadd.f32 %v3419_v3, %v3418_v7  ;;  %v3483_v34 = vpop.f32.mrf.mxu1 }
 0x173   :  { %v3484_v14 = vadd.f32 %v3483_v34, %v3482_v9  ;;  %v3421_v15 = vpop.f32.mrf.mxu0 }
 0x174   :  { %v2248_v39 = vadd.f32 %v3420_v12, %v4630_v59  ;;  %v3485_v20 = vpop.f32.mrf.mxu1 }
 0x175   :  { %v3422_v18 = vpop.f32.mrf.mxu0 }
 0x176   :  { %v4678_v22 = vadd.f32 %v3484_v14, %v2248_v39  ;;  %v3423_v23 = vadd.f32 %v3422_v18, %v3421_v15  ;;  %v3486_v42 = vpop.f32.mrf.mxu1 }
 0x177   :  { %v3487_v25 = vadd.f32 %v3486_v42, %v3485_v20  ;;  %v3424_v26 = vpop.f32.mrf.mxu0 }
 0x178   :  { %v2253_v49 = vadd.f32 %v3423_v23, %v4633_v4  ;;  %v3488_v29 = vpop.f32.mrf.mxu1 }
 0x179   :  { %v3425_v28 = vpop.f32.mrf.mxu0 }
 0x17a   :  { %v4681_v31 = vadd.f32 %v3487_v25, %v2253_v49  ;;  %v3426_v32 = vadd.f32 %v3425_v28, %v3424_v26  ;;  %v3489_v55 = vpop.f32.mrf.mxu1 }
 0x17b   :  { %v3490_v36 = vadd.f32 %v3489_v55, %v3488_v29  ;;  %v3427_v16 = vpop.f32.mrf.mxu0 }
 0x17c   :  { %v2256_v59 = vadd.f32 %v3426_v32, %v4636_v13  ;;  %v3491_v38 = vpop.f32.mrf.mxu1 }
 0x17d   :  { %v3428_v44 = vpop.f32.mrf.mxu0 }
 0x17e   :  { %v4684_v40 = vadd.f32 %v3490_v36, %v2256_v59  ;;  %v3429_v41 = vadd.f32 %v3428_v44, %v3427_v16  ;;  %v3492_v0 = vpop.f32.mrf.mxu1 }
 0x17f   :  { %v3493_v46 = vadd.f32 %v3492_v0, %v3491_v38  ;;  %v3430_v33 = vpop.f32.mrf.mxu0 }
 0x180   :  { %v2261_v4 = vadd.f32 %v3429_v41, %v4639_v24  ;;  %v3494_v48 = vpop.f32.mrf.mxu1 }
 0x181   :  { %v3431_v54 = vpop.f32.mrf.mxu0 }
 0x182   :  { %v4687_v50 = vadd.f32 %v3493_v46, %v2261_v4  ;;  %v3432_v51 = vadd.f32 %v3431_v54, %v3430_v33  ;;  %v3495_v10 = vpop.f32.mrf.mxu1 }
 0x183   :  { %v3496_v53 = vadd.f32 %v3495_v10, %v3494_v48  ;;  %v3433_v43 = vpop.f32.mrf.mxu0 }
 0x184   :  { %v2264_v13 = vadd.f32 %v3432_v51, %v4642_v35  ;;  %v3497_v58 = vpop.f32.mrf.mxu1 }
 0x185   :  { %v3434_v6 = vpop.f32.mrf.mxu0 }
 0x186   :  { %v4690_v60 = vadd.f32 %v3496_v53, %v2264_v13  ;;  %v3435_v61 = vadd.f32 %v3434_v6, %v3433_v43  ;;  %v3498_v21 = vpop.f32.mrf.mxu1 }
 0x187   :  { %v3499_v63 = vadd.f32 %v3498_v21, %v3497_v58  ;;  %v3436_v57 = vpop.f32.mrf.mxu0 }
 0x188   :  { %v2269_v24 = vadd.f32 %v3435_v61, %v4645_v45  ;;  %v3500_v2 = vpop.f32.mrf.mxu1 }
 0x189   :  { %v3437_v17 = vpop.f32.mrf.mxu0 }
 0x18a   :  { %v4693_v5 = vadd.f32 %v3499_v63, %v2269_v24  ;;  %v3438_v7 = vadd.f32 %v3437_v17, %v3436_v57  ;;  %v3501_v30 = vpop.f32.mrf.mxu1 }
 0x18b   :  { %v3502_v9 = vadd.f32 %v3501_v30, %v3500_v2  ;;  %v3439_v3 = vpop.f32.mrf.mxu0 }
 0x18c   :  { %v2272_v35 = vadd.f32 %v3438_v7, %v4648_v52  ;;  %v3503_v12 = vpop.f32.mrf.mxu1 }
 0x18d   :  { %v3440_v34 = vpop.f32.mrf.mxu0 }
 0x18e   :  { %v4696_v14 = vadd.f32 %v3502_v9, %v2272_v35  ;;  %v3441_v15 = vadd.f32 %v3440_v34, %v3439_v3  ;;  %v3504_v39 = vpop.f32.mrf.mxu1 }
 0x18f   :  { %v3505_v20 = vadd.f32 %v3504_v39, %v3503_v12  ;;  %v3442_v18 = vpop.f32.mrf.mxu0 }
 0x190   :  { %v2277_v45 = vadd.f32 %v3441_v15, %v4651_v62  ;;  %v3506_v23 = vpop.f32.mrf.mxu1 }
 0x191   :  { %v3443_v42 = vpop.f32.mrf.mxu0 }
 0x192   :  { %v4699_v25 = vadd.f32 %v3505_v20, %v2277_v45  ;;  %v3444_v26 = vadd.f32 %v3443_v42, %v3442_v18  ;;  %v3507_v49 = vpop.f32.mrf.mxu1 }
 0x193   :  { %v3508_v29 = vadd.f32 %v3507_v49, %v3506_v23  ;;  %v3445_v28 = vpop.f32.mrf.mxu0 }
 0x194   :  { %v2280_v52 = vadd.f32 %v3444_v26, %v4654_v8  ;;  %v3509_v32 = vpop.f32.mrf.mxu1 }
 0x195   :  { %v3446_v55 = vpop.f32.mrf.mxu0 }
 0x196   :  { %v4702_v36 = vadd.f32 %v3508_v29, %v2280_v52  ;;  %v3447_v16 = vadd.f32 %v3446_v55, %v3445_v28  ;;  %v3510_v59 = vpop.f32.mrf.mxu1 }
 0x197   :  { %v3511_v38 = vadd.f32 %v3510_v59, %v3509_v32  ;;  %v3448_v44 = vpop.f32.mrf.mxu0 }
 0x198   :  { %v2285_v62 = vadd.f32 %v3447_v16, %v4657_v19  ;;  %v3512_v41 = vpop.f32.mrf.mxu1 }
 0x199   :  { %v3449_v0 = vpop.f32.mrf.mxu0 }
 0x19a   :  { %v4705_v46 = vadd.f32 %v3511_v38, %v2285_v62  ;;  %v3450_v33 = vadd.f32 %v3449_v0, %v3448_v44  ;;  %v3513_v4 = vpop.f32.mrf.mxu1 }
 0x19b   :  { %v3514_v48 = vadd.f32 %v3513_v4, %v3512_v41  ;;  %v3451_v54 = vpop.f32.mrf.mxu0 }
 0x19c   :  { %v2288_v8 = vadd.f32 %v3450_v33, %v4660_v27  ;;  %v3515_v51 = vpop.f32.mrf.mxu1 }
 0x19d   :  { %v3452_v10 = vpop.f32.mrf.mxu0 }
 0x19e   :  { %v4708_v53 = vadd.f32 %v3514_v48, %v2288_v8  ;;  %v3453_v43 = vadd.f32 %v3452_v10, %v3451_v54  ;;  %v3516_v13 = vpop.f32.mrf.mxu1 }
 0x19f   :  { %v4710_v58 = vpop.f32.mrf.mxu0  ;;  %v3517_v6 = vadd.f32 %v3516_v13, %v3515_v51 }
 0x1a0   :  { %v2293_v19 = vadd.f32 %v3453_v43, %v4663_v37  ;;  %v4713_v61 = vpop.f32.mrf.mxu1 }
 0x1a1   :  { %v4715_v21 = vpop.f32.mrf.mxu0 }
 0x1a2   :  { %v4717_v63 = vadd.f32 %v3517_v6, %v2293_v19  ;;  %v4719_v57 = vpop.f32.mrf.mxu1 }
 0x1a3   :  { %v3537_v27 = vpop.f32.mrf.mxu0 }
 0x1a4   :  { %v3601_v24 = vpop.f32.mrf.mxu1 }
 0x1a5   :  { %v3538_v2 = vpop.f32.mrf.mxu0 }
 0x1a6   :  { %v3539_v17 = vadd.f32 %v3538_v2, %v3537_v27  ;;  %v3602_v7 = vpop.f32.mrf.mxu1 }
 0x1a7   :  { %v3540_v30 = vpop.f32.mrf.mxu0  ;;  %v3603_v15 = vadd.f32 %v3602_v7, %v3601_v24 }
 0x1a8   :  { %v3604_v9 = vpop.f32.mrf.mxu1  ;;  %v2431_v35 = vadd.f32 %v3539_v17, %v4669_v56 }
 0x1a9   :  { %v3541_v3 = vpop.f32.mrf.mxu0 }
 0x1aa   :  { %v3542_v37 = vadd.f32 %v3541_v3, %v3540_v30  ;;  %v3605_v12 = vpop.f32.mrf.mxu1  ;;  %v4723_v23 = vadd.f32 %v3603_v15, %v2431_v35 }
 0x1ab   :  { %v3543_v34 = vpop.f32.mrf.mxu0  ;;  %v3606_v20 = vadd.f32 %v3605_v12, %v3604_v9 }
 0x1ac   :  { %v2434_v39 = vadd.f32 %v3542_v37, %v4672_v1  ;;  %v3607_v18 = vpop.f32.mrf.mxu1 }
 0x1ad   :  { %v3544_v45 = vpop.f32.mrf.mxu0 }
 0x1ae   :  { %v4725_v42 = vadd.f32 %v3606_v20, %v2434_v39  ;;  %v3545_v26 = vadd.f32 %v3544_v45, %v3543_v34  ;;  %v3608_v49 = vpop.f32.mrf.mxu1 }
 0x1af   :  { %v3546_v29 = vpop.f32.mrf.mxu0  ;;  %v3609_v52 = vadd.f32 %v3608_v49, %v3607_v18 }
 0x1b0   :  { %v2590_v28 = vadd.f32 %v4725_v42, %v4723_v23  ;;  %v2439_v56 = vadd.f32 %v3545_v26, %v4675_v11  ;;  %v3610_v32 = vpop.f32.mrf.mxu1 }
 0x1b1   :  { %v3547_v55 = vpop.f32.mrf.mxu0 }
 0x1b2   :  { %v4730_v16 = vadd.f32 %v3609_v52, %v2439_v56  ;;  %v3548_v1 = vadd.f32 %v3547_v55, %v3546_v29  ;;  %v3611_v59 = vpop.f32.mrf.mxu1 }
 0x1b3   :  { %v3549_v38 = vpop.f32.mrf.mxu0  ;;  %v3612_v41 = vadd.f32 %v3611_v59, %v3610_v32 }
 0x1b4   :  { %v2591_v44 = vadd.f32 %v2590_v28, %v4730_v16  ;;  %v2442_v62 = vadd.f32 %v3548_v1, %v4678_v22  ;;  %v3613_v0 = vpop.f32.mrf.mxu1 }
 0x1b5   :  { %v3550_v33 = vpop.f32.mrf.mxu0 }
 0x1b6   :  { %v4734_v4 = vadd.f32 %v3612_v41, %v2442_v62  ;;  %v3551_v48 = vadd.f32 %v3550_v33, %v3549_v38  ;;  %v3614_v54 = vpop.f32.mrf.mxu1 }
 0x1b7   :  { %v3552_v11 = vpop.f32.mrf.mxu0  ;;  %v3615_v10 = vadd.f32 %v3614_v54, %v3613_v0 }
 0x1b8   :  { %v2592_v8 = vadd.f32 %v2591_v44, %v4734_v4  ;;  %v2447_v51 = vadd.f32 %v3551_v48, %v4681_v31  ;;  %v3616_v43 = vpop.f32.mrf.mxu1 }
 0x1b9   :  { %v3553_v13 = vpop.f32.mrf.mxu0 }
 0x1ba   :  { %v4738_v19 = vadd.f32 %v3615_v10, %v2447_v51  ;;  %v3554_v6 = vadd.f32 %v3553_v13, %v3552_v11  ;;  %v3617_v27 = vpop.f32.mrf.mxu1 }
 0x1bb   :  { %v3555_v22 = vpop.f32.mrf.mxu0  ;;  %v3618_v17 = vadd.f32 %v3617_v27, %v3616_v43 }
 0x1bc   :  { %v2593_v24 = vadd.f32 %v2592_v8, %v4738_v19  ;;  %v2450_v2 = vadd.f32 %v3554_v6, %v4684_v40  ;;  %v3619_v7 = vpop.f32.mrf.mxu1 }
 0x1bd   :  { %v3556_v30 = vpop.f32.mrf.mxu0 }
 0x1be   :  { %v4742_v9 = vadd.f32 %v3618_v17, %v2450_v2  ;;  %v3557_v3 = vadd.f32 %v3556_v30, %v3555_v22  ;;  %v3620_v35 = vpop.f32.mrf.mxu1 }
 0x1bf   :  { %v3558_v31 = vpop.f32.mrf.mxu0  ;;  %v3621_v34 = vadd.f32 %v3620_v35, %v3619_v7 }
 0x1c0   :  { %v2594_v37 = vadd.f32 %v2593_v24, %v4742_v9  ;;  %v2455_v12 = vadd.f32 %v3557_v3, %v4687_v50  ;;  %v3622_v15 = vpop.f32.mrf.mxu1 }
 0x1c1   :  { %v3559_v39 = vpop.f32.mrf.mxu0 }
 0x1c2   :  { %v4746_v20 = vadd.f32 %v3621_v34, %v2455_v12  ;;  %v3560_v18 = vadd.f32 %v3559_v39, %v3558_v31  ;;  %v3623_v45 = vpop.f32.mrf.mxu1 }
 0x1c3   :  { %v3561_v40 = vpop.f32.mrf.mxu0  ;;  %v3624_v29 = vadd.f32 %v3623_v45, %v3622_v15 }
 0x1c4   :  { %v2595_v26 = vadd.f32 %v2594_v37, %v4746_v20  ;;  %v2458_v49 = vadd.f32 %v3560_v18, %v4690_v60  ;;  %v3625_v28 = vpop.f32.mrf.mxu1 }
 0x1c5   :  { %v3562_v56 = vpop.f32.mrf.mxu0 }
 0x1c6   :  { %v4750_v52 = vadd.f32 %v3624_v29, %v2458_v49  ;;  %v3563_v32 = vadd.f32 %v3562_v56, %v3561_v40  ;;  %v3626_v55 = vpop.f32.mrf.mxu1  ;;  %v3456_v29 = vadd.f32 %v4715_v21, %v4710_v58 }
 0x1c7   :  { %v3564_v50 = vpop.f32.mrf.mxu0  ;;  %v3627_v38 = vadd.f32 %v3626_v55, %v3625_v28 }
 0x1c8   :  { %v2596_v1 = vadd.f32 %v2595_v26, %v4750_v52  ;;  %v2463_v59 = vadd.f32 %v3563_v32, %v4693_v5  ;;  %v3628_v44 = vpop.f32.mrf.mxu1 }
 0x1c9   :  { %v3565_v62 = vpop.f32.mrf.mxu0 }
 0x1ca   :  { %v4754_v41 = vadd.f32 %v3627_v38, %v2463_v59  ;;  %v3566_v0 = vadd.f32 %v3565_v62, %v3564_v50  ;;  %v3629_v33 = vpop.f32.mrf.mxu1 }
 0x1cb   :  { %v3567_v60 = vpop.f32.mrf.mxu0  ;;  %v3630_v11 = vadd.f32 %v3629_v33, %v3628_v44  ;;  %v2296_v44 = vadd.f32 %v3456_v29, %v4666_v47 }
 0x1cc   :  { %v2597_v48 = vadd.f32 %v2596_v1, %v4754_v41  ;;  %v2466_v54 = vadd.f32 %v3566_v0, %v4696_v14  ;;  %v3631_v8 = vpop.f32.mrf.mxu1 }
 0x1cd   :  { %v3568_v51 = vpop.f32.mrf.mxu0 }
 0x1ce   :  { %v4758_v10 = vadd.f32 %v3630_v11, %v2466_v54  ;;  %v3569_v43 = vadd.f32 %v3568_v51, %v3567_v60  ;;  %v3632_v13 = vpop.f32.mrf.mxu1  ;;  %v3520_v60 = vadd.f32 %v4719_v57, %v4713_v61 }
 0x1cf   :  { %v3570_v5 = vpop.f32.mrf.mxu0  ;;  %v3633_v22 = vadd.f32 %v3632_v13, %v3631_v8 }
 0x1d0   :  { %v2598_v6 = vadd.f32 %v2597_v48, %v4758_v10  ;;  %v2471_v27 = vadd.f32 %v3569_v43, %v4699_v25  ;;  %v3634_v24 = vpop.f32.mrf.mxu1  ;;  %v2393_v8 = vadd.f32 %v3520_v60, %v2296_v44 }
 0x1d1   :  { %v3571_v2 = vpop.f32.mrf.mxu0 }
 0x1d2   :  { %v4762_v17 = vadd.f32 %v3633_v22, %v2471_v27  ;;  %v3572_v7 = vadd.f32 %v3571_v2, %v3570_v5  ;;  %v3635_v30 = vpop.f32.mrf.mxu1 }
 0x1d3   :  { %v3573_v14 = vpop.f32.mrf.mxu0  ;;  %v3636_v31 = vadd.f32 %v3635_v30, %v3634_v24 }
 0x1d4   :  { %v2599_v3 = vadd.f32 %v2598_v6, %v4762_v17  ;;  %v2474_v35 = vadd.f32 %v3572_v7, %v4702_v36  ;;  %v3637_v37 = vpop.f32.mrf.mxu1 }
 0x1d5   :  { %v3574_v12 = vpop.f32.mrf.mxu0 }
 0x1d6   :  { %v2571_v34 = vadd.f32 %v3636_v31, %v2474_v35  ;;  %v3575_v15 = vadd.f32 %v3574_v12, %v3573_v14  ;;  %v3638_v39 = vpop.f32.mrf.mxu1 }
 0x1d7   :  { %v3576_v18 = vpop.f32.mrf.mxu0  ;;  %v3639_v40 = vadd.f32 %v3638_v39, %v3637_v37 }
 0x1d8   :  { %v2600_v25 = vadd.f32 %v2599_v3, %v2571_v34  ;;  %v2479_v45 = vadd.f32 %v3575_v15, %v4705_v46  ;;  %v3640_v26 = vpop.f32.mrf.mxu1 }
 0x1d9   :  { %v3577_v49 = vpop.f32.mrf.mxu0 }
 0x1da   :  { %v2576_v28 = vadd.f32 %v3639_v40, %v2479_v45  ;;  %v3578_v56 = vadd.f32 %v3577_v49, %v3576_v18  ;;  %v3641_v32 = vpop.f32.mrf.mxu1 }
 0x1db   :  { %v3579_v36 = vpop.f32.mrf.mxu0  ;;  %v3642_v1 = vadd.f32 %v3641_v32, %v3640_v26 }
 0x1dc   :  { %v2601_v55 = vadd.f32 %v2600_v25, %v2576_v28  ;;  %v2482_v50 = vadd.f32 %v3578_v56, %v4708_v53  ;;  %v3643_v59 = vpop.f32.mrf.mxu1 }
 0x1dd   :  { %v3580_v38 = vpop.f32.mrf.mxu0 }
 0x1de   :  { %v2579_v62 = vadd.f32 %v3642_v1, %v2482_v50  ;;  %v3581_v46 = vadd.f32 %v3580_v38, %v3579_v36  ;;  %v3644_v0 = vpop.f32.mrf.mxu1 }
 0x1df   :  { %v3582_v33 = vpop.f32.mrf.mxu0  ;;  %v3645_v48 = vadd.f32 %v3644_v0, %v3643_v59 }
 0x1e0   :  { %v2602_v58 = vadd.f32 %v2601_v55, %v2579_v62  ;;  %v2487_v21 = vadd.f32 %v3581_v46, %v4717_v63  ;;  %v3646_v54 = vpop.f32.mrf.mxu1 }
 0x1e1   :  { %v3583_v11 = vpop.f32.mrf.mxu0 }
 0x1e2   :  { %v2584_v53 = vadd.f32 %v3645_v48, %v2487_v21  ;;  %v3584_v51 = vadd.f32 %v3583_v11, %v3582_v33  ;;  %v3647_v43 = vpop.f32.mrf.mxu1 }
 0x1e3   :  { %v3648_v47 = vadd.f32 %v3647_v43, %v3646_v54 }
 0x1e4   :  { %v2603_v13 = vadd.f32 %v2602_v58, %v2584_v53  ;;  %v2490_v5 = vadd.f32 %v3584_v51, %v2393_v8 }
 0x1e6   :  { %v2587_v6 = vadd.f32 %v3648_v47, %v2490_v5 }
 0x1e8   :  { %v2604_v27 = vadd.f32 %v2603_v13, %v2587_v6 }
 0x1ea   :  { %v2605_v22 = vrot.slane %v2604_v27, 4 }
 0x1ec   :  { %v2606_v24 = vadd.f32 %v2605_v22, %v2604_v27 }
 0x1ee   :  { %v2607_v2 = vrot.slane %v2606_v24, 2 }
 0x1f0   :  { %v2608_v7 = vadd.f32 %v2607_v2, %v2606_v24 }
 0x1f2   :  { %v2609_v61 = vrot.slane %v2608_v7, 1 }
 0x1f4   :  { %v2610_v57 = vadd.f32 %v2609_v61, %v2608_v7 }
 0x1f6   :  { %v2612_v30 = vmul.f32 0.0078125, %v2610_v57 }
 0x1f8   :  { %v2613_v63 = vsub.f32 %v4723_v23, %v2612_v30  ;;  %v2614_v14 = vsub.f32 %v4725_v42, %v2612_v30  ;;  %v2615_v3 = vsub.f32 %v4730_v16, %v2612_v30  ;;  %v2616_v35 = vsub.f32 %v4734_v4, %v2612_v30 }
 0x1f9   :  { %v2617_v31 = vsub.f32 %v4738_v19, %v2612_v30  ;;  %v2618_v37 = vsub.f32 %v4742_v9, %v2612_v30  ;;  %v2619_v12 = vsub.f32 %v4746_v20, %v2612_v30  ;;  %v2620_v15 = vsub.f32 %v4750_v52, %v2612_v30 }
 0x1fa   :  { %v2621_v39 = vsub.f32 %v4754_v41, %v2612_v30  ;;  %v2622_v18 = vsub.f32 %v4758_v10, %v2612_v30  ;;  %v2623_v23 = vsub.f32 %v4762_v17, %v2612_v30  ;;  %v2624_v25 = vsub.f32 %v2571_v34, %v2612_v30 }
 0x1fb   :  { %v2625_v42 = vsub.f32 %v2576_v28, %v2612_v30  ;;  %v2626_v45 = vsub.f32 %v2579_v62, %v2612_v30  ;;  %v2627_v16 = vsub.f32 %v2584_v53, %v2612_v30  ;;  %v2628_v40 = vsub.f32 %v2587_v6, %v2612_v30 }
 0x1fc   :  { %v2629_v4 = vmul.f32 %v2613_v63, %v2613_v63  ;;  %v2630_v26 = vmul.f32 %v2614_v14, %v2614_v14  ;;  %v2631_v19 = vmul.f32 %v2615_v3, %v2615_v3  ;;  %v2632_v9 = vmul.f32 %v2616_v35, %v2616_v35 }
 0x1fd   :  { %v2633_v20 = vmul.f32 %v2617_v31, %v2617_v31  ;;  %v2634_v52 = vmul.f32 %v2618_v37, %v2618_v37  ;;  %v2635_v41 = vmul.f32 %v2619_v12, %v2619_v12  ;;  %v2636_v10 = vmul.f32 %v2620_v15, %v2620_v15 }
 0x1fe   :  { %v2645_v49 = vadd.f32 %v2630_v26, %v2629_v4  ;;  %v2637_v17 = vmul.f32 %v2621_v39, %v2621_v39  ;;  %v2638_v28 = vmul.f32 %v2622_v18, %v2622_v18  ;;  %v2639_v1 = vmul.f32 %v2623_v23, %v2623_v23 }
 0x1ff   :  { %v2640_v38 = vmul.f32 %v2624_v25, %v2624_v25  ;;  %v2641_v62 = vmul.f32 %v2625_v42, %v2625_v42  ;;  %v2642_v0 = vmul.f32 %v2626_v45, %v2626_v45  ;;  %v2643_v60 = vmul.f32 %v2627_v16, %v2627_v16 }
 0x200   :  { %v2646_v29 = vadd.f32 %v2645_v49, %v2631_v19  ;;  %v2644_v21 = vmul.f32 %v2628_v40, %v2628_v40 }
 0x202   :  { %v2647_v56 = vadd.f32 %v2646_v29, %v2632_v9 }
 0x204   :  { %v2648_v32 = vadd.f32 %v2647_v56, %v2633_v20 }
 0x206   :  { %v2649_v36 = vadd.f32 %v2648_v32, %v2634_v52 }
 0x208   :  { %v2650_v55 = vadd.f32 %v2649_v36, %v2635_v41 }
 0x20a   :  { %v2651_v34 = vadd.f32 %v2650_v55, %v2636_v10 }
 0x20c   :  { %v2652_v50 = vadd.f32 %v2651_v34, %v2637_v17 }
 0x20e   :  { %v2653_v59 = vadd.f32 %v2652_v50, %v2638_v28 }
 0x210   :  { %v2654_v44 = vadd.f32 %v2653_v59, %v2639_v1 }
 0x212   :  { %v2655_v46 = vadd.f32 %v2654_v44, %v2640_v38 }
 0x214   :  { %v2656_v33 = vadd.f32 %v2655_v46, %v2641_v62 }
 0x216   :  { %v2657_v58 = vadd.f32 %v2656_v33, %v2642_v0 }
 0x218   :  { %v2658_v48 = vadd.f32 %v2657_v58, %v2643_v60 }
 0x21a   :  { %v2659_v54 = vadd.f32 %v2658_v48, %v2644_v21 }
 0x21c   :  { %v2660_v11 = vrot.slane %v2659_v54, 4 }
 0x21e   :  { %v2661_v8 = vadd.f32 %v2660_v11, %v2659_v54 }
 0x220   :  { %v2662_v53 = vrot.slane %v2661_v8, 2 }
 0x222   :  { %v2663_v51 = vadd.f32 %v2662_v53, %v2661_v8 }
 0x224   :  { %v2664_v43 = vrot.slane %v2663_v51, 1 }
 0x226   :  { %v2665_v13 = vadd.f32 %v2664_v43, %v2663_v51 }
 0x228   :  { %v2666_v5 = vmul.f32 0.0078125, %v2665_v13 }
 0x22a   :  { %v2667_v47 = vadd.f32 1e-05, %v2666_v5 }
 0x22c   :  { %3777 = vrsqrt.f32 %v2667_v47 }
 0x239   :  { %v3778_v6 = vpop.eup %3777 }
 0x23a   :  { %v2669_v27 = vmul.f32 %v3778_v6, %v2613_v63  ;;  %v2670_v22 = vmul.f32 %v3778_v6, %v2614_v14  ;;  %v2671_v24 = vmul.f32 %v3778_v6, %v2615_v3  ;;  %v2672_v2 = vmul.f32 %v3778_v6, %v2616_v35 }
 0x23b   :  { %v2673_v7 = vmul.f32 %v3778_v6, %v2617_v31  ;;  %v2674_v61 = vmul.f32 %v3778_v6, %v2618_v37  ;;  %v2675_v57 = vmul.f32 %v3778_v6, %v2619_v12  ;;  %v2676_v30 = vmul.f32 %v3778_v6, %v2620_v15 }
 0x23c   :  { %v2677_v4 = vmul.f32 %v3778_v6, %v2621_v39  ;;  %v2678_v26 = vmul.f32 %v3778_v6, %v2622_v18  ;;  %v2679_v19 = vmul.f32 %v3778_v6, %v2623_v23  ;;  %v2680_v49 = vmul.f32 %v3778_v6, %v2624_v25 }
 0x23d   :  { %v2681_v9 = vmul.f32 %v3778_v6, %v2625_v42  ;;  %v2682_v29 = vmul.f32 %v3778_v6, %v2626_v45  ;;  %v2683_v20 = vmul.f32 %v3778_v6, %v2627_v16  ;;  %v2684_v56 = vmul.f32 %v3778_v6, %v2628_v40 }
 0x23e   :  { %v2685_v52 = vmul.f32 0.2, %v2669_v27  ;;  %v2686_v32 = vmul.f32 0.2, %v2670_v22  ;;  %v2687_v41 = vmul.f32 0.2, %v2671_v24 }
 0x23f   :  { %v2688_v36 = vmul.f32 0.2, %v2672_v2  ;;  %v2689_v63 = vmul.f32 0.2, %v2673_v7  ;;  %v2690_v14 = vmul.f32 0.2, %v2674_v61 }
 0x240   :  { %v2691_v3 = vmul.f32 0.2, %v2675_v57  ;;  %v2692_v35 = vmul.f32 0.2, %v2676_v30  ;;  %v2693_v31 = vmul.f32 0.2, %v2677_v4  ;;  %v2701_v37 = vmax.f32 %v2669_v27, %v2685_v52 }
 0x241   :  { %v2694_v12 = vmul.f32 0.2, %v2678_v26  ;;  %v2695_v15 = vmul.f32 0.2, %v2679_v19  ;;  %v2696_v39 = vmul.f32 0.2, %v2680_v49  ;;  %v2702_v18 = vmax.f32 %v2670_v22, %v2686_v32 }
 0x242   :  { %v2697_v23 = vmul.f32 0.2, %v2681_v9  ;;  %v2698_v25 = vmul.f32 0.2, %v2682_v29  ;;  %v2699_v42 = vmul.f32 0.2, %v2683_v20  ;;  %v2703_v45 = vmax.f32 %v2671_v24, %v2687_v41 }
 0x243   :  { %v2700_v16 = vmul.f32 0.2, %v2684_v56  ;;  %v2704_v40 = vmax.f32 %v2672_v2, %v2688_v36  ;;  %v2705_v10 = vmax.f32 %v2673_v7, %v2689_v63  ;;  %v2706_v55 = vmax.f32 %v2674_v61, %v2690_v14 }
 0x244   :  { %v2707_v17 = vmax.f32 %v2675_v57, %v2691_v3  ;;  %v2708_v34 = vmax.f32 %v2676_v30, %v2692_v35  ;;  %v2709_v28 = vmax.f32 %v2677_v4, %v2693_v31  ;;  %v2710_v50 = vmax.f32 %v2678_v26, %v2694_v12 }
 0x245   :  { %v2711_v1 = vmax.f32 %v2679_v19, %v2695_v15  ;;  %v2712_v59 = vmax.f32 %v2680_v49, %v2696_v39  ;;  %v2713_v38 = vmax.f32 %v2681_v9, %v2697_v23  ;;  %v2714_v44 = vmax.f32 %v2682_v29, %v2698_v25 }
 0x246   :  { %v2715_v62 = vmax.f32 %v2683_v20, %v2699_v42  ;;  %v2716_v46 = vmax.f32 %v2684_v56, %v2700_v16  ;;  %v3093_v0 = vpack.c.bf16 %v2702_v18, %v2701_v37  ;;  %v3098_v33 = vpack.c.bf16 %v2704_v40, %v2703_v45 }
 0x247   :  { %v3103_v60 = vpack.c.bf16 %v2706_v55, %v2705_v10  ;;  %v3108_v58 = vpack.c.bf16 %v2708_v34, %v2707_v17  ;;  %v3113_v21 = vpack.c.bf16 %v2710_v50, %v2709_v28  ;;  %v3118_v48 = vpack.c.bf16 %v2712_v59, %v2711_v1 }
 0x248   :  { %3094 = vst [vmem:[%s4812_s3] sm:$0xff] %v3093_v0   ;;  %3130 = vst [vmem:[%s4812_s3 + $0x8] sm:$0xff] %v3098_v33   ;;  %v3123_v54 = vpack.c.bf16 %v2714_v44, %v2713_v38  ;;  %v3128_v11 = vpack.c.bf16 %v2716_v46, %v2715_v62 }
 0x249   :  { %3131 = vst [vmem:[%s4812_s3 + $0x10] sm:$0xff] %v3103_v60   ;;  %3132 = vst [vmem:[%s4812_s3 + $0x18] sm:$0xff] %v3108_v58  }
 0x24a   :  { %3133 = vst [vmem:[%s4812_s3 + $0x20] sm:$0xff] %v3113_v21   ;;  %3134 = vst [vmem:[%s4812_s3 + $0x28] sm:$0xff] %v3118_v48  }
 0x24b   :  { %3135 = vst [vmem:[%s4812_s3 + $0x30] sm:$0xff] %v3123_v54   ;;  %3136 = vst [vmem:[%s4812_s3 + $0x38] sm:$0xff] %v3128_v11  }

// kernel: discriminator_forward.7
= control target key start
LH: loop header
LB: loop body
LE: loop exit
PB: predicated region body
PF: predicated region fallthrough
CT: control target
= control target key end

     0   :  { %s2740_s1 = inlined_call_operand.vmem [shape: bf16[2048,128], index: 1, kind: input, shape index: {}]   ;;  %s2741_s0 = inlined_call_operand.vmem [shape: bf16[32,2048], index: 0, kind: input, shape index: {}]   ;;  %s2742_s2 = inlined_call_operand.vmem [shape: f32[1,128], index: 2, kind: input, shape index: {}]   ;;  %s2743_s3 = inlined_call_operand.vmem [shape: bf16[32,128], index: 3, kind: output, shape index: {}]  }
   0x1   :  { %v2101_v0 = vld [vmem:[%s2740_s1 + $0x78] sm:$0xff]   ;;  %v2105_v4 = vld [vmem:[%s2740_s1 + $0x70] sm:$0xff]   ;;  %v2109_v8 = vld [vmem:[%s2740_s1 + $0x68] sm:$0xff]  }
   0x2   :  { %v2102_v1 = vld [vmem:[%s2740_s1 + $0xf8] sm:$0xff]   ;;  %1877 = vmatprep.subr.bf16.mxu0 %v2101_v0  ;;  %v2106_v5 = vld [vmem:[%s2740_s1 + $0xf0] sm:$0xff]   ;;  %v2110_v9 = vld [vmem:[%s2740_s1 + $0xe8] sm:$0xff]  }
   0x3   :  { %v2103_v2 = vld [vmem:[%s2740_s1 + $0x38] sm:$0xff]   ;;  %1905 = vmatprep.subr.bf16.mxu1 %v2102_v1  ;;  %v2107_v6 = vld [vmem:[%s2740_s1 + $0x30] sm:$0xff]   ;;  %v2111_v10 = vld [vmem:[%s2740_s1 + $0x28] sm:$0xff]  }
   0x4   :  { %v2104_v3 = vld [vmem:[%s2740_s1 + $0xb8] sm:$0xff]   ;;  %1878 = vmatpush3.bf16.msra.mxu0 %v2103_v2  ;;  %v2108_v7 = vld [vmem:[%s2740_s1 + $0xb0] sm:$0xff]   ;;  %v2112_v11 = vld [vmem:[%s2740_s1 + $0xa8] sm:$0xff]  }
   0x5   :  { %1906 = vmatpush3.bf16.msra.mxu1 %v2104_v3  ;;  %1879 = vmatprep.subr.bf16.mxu0 %v2105_v4  ;;  %v2113_v12 = vld [vmem:[%s2740_s1 + $0x60] sm:$0xff]   ;;  %v2117_v16 = vld [vmem:[%s2740_s1 + $0x58] sm:$0xff]   ;;  %v2121_v20 = vld [vmem:[%s2740_s1 + $0x50] sm:$0xff]  }
   0x6   :  { %1907 = vmatprep.subr.bf16.mxu1 %v2106_v5  ;;  %v2114_v13 = vld [vmem:[%s2740_s1 + $0xe0] sm:$0xff]   ;;  %v2118_v17 = vld [vmem:[%s2740_s1 + $0xd8] sm:$0xff]   ;;  %v2122_v21 = vld [vmem:[%s2740_s1 + $0xd0] sm:$0xff]  }
   0x7   :  { %v2115_v14 = vld [vmem:[%s2740_s1 + $0x20] sm:$0xff]   ;;  %v2119_v18 = vld [vmem:[%s2740_s1 + $0x18] sm:$0xff]   ;;  %v2123_v22 = vld [vmem:[%s2740_s1 + $0x10] sm:$0xff]  }
   0x8   :  { %1880 = vmatpush3.bf16.msra.mxu0 %v2107_v6  ;;  %v2116_v15 = vld [vmem:[%s2740_s1 + $0xa0] sm:$0xff]   ;;  %v2120_v19 = vld [vmem:[%s2740_s1 + $0x98] sm:$0xff]   ;;  %v2124_v23 = vld [vmem:[%s2740_s1 + $0x90] sm:$0xff]  }
   0x9   :  { %1908 = vmatpush3.bf16.msra.mxu1 %v2108_v7  ;;  %1881 = vmatprep.subr.bf16.mxu0 %v2109_v8  ;;  %v2125_v24 = vld [vmem:[%s2740_s1 + $0x48] sm:$0xff]   ;;  %v2129_v28 = vld [vmem:[%s2740_s1 + $0x40] sm:$0xff]   ;;  %v2133_v40 = vld [vmem:[%s2740_s1 + $0x178] sm:$0xff]  }
   0xa   :  { %1909 = vmatprep.subr.bf16.mxu1 %v2110_v9  ;;  %v2126_v25 = vld [vmem:[%s2740_s1 + $0xc8] sm:$0xff]   ;;  %v2130_v29 = vld [vmem:[%s2740_s1 + $0xc0] sm:$0xff]   ;;  %v2134_v41 = vld [vmem:[%s2740_s1 + $0x1f8] sm:$0xff]  }
   0xb   :  { %v2127_v26 = vld [vmem:[%s2740_s1 + $0x8] sm:$0xff]   ;;  %v2131_v30 = vld [vmem:[%s2740_s1] sm:$0xff]   ;;  %v2135_v42 = vld [vmem:[%s2740_s1 + $0x138] sm:$0xff]  }
   0xc   :  { %1882 = vmatpush3.bf16.msra.mxu0 %v2111_v10  ;;  %v2128_v27 = vld [vmem:[%s2740_s1 + $0x88] sm:$0xff]   ;;  %v2132_v31 = vld [vmem:[%s2740_s1 + $0x80] sm:$0xff]   ;;  %v2136_v43 = vld [vmem:[%s2740_s1 + $0x1b8] sm:$0xff]  }
   0xd   :  { %1910 = vmatpush3.bf16.msra.mxu1 %v2112_v11  ;;  %1883 = vmatprep.subr.bf16.mxu0 %v2113_v12  ;;  %v15_v32 = vld [vmem:[%s2741_s0] sm:$0xff]  ;;  %v16_v34 = vld [vmem:[%s2741_s0 + $0x8] sm:$0xff]  ;;  %v2137_v44 = vld [vmem:[%s2740_s1 + $0x170] sm:$0xff]  }
   0xe   :  { %1911 = vmatprep.subr.bf16.mxu1 %v2114_v13  ;;  %v23_v33 = vld [vmem:[%s2741_s0 + $0x40] sm:$0xff]  ;;  %v24_v37 = vld [vmem:[%s2741_s0 + $0x48] sm:$0xff]  ;;  %v2138_v45 = vld [vmem:[%s2740_s1 + $0x1f0] sm:$0xff]  }
   0xf   :  { %v1698_v35 = vcombine.low %v15_v32, %v23_v33  ;;  %v1699_v36 = vcombine.high %v15_v32, %v23_v33  ;;  %v1700_v38 = vcombine.low %v16_v34, %v24_v37  ;;  %v1701_v39 = vcombine.high %v16_v34, %v24_v37  ;;  %v2139_v46 = vld [vmem:[%s2740_s1 + $0x130] sm:$0xff]   ;;  %v2141_v48 = vld [vmem:[%s2740_s1 + $0x168] sm:$0xff]   ;;  %v2145_v52 = vld [vmem:[%s2740_s1 + $0x160] sm:$0xff]  }
  0x10   :  { %1884 = vmatpush3.bf16.msra.mxu0 %v2115_v14  ;;  %v2140_v47 = vld [vmem:[%s2740_s1 + $0x1b0] sm:$0xff]   ;;  %v2142_v49 = vld [vmem:[%s2740_s1 + $0x1e8] sm:$0xff]   ;;  %v2146_v53 = vld [vmem:[%s2740_s1 + $0x1e0] sm:$0xff]  }
  0x11   :  { %1912 = vmatpush3.bf16.msra.mxu1 %v2116_v15  ;;  %1885 = vmatprep.subr.bf16.mxu0 %v2117_v16  ;;  %v2143_v50 = vld [vmem:[%s2740_s1 + $0x128] sm:$0xff]   ;;  %v2147_v54 = vld [vmem:[%s2740_s1 + $0x120] sm:$0xff]   ;;  %v2149_v56 = vld [vmem:[%s2740_s1 + $0x158] sm:$0xff]  }
  0x12   :  { %1913 = vmatprep.subr.bf16.mxu1 %v2118_v17  ;;  %1270 = vmatprep.mubr.bf16.mxu0 %v1699_v36  ;;  %v2144_v51 = vld [vmem:[%s2740_s1 + $0x1a8] sm:$0xff]   ;;  %v2148_v55 = vld [vmem:[%s2740_s1 + $0x1a0] sm:$0xff]   ;;  %v2150_v57 = vld [vmem:[%s2740_s1 + $0x1d8] sm:$0xff]  }
  0x13   :  { %1319 = vmatprep.mubr.bf16.mxu1 %v1701_v39  ;;  %v2151_v58 = vld [vmem:[%s2740_s1 + $0x118] sm:$0xff]   ;;  %v31_v60 = vld [vmem:[%s2741_s0 + $0x80] sm:$0xff]  ;;  %v32_v0 = vld [vmem:[%s2741_s0 + $0x88] sm:$0xff] }
  0x14   :  { %1886 = vmatpush3.bf16.msra.mxu0 %v2119_v18  ;;  %v2152_v59 = vld [vmem:[%s2740_s1 + $0x198] sm:$0xff]   ;;  %v39_v61 = vld [vmem:[%s2741_s0 + $0xc0] sm:$0xff]  ;;  %v40_v1 = vld [vmem:[%s2741_s0 + $0xc8] sm:$0xff] }
  0x15   :  { %1914 = vmatpush3.bf16.msra.mxu1 %v2120_v19  ;;  %1887 = vmatprep.subr.bf16.mxu0 %v2121_v20  ;;  %v1715_v62 = vcombine.high %v31_v60, %v39_v61  ;;  %v1714_v63 = vcombine.low %v31_v60, %v39_v61  ;;  %v1717_v2 = vcombine.high %v32_v0, %v40_v1  ;;  %v2153_v3 = vld [vmem:[%s2740_s1 + $0x150] sm:$0xff]   ;;  %v2157_v8 = vld [vmem:[%s2740_s1 + $0x148] sm:$0xff]   ;;  %v2161_v12 = vld [vmem:[%s2740_s1 + $0x140] sm:$0xff]  }
  0x16   :  { %1915 = vmatprep.subr.bf16.mxu1 %v2122_v21  ;;  %v1716_v4 = vcombine.low %v32_v0, %v40_v1  ;;  %v2154_v5 = vld [vmem:[%s2740_s1 + $0x1d0] sm:$0xff]   ;;  %v2158_v9 = vld [vmem:[%s2740_s1 + $0x1c8] sm:$0xff]   ;;  %v2162_v13 = vld [vmem:[%s2740_s1 + $0x1c0] sm:$0xff]  }
  0x17   :  { %v2155_v6 = vld [vmem:[%s2740_s1 + $0x110] sm:$0xff]   ;;  %v2159_v10 = vld [vmem:[%s2740_s1 + $0x108] sm:$0xff]   ;;  %v2163_v14 = vld [vmem:[%s2740_s1 + $0x100] sm:$0xff]  }
  0x18   :  { %1888 = vmatpush3.bf16.msra.mxu0 %v2123_v22  ;;  %v2156_v7 = vld [vmem:[%s2740_s1 + $0x190] sm:$0xff]   ;;  %v2160_v11 = vld [vmem:[%s2740_s1 + $0x188] sm:$0xff]   ;;  %v2164_v15 = vld [vmem:[%s2740_s1 + $0x180] sm:$0xff]  }
  0x19   :  { %1916 = vmatpush3.bf16.msra.mxu1 %v2124_v23  ;;  %1889 = vmatprep.subr.bf16.mxu0 %v2125_v24  ;;  %v17_v16 = vld [vmem:[%s2741_s0 + $0x10] sm:$0xff]  ;;  %v18_v18 = vld [vmem:[%s2741_s0 + $0x18] sm:$0xff]  ;;  %v2173_v36 = vld [vmem:[%s2740_s1 + $0x268] sm:$0xff]  }
  0x1a   :  { %1917 = vmatprep.subr.bf16.mxu1 %v2126_v25  ;;  %v25_v17 = vld [vmem:[%s2741_s0 + $0x50] sm:$0xff]  ;;  %v26_v19 = vld [vmem:[%s2741_s0 + $0x58] sm:$0xff]  ;;  %v2174_v37 = vld [vmem:[%s2740_s1 + $0x2e8] sm:$0xff]  }
  0x1b   :  { %v1702_v20 = vcombine.low %v17_v16, %v25_v17  ;;  %v1703_v21 = vcombine.high %v17_v16, %v25_v17  ;;  %v1704_v22 = vcombine.low %v18_v18, %v26_v19  ;;  %v1705_v23 = vcombine.high %v18_v18, %v26_v19  ;;  %v2165_v24 = vld [vmem:[%s2740_s1 + $0x278] sm:$0xff]   ;;  %v33_v32 = vld [vmem:[%s2741_s0 + $0x90] sm:$0xff]  ;;  %v2193_v60 = vld [vmem:[%s2740_s1 + $0x240] sm:$0xff]  }
  0x1c   :  { %1890 = vmatpush3.bf16.msra.mxu0 %v2127_v26  ;;  %v2166_v25 = vld [vmem:[%s2740_s1 + $0x2f8] sm:$0xff]   ;;  %v41_v33 = vld [vmem:[%s2741_s0 + $0xd0] sm:$0xff]  ;;  %v2194_v61 = vld [vmem:[%s2740_s1 + $0x2c0] sm:$0xff]  }
  0x1d   :  { %1918 = vmatpush3.bf16.msra.mxu1 %v2128_v27  ;;  %1891 = vmatprep.subr.bf16.mxu0 %v2129_v28  ;;  %v2167_v26 = vld [vmem:[%s2740_s1 + $0x238] sm:$0xff]   ;;  %v2169_v28 = vld [vmem:[%s2740_s1 + $0x270] sm:$0xff]   ;;  %v1719_v34 = vcombine.high %v33_v32, %v41_v33  ;;  %v19_v0 = vld [vmem:[%s2741_s0 + $0x20] sm:$0xff] }
  0x1e   :  { %1919 = vmatprep.subr.bf16.mxu1 %v2130_v29  ;;  %v2168_v27 = vld [vmem:[%s2740_s1 + $0x2b8] sm:$0xff]   ;;  %v2170_v29 = vld [vmem:[%s2740_s1 + $0x2f0] sm:$0xff]   ;;  %v27_v1 = vld [vmem:[%s2741_s0 + $0x60] sm:$0xff] }
  0x1f   :  { %v42_v39 = vld [vmem:[%s2741_s0 + $0xd8] sm:$0xff]  ;;  %v35_v16 = vld [vmem:[%s2741_s0 + $0xa0] sm:$0xff] }
  0x20   :  { %1892 = vmatpush3.bf16.msra.mxu0 %v2131_v30  ;;  %v2171_v30 = vld [vmem:[%s2740_s1 + $0x230] sm:$0xff]   ;;  %v43_v17 = vld [vmem:[%s2741_s0 + $0xe0] sm:$0xff] }
  0x21   :  { %1920 = vmatpush3.bf16.msra.mxu1 %v2132_v31  ;;  %1933 = vmatprep.subr.bf16.mxu0 %v2133_v40  ;;  %v2172_v31 = vld [vmem:[%s2740_s1 + $0x2b0] sm:$0xff]   ;;  %v1723_v18 = vcombine.high %v35_v16, %v43_v17  ;;  %v1722_v19 = vcombine.low %v35_v16, %v43_v17 }
  0x22   :  { %1961 = vmatprep.subr.bf16.mxu1 %v2134_v41  ;;  %v2175_v41 = vld [vmem:[%s2740_s1 + $0x228] sm:$0xff]  }
  0x23   :  { %1271 = vmatmul.mubr.bf16.vlgmr.msra.gmra.mxu0 %v1698_v35  ;;  %v1718_v35 = vcombine.low %v33_v32, %v41_v33  ;;  %v2213_v32 = vld [vmem:[%s2740_s1 + $0x358] sm:$0xff]  }
  0x24   :  { %1320 = vmatmul.mubr.bf16.vlgmr.msra.gmra.mxu1 %v1700_v38  ;;  %1934 = vmatpush3.bf16.msra.mxu0 %v2135_v42  ;;  %v34_v38 = vld [vmem:[%s2741_s0 + $0x98] sm:$0xff] }
  0x25   :  { %1962 = vmatpush3.bf16.msra.mxu1 %v2136_v43  ;;  %1935 = vmatprep.subr.bf16.mxu0 %v2137_v44  ;;  %v1721_v40 = vcombine.high %v34_v38, %v42_v39  ;;  %v1720_v42 = vcombine.low %v34_v38, %v42_v39  ;;  %v2176_v43 = vld [vmem:[%s2740_s1 + $0x2a8] sm:$0xff]   ;;  %v2177_v44 = vld [vmem:[%s2740_s1 + $0x260] sm:$0xff]   ;;  %v2214_v33 = vld [vmem:[%s2740_s1 + $0x3d8] sm:$0xff]  }
  0x26   :  { %1963 = vmatprep.subr.bf16.mxu1 %v2138_v45  ;;  %1278 = vmatprep.mubr.bf16.mxu0 %v1715_v62  ;;  %v2178_v45 = vld [vmem:[%s2740_s1 + $0x2e0] sm:$0xff]   ;;  %v2219_v38 = vld [vmem:[%s2740_s1 + $0x310] sm:$0xff]  }
  0x27   :  { %1327 = vmatprep.mubr.bf16.mxu1 %v1717_v2  ;;  %v2195_v62 = vld [vmem:[%s2740_s1 + $0x200] sm:$0xff]   ;;  %v1706_v2 = vcombine.low %v19_v0, %v27_v1  ;;  %v2220_v39 = vld [vmem:[%s2740_s1 + $0x390] sm:$0xff]  }
  0x28   :  { %1936 = vmatpush3.bf16.msra.mxu0 %v2139_v46  ;;  %v2179_v46 = vld [vmem:[%s2740_s1 + $0x220] sm:$0xff]  }
  0x29   :  { %1964 = vmatpush3.bf16.msra.mxu1 %v2140_v47  ;;  %1937 = vmatprep.subr.bf16.mxu0 %v2141_v48  ;;  %v2180_v47 = vld [vmem:[%s2740_s1 + $0x2a0] sm:$0xff]   ;;  %v2181_v48 = vld [vmem:[%s2740_s1 + $0x258] sm:$0xff]  }
  0x2a   :  { %1965 = vmatprep.subr.bf16.mxu1 %v2142_v49  ;;  %v2182_v49 = vld [vmem:[%s2740_s1 + $0x2d8] sm:$0xff]  }
  0x2b   :  { %1279 = vmatmul.mubr.bf16.gmra.mxu0 %v1714_v63  ;;  %v2196_v63 = vld [vmem:[%s2740_s1 + $0x280] sm:$0xff]  }
  0x2c   :  { %1938 = vmatpush3.bf16.msra.mxu0 %v2143_v50  ;;  %1328 = vmatmul.mubr.bf16.gmra.mxu1 %v1716_v4  ;;  %v2183_v50 = vld [vmem:[%s2740_s1 + $0x218] sm:$0xff]   ;;  %v20_v4 = vld [vmem:[%s2741_s0 + $0x28] sm:$0xff] }
  0x2d   :  { %1966 = vmatpush3.bf16.msra.mxu1 %v2144_v51  ;;  %1939 = vmatprep.subr.bf16.mxu0 %v2145_v52  ;;  %v2184_v51 = vld [vmem:[%s2740_s1 + $0x298] sm:$0xff]   ;;  %v2185_v52 = vld [vmem:[%s2740_s1 + $0x250] sm:$0xff]  }
  0x2e   :  { %1967 = vmatprep.subr.bf16.mxu1 %v2146_v53  ;;  %1368 = vmatprep.mubr.bf16.mxu0 %v1703_v21  ;;  %v2186_v53 = vld [vmem:[%s2740_s1 + $0x2d0] sm:$0xff]   ;;  %v2206_v21 = vld [vmem:[%s2740_s1 + $0x3e8] sm:$0xff]  }
  0x2f   :  { %1417 = vmatprep.mubr.bf16.mxu1 %v1705_v23  ;;  %v44_v23 = vld [vmem:[%s2741_s0 + $0xe8] sm:$0xff] }
  0x30   :  { %1940 = vmatpush3.bf16.msra.mxu0 %v2147_v54  ;;  %v2187_v54 = vld [vmem:[%s2740_s1 + $0x210] sm:$0xff]  }
  0x31   :  { %1968 = vmatpush3.bf16.msra.mxu1 %v2148_v55  ;;  %1941 = vmatprep.subr.bf16.mxu0 %v2149_v56  ;;  %v2188_v55 = vld [vmem:[%s2740_s1 + $0x290] sm:$0xff]   ;;  %v2189_v56 = vld [vmem:[%s2740_s1 + $0x248] sm:$0xff]  }
  0x32   :  { %1969 = vmatprep.subr.bf16.mxu1 %v2150_v57  ;;  %v2190_v57 = vld [vmem:[%s2740_s1 + $0x2c8] sm:$0xff]  }
  0x34   :  { %1942 = vmatpush3.bf16.msra.mxu0 %v2151_v58  ;;  %v2191_v58 = vld [vmem:[%s2740_s1 + $0x208] sm:$0xff]  }
  0x35   :  { %1970 = vmatpush3.bf16.msra.mxu1 %v2152_v59  ;;  %1943 = vmatprep.subr.bf16.mxu0 %v2153_v3  ;;  %v2192_v59 = vld [vmem:[%s2740_s1 + $0x288] sm:$0xff]   ;;  %v1707_v3 = vcombine.high %v19_v0, %v27_v1 }
  0x36   :  { %1971 = vmatprep.subr.bf16.mxu1 %v2154_v5  ;;  %v28_v5 = vld [vmem:[%s2741_s0 + $0x68] sm:$0xff] }
  0x38   :  { %1944 = vmatpush3.bf16.msra.mxu0 %v2155_v6  ;;  %v1708_v6 = vcombine.low %v20_v4, %v28_v5 }
  0x39   :  { %1972 = vmatpush3.bf16.msra.mxu1 %v2156_v7  ;;  %1945 = vmatprep.subr.bf16.mxu0 %v2157_v8  ;;  %v1709_v7 = vcombine.high %v20_v4, %v28_v5  ;;  %v2197_v8 = vld [vmem:[%s2740_s1 + $0x378] sm:$0xff]  }
  0x3a   :  { %1973 = vmatprep.subr.bf16.mxu1 %v2158_v9  ;;  %v2198_v9 = vld [vmem:[%s2740_s1 + $0x3f8] sm:$0xff]  }
  0x3c   :  { %1946 = vmatpush3.bf16.msra.mxu0 %v2159_v10  ;;  %v2199_v10 = vld [vmem:[%s2740_s1 + $0x338] sm:$0xff]  }
  0x3d   :  { %1974 = vmatpush3.bf16.msra.mxu1 %v2160_v11  ;;  %1947 = vmatprep.subr.bf16.mxu0 %v2161_v12  ;;  %v2200_v11 = vld [vmem:[%s2740_s1 + $0x3b8] sm:$0xff]   ;;  %v2201_v12 = vld [vmem:[%s2740_s1 + $0x370] sm:$0xff]  }
  0x3e   :  { %1975 = vmatprep.subr.bf16.mxu1 %v2162_v13  ;;  %v2202_v13 = vld [vmem:[%s2740_s1 + $0x3f0] sm:$0xff]  }
  0x40   :  { %1948 = vmatpush3.bf16.msra.mxu0 %v2163_v14  ;;  %v2203_v14 = vld [vmem:[%s2740_s1 + $0x330] sm:$0xff]  }
  0x41   :  { %1976 = vmatpush3.bf16.msra.mxu1 %v2164_v15  ;;  %1989 = vmatprep.subr.bf16.mxu0 %v2165_v24  ;;  %v2204_v15 = vld [vmem:[%s2740_s1 + $0x3b0] sm:$0xff]  }
  0x42   :  { %2017 = vmatprep.subr.bf16.mxu1 %v2166_v25  ;;  %v2207_v25 = vld [vmem:[%s2740_s1 + $0x328] sm:$0xff]  }
  0x43   :  { %1369 = vmatmul.mubr.bf16.vlgmr.msra.gmra.mxu0 %v1702_v20  ;;  %v2205_v20 = vld [vmem:[%s2740_s1 + $0x368] sm:$0xff]  }
  0x44   :  { %1418 = vmatmul.mubr.bf16.vlgmr.msra.gmra.mxu1 %v1704_v22  ;;  %1990 = vmatpush3.bf16.msra.mxu0 %v2167_v26  ;;  %v36_v22 = vld [vmem:[%s2741_s0 + $0xa8] sm:$0xff] }
  0x45   :  { %2018 = vmatpush3.bf16.msra.mxu1 %v2168_v27  ;;  %1991 = vmatprep.subr.bf16.mxu0 %v2169_v28  ;;  %v1725_v24 = vcombine.high %v36_v22, %v44_v23  ;;  %v1724_v26 = vcombine.low %v36_v22, %v44_v23  ;;  %v2208_v27 = vld [vmem:[%s2740_s1 + $0x3a8] sm:$0xff]   ;;  %v2209_v28 = vld [vmem:[%s2740_s1 + $0x360] sm:$0xff]  }
  0x46   :  { %2019 = vmatprep.subr.bf16.mxu1 %v2170_v29  ;;  %1376 = vmatprep.mubr.bf16.mxu0 %v1719_v34  ;;  %v2210_v29 = vld [vmem:[%s2740_s1 + $0x3e0] sm:$0xff]   ;;  %v2215_v34 = vld [vmem:[%s2740_s1 + $0x318] sm:$0xff]  }
  0x47   :  { %1425 = vmatprep.mubr.bf16.mxu1 %v1721_v40  ;;  %v2221_v40 = vld [vmem:[%s2740_s1 + $0x348] sm:$0xff]  }
  0x48   :  { %1992 = vmatpush3.bf16.msra.mxu0 %v2171_v30  ;;  %v2211_v30 = vld [vmem:[%s2740_s1 + $0x320] sm:$0xff]  }
  0x49   :  { %2020 = vmatpush3.bf16.msra.mxu1 %v2172_v31  ;;  %1993 = vmatprep.subr.bf16.mxu0 %v2173_v36  ;;  %v2212_v31 = vld [vmem:[%s2740_s1 + $0x3a0] sm:$0xff]   ;;  %v2217_v36 = vld [vmem:[%s2740_s1 + $0x350] sm:$0xff]  }
  0x4a   :  { %2021 = vmatprep.subr.bf16.mxu1 %v2174_v37  ;;  %v2218_v37 = vld [vmem:[%s2740_s1 + $0x3d0] sm:$0xff]  }
  0x4b   :  { %1377 = vmatmul.mubr.bf16.gmra.mxu0 %v1718_v35  ;;  %v2216_v35 = vld [vmem:[%s2740_s1 + $0x398] sm:$0xff]  }
  0x4c   :  { %1994 = vmatpush3.bf16.msra.mxu0 %v2175_v41  ;;  %1426 = vmatmul.mubr.bf16.gmra.mxu1 %v1720_v42  ;;  %v2222_v41 = vld [vmem:[%s2740_s1 + $0x3c8] sm:$0xff]  }
  0x4d   :  { %2022 = vmatpush3.bf16.msra.mxu1 %v2176_v43  ;;  %1995 = vmatprep.subr.bf16.mxu0 %v2177_v44  ;;  %v2223_v42 = vld [vmem:[%s2740_s1 + $0x308] sm:$0xff]   ;;  %v2225_v44 = vld [vmem:[%s2740_s1 + $0x340] sm:$0xff]  }
  0x4e   :  { %2023 = vmatprep.subr.bf16.mxu1 %v2178_v45  ;;  %1466 = vmatprep.mubr.bf16.mxu0 %v1707_v3  ;;  %v2224_v43 = vld [vmem:[%s2740_s1 + $0x388] sm:$0xff]   ;;  %v2226_v45 = vld [vmem:[%s2740_s1 + $0x3c0] sm:$0xff]  }
  0x4f   :  { %1515 = vmatprep.mubr.bf16.mxu1 %v1709_v7 }
  0x50   :  { %1996 = vmatpush3.bf16.msra.mxu0 %v2179_v46  ;;  %v2227_v46 = vld [vmem:[%s2740_s1 + $0x300] sm:$0xff]  }
  0x51   :  { %2024 = vmatpush3.bf16.msra.mxu1 %v2180_v47  ;;  %1997 = vmatprep.subr.bf16.mxu0 %v2181_v48  ;;  %v2228_v47 = vld [vmem:[%s2740_s1 + $0x380] sm:$0xff]   ;;  %v21_v48 = vld [vmem:[%s2741_s0 + $0x30] sm:$0xff] }
  0x52   :  { %2025 = vmatprep.subr.bf16.mxu1 %v2182_v49  ;;  %v29_v49 = vld [vmem:[%s2741_s0 + $0x70] sm:$0xff] }
  0x54   :  { %1998 = vmatpush3.bf16.msra.mxu0 %v2183_v50  ;;  %v22_v50 = vld [vmem:[%s2741_s0 + $0x38] sm:$0xff] }
  0x55   :  { %2026 = vmatpush3.bf16.msra.mxu1 %v2184_v51  ;;  %1999 = vmatprep.subr.bf16.mxu0 %v2185_v52  ;;  %v1710_v51 = vcombine.low %v21_v48, %v29_v49  ;;  %v1711_v52 = vcombine.high %v21_v48, %v29_v49 }
  0x56   :  { %2027 = vmatprep.subr.bf16.mxu1 %v2186_v53  ;;  %v30_v53 = vld [vmem:[%s2741_s0 + $0x78] sm:$0xff] }
  0x58   :  { %2000 = vmatpush3.bf16.msra.mxu0 %v2187_v54  ;;  %v37_v54 = vld [vmem:[%s2741_s0 + $0xb0] sm:$0xff] }
  0x59   :  { %2028 = vmatpush3.bf16.msra.mxu1 %v2188_v55  ;;  %2001 = vmatprep.subr.bf16.mxu0 %v2189_v56  ;;  %v45_v55 = vld [vmem:[%s2741_s0 + $0xf0] sm:$0xff]  ;;  %v1712_v56 = vcombine.low %v22_v50, %v30_v53 }
  0x5a   :  { %2029 = vmatprep.subr.bf16.mxu1 %v2190_v57  ;;  %v1713_v57 = vcombine.high %v22_v50, %v30_v53 }
  0x5c   :  { %2002 = vmatpush3.bf16.msra.mxu0 %v2191_v58  ;;  %v1727_v58 = vcombine.high %v37_v54, %v45_v55 }
  0x5d   :  { %2030 = vmatpush3.bf16.msra.mxu1 %v2192_v59  ;;  %2003 = vmatprep.subr.bf16.mxu0 %v2193_v60  ;;  %v38_v59 = vld [vmem:[%s2741_s0 + $0xb8] sm:$0xff] }
  0x5e   :  { %2031 = vmatprep.subr.bf16.mxu1 %v2194_v61  ;;  %v46_v60 = vld [vmem:[%s2741_s0 + $0xf8] sm:$0xff] }
  0x5f   :  { %v1729_v61 = vcombine.high %v38_v59, %v46_v60 }
  0x60   :  { %2004 = vmatpush3.bf16.msra.mxu0 %v2195_v62  ;;  %v1726_v62 = vcombine.low %v37_v54, %v45_v55 }
  0x61   :  { %2032 = vmatpush3.bf16.msra.mxu1 %v2196_v63  ;;  %2045 = vmatprep.subr.bf16.mxu0 %v2197_v8  ;;  %v1728_v63 = vcombine.low %v38_v59, %v46_v60 }
  0x62   :  { %2073 = vmatprep.subr.bf16.mxu1 %v2198_v9 }
  0x63   :  { %1467 = vmatmul.mubr.bf16.vlgmr.msra.gmra.mxu0 %v1706_v2 }
  0x64   :  { %1516 = vmatmul.mubr.bf16.vlgmr.msra.gmra.mxu1 %v1708_v6  ;;  %2046 = vmatpush3.bf16.msra.mxu0 %v2199_v10 }
  0x65   :  { %2074 = vmatpush3.bf16.msra.mxu1 %v2200_v11  ;;  %2047 = vmatprep.subr.bf16.mxu0 %v2201_v12 }
  0x66   :  { %2075 = vmatprep.subr.bf16.mxu1 %v2202_v13  ;;  %1474 = vmatprep.mubr.bf16.mxu0 %v1723_v18 }
  0x67   :  { %1523 = vmatprep.mubr.bf16.mxu1 %v1725_v24 }
  0x68   :  { %2048 = vmatpush3.bf16.msra.mxu0 %v2203_v14 }
  0x69   :  { %2076 = vmatpush3.bf16.msra.mxu1 %v2204_v15  ;;  %2049 = vmatprep.subr.bf16.mxu0 %v2205_v20 }
  0x6a   :  { %2077 = vmatprep.subr.bf16.mxu1 %v2206_v21 }
  0x6b   :  { %1475 = vmatmul.mubr.bf16.gmra.mxu0 %v1722_v19 }
  0x6c   :  { %2050 = vmatpush3.bf16.msra.mxu0 %v2207_v25  ;;  %1524 = vmatmul.mubr.bf16.gmra.mxu1 %v1724_v26 }
  0x6d   :  { %2078 = vmatpush3.bf16.msra.mxu1 %v2208_v27  ;;  %2051 = vmatprep.subr.bf16.mxu0 %v2209_v28 }
  0x6e   :  { %2079 = vmatprep.subr.bf16.mxu1 %v2210_v29  ;;  %1564 = vmatprep.mubr.bf16.mxu0 %v1711_v52 }
  0x6f   :  { %1613 = vmatprep.mubr.bf16.mxu1 %v1713_v57 }
  0x70   :  { %2052 = vmatpush3.bf16.msra.mxu0 %v2211_v30 }
  0x71   :  { %2080 = vmatpush3.bf16.msra.mxu1 %v2212_v31  ;;  %2053 = vmatprep.subr.bf16.mxu0 %v2213_v32 }
  0x72   :  { %2081 = vmatprep.subr.bf16.mxu1 %v2214_v33 }
  0x74   :  { %2054 = vmatpush3.bf16.msra.mxu0 %v2215_v34 }
  0x75   :  { %2082 = vmatpush3.bf16.msra.mxu1 %v2216_v35  ;;  %2055 = vmatprep.subr.bf16.mxu0 %v2217_v36 }
  0x76   :  { %2083 = vmatprep.subr.bf16.mxu1 %v2218_v37 }
  0x78   :  { %2056 = vmatpush3.bf16.msra.mxu0 %v2219_v38 }
  0x79   :  { %2084 = vmatpush3.bf16.msra.mxu1 %v2220_v39  ;;  %2057 = vmatprep.subr.bf16.mxu0 %v2221_v40 }
  0x7a   :  { %2085 = vmatprep.subr.bf16.mxu1 %v2222_v41 }
  0x7c   :  { %2058 = vmatpush3.bf16.msra.mxu0 %v2223_v42 }
  0x7d   :  { %2086 = vmatpush3.bf16.msra.mxu1 %v2224_v43  ;;  %2059 = vmatprep.subr.bf16.mxu0 %v2225_v44  ;;  %v1697_v44 = vld [vmem:[%s2742_s2] ss:$0 sm:$0xff] }
  0x7e   :  { %2087 = vmatprep.subr.bf16.mxu1 %v2226_v45 }
  0x80   :  { %2060 = vmatpush3.bf16.msra.mxu0 %v2227_v46 }
  0x81   :  { %2088 = vmatpush3.bf16.msra.mxu1 %v2228_v47 }
  0x83   :  { %1565 = vmatmul.mubr.bf16.vlgmr.msra.gmra.mxu0 %v1710_v51 }
  0x84   :  { %1614 = vmatmul.mubr.bf16.vlgmr.msra.gmra.mxu1 %v1712_v56  ;;  %1572 = vmatprep.mubr.bf16.mxu0 %v1727_v58 }
  0x85   :  { %1621 = vmatprep.mubr.bf16.mxu1 %v1729_v61 }
  0x8b   :  { %1573 = vmatmul.mubr.bf16.gmra.mxu0 %v1726_v62 }
  0x8c   :  { %1622 = vmatmul.mubr.bf16.gmra.mxu1 %v1728_v63 }
  0xe3   :  { %v1893_v0 = vpop.f32.mrf.mxu0 }
  0xe4   :  { %v1921_v2 = vpop.f32.mrf.mxu1 }
  0xe5   :  { %v1894_v1 = vpop.f32.mrf.mxu0 }
  0xe6   :  { %v1922_v4 = vpop.f32.mrf.mxu1  ;;  %v1895_v43 = vadd.f32 %v1894_v1, %v1893_v0 }
  0xe7   :  { %v1896_v3 = vpop.f32.mrf.mxu0  ;;  %v1923_v50 = vadd.f32 %v1922_v4, %v1921_v2 }
  0xe8   :  { %v1924_v6 = vpop.f32.mrf.mxu1  ;;  %v1273_v49 = vadd.f32 %v1895_v43, %v1697_v44 }
  0xe9   :  { %v1897_v5 = vpop.f32.mrf.mxu0 }
  0xea   :  { %v1925_v8 = vpop.f32.mrf.mxu1  ;;  %v1898_v41 = vadd.f32 %v1897_v5, %v1896_v3  ;;  %v1322_v61 = vadd.f32 %v1923_v50, %v1273_v49 }
  0xeb   :  { %v1899_v7 = vpop.f32.mrf.mxu0  ;;  %v1926_v51 = vadd.f32 %v1925_v8, %v1924_v6 }
  0xec   :  { %v1927_v10 = vpop.f32.mrf.mxu1  ;;  %v1276_v47 = vadd.f32 %v1898_v41, %v1697_v44 }
  0xed   :  { %v1900_v9 = vpop.f32.mrf.mxu0 }
  0xee   :  { %v1928_v12 = vpop.f32.mrf.mxu1  ;;  %v1901_v45 = vadd.f32 %v1900_v9, %v1899_v7  ;;  %v1325_v57 = vadd.f32 %v1926_v51, %v1276_v47 }
  0xef   :  { %v1902_v11 = vpop.f32.mrf.mxu0  ;;  %v1929_v54 = vadd.f32 %v1928_v12, %v1927_v10 }
  0xf0   :  { %v1930_v14 = vpop.f32.mrf.mxu1  ;;  %v1281_v53 = vadd.f32 %v1901_v45, %v1697_v44 }
  0xf1   :  { %v1903_v13 = vpop.f32.mrf.mxu0 }
  0xf2   :  { %v1931_v16 = vpop.f32.mrf.mxu1  ;;  %v1904_v55 = vadd.f32 %v1903_v13, %v1902_v11  ;;  %v1330_v63 = vadd.f32 %v1929_v54, %v1281_v53 }
  0xf3   :  { %v1932_v1 = vadd.f32 %v1931_v16, %v1930_v14 }
  0xf4   :  { %v1284_v0 = vadd.f32 %v1904_v55, %v1697_v44 }
 0x103   :  { %v1949_v15 = vpop.f32.mrf.mxu0 }
 0x104   :  { %v1977_v18 = vpop.f32.mrf.mxu1 }
 0x105   :  { %v1950_v17 = vpop.f32.mrf.mxu0 }
 0x106   :  { %v1978_v20 = vpop.f32.mrf.mxu1  ;;  %v1951_v58 = vadd.f32 %v1950_v17, %v1949_v15  ;;  %v1333_v17 = vadd.f32 %v1932_v1, %v1284_v0 }
 0x107   :  { %v1952_v19 = vpop.f32.mrf.mxu0  ;;  %v1979_v7 = vadd.f32 %v1978_v20, %v1977_v18 }
 0x108   :  { %v1980_v22 = vpop.f32.mrf.mxu1  ;;  %v1371_v5 = vadd.f32 %v1951_v58, %v1322_v61 }
 0x109   :  { %v1953_v21 = vpop.f32.mrf.mxu0 }
 0x10a   :  { %v1981_v24 = vpop.f32.mrf.mxu1  ;;  %v1954_v52 = vadd.f32 %v1953_v21, %v1952_v19 }
 0x10b   :  { %v1955_v23 = vpop.f32.mrf.mxu0  ;;  %v1982_v9 = vadd.f32 %v1981_v24, %v1980_v22 }
 0x10c   :  { %v1983_v25 = vpop.f32.mrf.mxu1  ;;  %v1374_v62 = vadd.f32 %v1954_v52, %v1325_v57 }
 0x10d   :  { %v1956_v26 = vpop.f32.mrf.mxu0 }
 0x10e   :  { %v1984_v27 = vpop.f32.mrf.mxu1  ;;  %v1957_v60 = vadd.f32 %v1956_v26, %v1955_v23  ;;  %v1423_v12 = vadd.f32 %v1982_v9, %v1374_v62  ;;  %v1420_v23 = vadd.f32 %v1979_v7, %v1371_v5 }
 0x10f   :  { %v1958_v28 = vpop.f32.mrf.mxu0  ;;  %v1985_v8 = vadd.f32 %v1984_v27, %v1983_v25 }
 0x110   :  { %v1986_v29 = vpop.f32.mrf.mxu1  ;;  %v1379_v6 = vadd.f32 %v1957_v60, %v1330_v63 }
 0x111   :  { %v1959_v30 = vpop.f32.mrf.mxu0 }
 0x112   :  { %v1987_v32 = vpop.f32.mrf.mxu1  ;;  %v1960_v10 = vadd.f32 %v1959_v30, %v1958_v28  ;;  %v1428_v14 = vadd.f32 %v1985_v8, %v1379_v6 }
 0x113   :  { %v1988_v43 = vadd.f32 %v1987_v32, %v1986_v29 }
 0x114   :  { %v1382_v16 = vadd.f32 %v1960_v10, %v1333_v17 }
 0x116   :  { %v1431_v44 = vadd.f32 %v1988_v43, %v1382_v16 }
 0x123   :  { %v2005_v31 = vpop.f32.mrf.mxu0 }
 0x124   :  { %v2033_v33 = vpop.f32.mrf.mxu1 }
 0x125   :  { %v2006_v34 = vpop.f32.mrf.mxu0 }
 0x126   :  { %v2034_v35 = vpop.f32.mrf.mxu1  ;;  %v2007_v13 = vadd.f32 %v2006_v34, %v2005_v31 }
 0x127   :  { %v2008_v36 = vpop.f32.mrf.mxu0  ;;  %v2035_v22 = vadd.f32 %v2034_v35, %v2033_v33 }
 0x128   :  { %v2036_v37 = vpop.f32.mrf.mxu1  ;;  %v1469_v20 = vadd.f32 %v2007_v13, %v1420_v23 }
 0x129   :  { %v2009_v38 = vpop.f32.mrf.mxu0 }
 0x12a   :  { %v2037_v39 = vpop.f32.mrf.mxu1  ;;  %v2010_v2 = vadd.f32 %v2009_v38, %v2008_v36 }
 0x12b   :  { %v2011_v40 = vpop.f32.mrf.mxu0  ;;  %v2038_v24 = vadd.f32 %v2037_v39, %v2036_v37 }
 0x12c   :  { %v2039_v42 = vpop.f32.mrf.mxu1  ;;  %v1472_v26 = vadd.f32 %v2010_v2, %v1423_v12 }
 0x12d   :  { %v2012_v46 = vpop.f32.mrf.mxu0 }
 0x12e   :  { %v2040_v48 = vpop.f32.mrf.mxu1  ;;  %v2013_v19 = vadd.f32 %v2012_v46, %v2011_v40  ;;  %v1521_v31 = vadd.f32 %v2038_v24, %v1472_v26  ;;  %v1518_v46 = vadd.f32 %v2035_v22, %v1469_v20 }
 0x12f   :  { %v2014_v56 = vpop.f32.mrf.mxu0  ;;  %v2041_v27 = vadd.f32 %v2040_v48, %v2039_v42 }
 0x130   :  { %v2042_v59 = vpop.f32.mrf.mxu1  ;;  %v1477_v25 = vadd.f32 %v2013_v19, %v1428_v14 }
 0x131   :  { %v2015_v3 = vpop.f32.mrf.mxu0 }
 0x132   :  { %v2043_v4 = vpop.f32.mrf.mxu1  ;;  %v2016_v28 = vadd.f32 %v2015_v3, %v2014_v56  ;;  %v1526_v50 = vadd.f32 %v2041_v27, %v1477_v25 }
 0x133   :  { %v2044_v51 = vadd.f32 %v2043_v4, %v2042_v59 }
 0x134   :  { %v1480_v29 = vadd.f32 %v2016_v28, %v1431_v44 }
 0x136   :  { %v1529_v57 = vadd.f32 %v2044_v51, %v1480_v29 }
 0x143   :  { %v2061_v11 = vpop.f32.mrf.mxu0 }
 0x144   :  { %v2089_v15 = vpop.f32.mrf.mxu1 }
 0x145   :  { %v2062_v21 = vpop.f32.mrf.mxu0 }
 0x146   :  { %v2090_v41 = vpop.f32.mrf.mxu1  ;;  %v2063_v34 = vadd.f32 %v2062_v21, %v2061_v11 }
 0x147   :  { %v2064_v18 = vpop.f32.mrf.mxu0  ;;  %v2091_v48 = vadd.f32 %v2090_v41, %v2089_v15 }
 0x148   :  { %v2092_v36 = vpop.f32.mrf.mxu1  ;;  %v1567_v33 = vadd.f32 %v2063_v34, %v1518_v46 }
 0x149   :  { %v2065_v30 = vpop.f32.mrf.mxu0 }
 0x14a   :  { %v2066_v38 = vadd.f32 %v2065_v30, %v2064_v18  ;;  %v2093_v40 = vpop.f32.mrf.mxu1  ;;  %v1616_v58 = vadd.f32 %v2091_v48, %v1567_v33 }
 0x14b   :  { %v2067_v45 = vpop.f32.mrf.mxu0  ;;  %v2094_v35 = vadd.f32 %v2093_v40, %v2092_v36 }
 0x14c   :  { %v1570_v47 = vadd.f32 %v2066_v38, %v1521_v31  ;;  %v2095_v49 = vpop.f32.mrf.mxu1 }
 0x14d   :  { %v2068_v32 = vpop.f32.mrf.mxu0 }
 0x14e   :  { %v2069_v37 = vadd.f32 %v2068_v32, %v2067_v45  ;;  %v2096_v39 = vpop.f32.mrf.mxu1  ;;  %v1619_v52 = vadd.f32 %v2094_v35, %v1570_v47 }
 0x14f   :  { %v2070_v42 = vpop.f32.mrf.mxu0  ;;  %v2097_v54 = vadd.f32 %v2096_v39, %v2095_v49 }
 0x150   :  { %v1575_v53 = vadd.f32 %v2069_v37, %v1526_v50  ;;  %v2098_v55 = vpop.f32.mrf.mxu1  ;;  %v1630_v63 = vadd.f32 %v1619_v52, %v1616_v58 }
 0x151   :  { %v2071_v56 = vpop.f32.mrf.mxu0 }
 0x152   :  { %v1624_v60 = vadd.f32 %v2097_v54, %v1575_v53  ;;  %v2072_v61 = vadd.f32 %v2071_v56, %v2070_v42  ;;  %v2099_v62 = vpop.f32.mrf.mxu1 }
 0x153   :  { %v2100_v1 = vadd.f32 %v2099_v62, %v2098_v55 }
 0x154   :  { %v1578_v0 = vadd.f32 %v2072_v61, %v1529_v57  ;;  %v1631_v59 = vadd.f32 %v1630_v63, %v1624_v60 }
 0x156   :  { %v1627_v3 = vadd.f32 %v2100_v1, %v1578_v0 }
 0x158   :  { %v1632_v5 = vadd.f32 %v1631_v59, %v1627_v3 }
 0x15a   :  { %v1633_v7 = vrot.slane %v1632_v5, 4 }
 0x15c   :  { %v1634_v9 = vadd.f32 %v1633_v7, %v1632_v5 }
 0x15e   :  { %v1635_v2 = vrot.slane %v1634_v9, 2 }
 0x160   :  { %v1636_v4 = vadd.f32 %v1635_v2, %v1634_v9 }
 0x162   :  { %v1637_v6 = vrot.slane %v1636_v4, 1 }
 0x164   :  { %v1638_v8 = vadd.f32 %v1637_v6, %v1636_v4 }
 0x166   :  { %v1640_v10 = vmul.f32 0.03125, %v1638_v8 }
 0x168   :  { %v1641_v11 = vsub.f32 %v1616_v58, %v1640_v10  ;;  %v1642_v12 = vsub.f32 %v1619_v52, %v1640_v10  ;;  %v1643_v13 = vsub.f32 %v1624_v60, %v1640_v10  ;;  %v1644_v15 = vsub.f32 %v1627_v3, %v1640_v10 }
 0x16a   :  { %v1645_v17 = vmul.f32 %v1641_v11, %v1641_v11  ;;  %v1646_v19 = vmul.f32 %v1642_v12, %v1642_v12  ;;  %v1647_v21 = vmul.f32 %v1643_v13, %v1643_v13  ;;  %v1648_v26 = vmul.f32 %v1644_v15, %v1644_v15 }
 0x16c   :  { %v1649_v23 = vadd.f32 %v1646_v19, %v1645_v17 }
 0x16e   :  { %v1650_v41 = vadd.f32 %v1649_v23, %v1647_v21 }
 0x170   :  { %v1651_v14 = vadd.f32 %v1650_v41, %v1648_v26 }
 0x172   :  { %v1652_v16 = vrot.slane %v1651_v14, 4 }
 0x174   :  { %v1653_v43 = vadd.f32 %v1652_v16, %v1651_v14 }
 0x176   :  { %v1654_v18 = vrot.slane %v1653_v43, 2 }
 0x178   :  { %v1655_v20 = vadd.f32 %v1654_v18, %v1653_v43 }
 0x17a   :  { %v1656_v22 = vrot.slane %v1655_v20, 1 }
 0x17c   :  { %v1657_v24 = vadd.f32 %v1656_v22, %v1655_v20 }
 0x17e   :  { %v1658_v36 = vmul.f32 0.03125, %v1657_v24 }
 0x180   :  { %v1659_v25 = vadd.f32 1e-05, %v1658_v36 }
 0x182   :  { %2229 = vrsqrt.f32 %v1659_v25 }
 0x18f   :  { %v2230_v27 = vpop.eup %2229 }
 0x190   :  { %v1661_v28 = vmul.f32 %v2230_v27, %v1641_v11  ;;  %v1662_v30 = vmul.f32 %v2230_v27, %v1642_v12  ;;  %v1663_v31 = vmul.f32 %v2230_v27, %v1643_v13  ;;  %v1664_v34 = vmul.f32 %v2230_v27, %v1644_v15 }
 0x192   :  { %v1665_v38 = vmul.f32 0.2, %v1661_v28  ;;  %v1666_v40 = vmul.f32 0.2, %v1662_v30  ;;  %v1667_v44 = vmul.f32 0.2, %v1663_v31 }
 0x193   :  { %v1668_v45 = vmul.f32 0.2, %v1664_v34 }
 0x194   :  { %v1669_v46 = vmax.f32 %v1661_v28, %v1665_v38  ;;  %v1670_v47 = vmax.f32 %v1662_v30, %v1666_v40  ;;  %v1671_v49 = vmax.f32 %v1663_v31, %v1667_v44 }
 0x195   :  { %v1672_v50 = vmax.f32 %v1664_v34, %v1668_v45 }
 0x196   :  { %v1869_v29 = vpack.c.bf16 %v1670_v47, %v1669_v46 }
 0x197   :  { %v1874_v32 = vpack.c.bf16 %v1672_v50, %v1671_v49 }
 0x198   :  { %1870 = vst [vmem:[%s2743_s3] sm:$0xff] %v1869_v29  }
 0x199   :  { %1876 = vst [vmem:[%s2743_s3 + $0x8] sm:$0xff] %v1874_v32  }

// kernel: discriminator_forward.8
= control target key start
LH: loop header
LB: loop body
LE: loop exit
PB: predicated region body
PF: predicated region fallthrough
CT: control target
= control target key end

     0   :  { %s3542_s1 = inlined_call_operand.vmem [shape: bf16[2048,256], index: 1, kind: input, shape index: {}]   ;;  %s3543_s0 = inlined_call_operand.vmem [shape: bf16[8,2048], index: 0, kind: input, shape index: {}]   ;;  %s3544_s2 = inlined_call_operand.vmem [shape: f32[1,256], index: 2, kind: input, shape index: {}]   ;;  %s3545_s3 = inlined_call_operand.vmem [shape: bf16[8,256], index: 3, kind: output, shape index: {}]  }
   0x1   :  { %v2284_v0 = vld [vmem:[%s3542_s1 + $0x74] ss:$8 sps:$4 sm:$0xff]   ;;  %v2288_v2 = vld [vmem:[%s3542_s1 + $0x70] ss:$8 sps:$4 sm:$0xff]   ;;  %v2290_v4 = vld [vmem:[%s3542_s1 + $0x64] ss:$8 sps:$4 sm:$0xff]  }
   0x2   :  { %v2286_v1 = vld [vmem:[%s3542_s1 + $0x174] ss:$8 sps:$4 sm:$0xff]   ;;  %1626 = vmatprep.subr.bf16.mxu0 %v2284_v0  ;;  %v2289_v3 = vld [vmem:[%s3542_s1 + $0x170] ss:$8 sps:$4 sm:$0xff]   ;;  %v2292_v5 = vld [vmem:[%s3542_s1 + $0x164] ss:$8 sps:$4 sm:$0xff]  }
   0x3   :  { %1667 = vmatprep.subr.bf16.mxu1 %v2286_v1  ;;  %1627 = vmatpush1.bf16.msra.mxu0 %v2288_v2  ;;  %v2294_v6 = vld [vmem:[%s3542_s1 + $0x60] ss:$8 sps:$4 sm:$0xff]   ;;  %v2296_v8 = vld [vmem:[%s3542_s1 + $0x54] ss:$8 sps:$4 sm:$0xff]   ;;  %v2300_v10 = vld [vmem:[%s3542_s1 + $0x50] ss:$8 sps:$4 sm:$0xff]  }
   0x4   :  { %1668 = vmatpush1.bf16.msra.mxu1 %v2289_v3  ;;  %1628 = vmatprep.subr.bf16.mxu0 %v2290_v4  ;;  %v2295_v7 = vld [vmem:[%s3542_s1 + $0x160] ss:$8 sps:$4 sm:$0xff]   ;;  %v2298_v9 = vld [vmem:[%s3542_s1 + $0x154] ss:$8 sps:$4 sm:$0xff]   ;;  %v2301_v11 = vld [vmem:[%s3542_s1 + $0x150] ss:$8 sps:$4 sm:$0xff]  }
   0x5   :  { %1669 = vmatprep.subr.bf16.mxu1 %v2292_v5  ;;  %v2302_v12 = vld [vmem:[%s3542_s1 + $0x44] ss:$8 sps:$4 sm:$0xff]   ;;  %v2306_v14 = vld [vmem:[%s3542_s1 + $0x40] ss:$8 sps:$4 sm:$0xff]   ;;  %v2308_v16 = vld [vmem:[%s3542_s1 + $0x34] ss:$8 sps:$4 sm:$0xff]  }
   0x6   :  { %v2304_v13 = vld [vmem:[%s3542_s1 + $0x144] ss:$8 sps:$4 sm:$0xff]   ;;  %v2307_v15 = vld [vmem:[%s3542_s1 + $0x140] ss:$8 sps:$4 sm:$0xff]   ;;  %v2310_v17 = vld [vmem:[%s3542_s1 + $0x134] ss:$8 sps:$4 sm:$0xff]  }
   0x7   :  { %1629 = vmatpush1.bf16.msra.mxu0 %v2294_v6  ;;  %v2312_v18 = vld [vmem:[%s3542_s1 + $0x30] ss:$8 sps:$4 sm:$0xff]   ;;  %v2314_v20 = vld [vmem:[%s3542_s1 + $0x24] ss:$8 sps:$4 sm:$0xff]   ;;  %v2318_v22 = vld [vmem:[%s3542_s1 + $0x20] ss:$8 sps:$4 sm:$0xff]  }
   0x8   :  { %1670 = vmatpush1.bf16.msra.mxu1 %v2295_v7  ;;  %1630 = vmatprep.subr.bf16.mxu0 %v2296_v8  ;;  %v2313_v19 = vld [vmem:[%s3542_s1 + $0x130] ss:$8 sps:$4 sm:$0xff]   ;;  %v2316_v21 = vld [vmem:[%s3542_s1 + $0x124] ss:$8 sps:$4 sm:$0xff]   ;;  %v2319_v23 = vld [vmem:[%s3542_s1 + $0x120] ss:$8 sps:$4 sm:$0xff]  }
   0x9   :  { %1671 = vmatprep.subr.bf16.mxu1 %v2298_v9  ;;  %v2320_v24 = vld [vmem:[%s3542_s1 + $0x14] ss:$8 sps:$4 sm:$0xff]   ;;  %v2324_v26 = vld [vmem:[%s3542_s1 + $0x10] ss:$8 sps:$4 sm:$0xff]   ;;  %v2326_v28 = vld [vmem:[%s3542_s1 + $0x4] ss:$8 sps:$4 sm:$0xff]  }
   0xa   :  { %v2322_v25 = vld [vmem:[%s3542_s1 + $0x114] ss:$8 sps:$4 sm:$0xff]   ;;  %v2325_v27 = vld [vmem:[%s3542_s1 + $0x110] ss:$8 sps:$4 sm:$0xff]   ;;  %v2328_v29 = vld [vmem:[%s3542_s1 + $0x104] ss:$8 sps:$4 sm:$0xff]  }
   0xb   :  { %1631 = vmatpush1.bf16.msra.mxu0 %v2300_v10  ;;  %v2330_v30 = vld [vmem:[%s3542_s1] ss:$8 sps:$4 sm:$0xff]   ;;  %v2332_v32 = vld [vmem:[%s3542_s1 + $0xf4] ss:$8 sps:$4 sm:$0xff]   ;;  %v2336_v34 = vld [vmem:[%s3542_s1 + $0xf0] ss:$8 sps:$4 sm:$0xff]  }
   0xc   :  { %1672 = vmatpush1.bf16.msra.mxu1 %v2301_v11  ;;  %1632 = vmatprep.subr.bf16.mxu0 %v2302_v12  ;;  %v2331_v31 = vld [vmem:[%s3542_s1 + $0x100] ss:$8 sps:$4 sm:$0xff]   ;;  %v2334_v33 = vld [vmem:[%s3542_s1 + $0x1f4] ss:$8 sps:$4 sm:$0xff]   ;;  %v2337_v35 = vld [vmem:[%s3542_s1 + $0x1f0] ss:$8 sps:$4 sm:$0xff]  }
   0xd   :  { %1673 = vmatprep.subr.bf16.mxu1 %v2304_v13  ;;  %v2338_v36 = vld [vmem:[%s3542_s1 + $0xe4] ss:$8 sps:$4 sm:$0xff]   ;;  %v2342_v38 = vld [vmem:[%s3542_s1 + $0xe0] ss:$8 sps:$4 sm:$0xff]   ;;  %v2344_v40 = vld [vmem:[%s3542_s1 + $0xd4] ss:$8 sps:$4 sm:$0xff]  }
   0xe   :  { %v2340_v37 = vld [vmem:[%s3542_s1 + $0x1e4] ss:$8 sps:$4 sm:$0xff]   ;;  %v2343_v39 = vld [vmem:[%s3542_s1 + $0x1e0] ss:$8 sps:$4 sm:$0xff]   ;;  %v2346_v41 = vld [vmem:[%s3542_s1 + $0x1d4] ss:$8 sps:$4 sm:$0xff]  }
   0xf   :  { %1633 = vmatpush1.bf16.msra.mxu0 %v2306_v14  ;;  %v2348_v42 = vld [vmem:[%s3542_s1 + $0xd0] ss:$8 sps:$4 sm:$0xff]   ;;  %v2350_v44 = vld [vmem:[%s3542_s1 + $0xc4] ss:$8 sps:$4 sm:$0xff]   ;;  %v2354_v49 = vld [vmem:[%s3542_s1 + $0xc0] ss:$8 sps:$4 sm:$0xff]  }
  0x10   :  { %1674 = vmatpush1.bf16.msra.mxu1 %v2307_v15  ;;  %1634 = vmatprep.subr.bf16.mxu0 %v2308_v16  ;;  %v2349_v43 = vld [vmem:[%s3542_s1 + $0x1d0] ss:$8 sps:$4 sm:$0xff]   ;;  %v2352_v45 = vld [vmem:[%s3542_s1 + $0x1c4] ss:$8 sps:$4 sm:$0xff]   ;;  %v2355_v50 = vld [vmem:[%s3542_s1 + $0x1c0] ss:$8 sps:$4 sm:$0xff]  }
  0x11   :  { %1675 = vmatprep.subr.bf16.mxu1 %v2310_v17  ;;  %v14_v46 = vld [vmem:[%s3543_s0] sm:$0xff]  ;;  %v15_v48 = vld [vmem:[%s3543_s0 + $0x8] sm:$0xff]  ;;  %v2356_v52 = vld [vmem:[%s3542_s1 + $0xb4] ss:$8 sps:$4 sm:$0xff]  }
  0x12   :  { %v2011_v47 = vcombine.high %v14_v46, %v14_v46  ;;  %v2013_v51 = vcombine.high %v15_v48, %v15_v48  ;;  %v2358_v53 = vld [vmem:[%s3542_s1 + $0x1b4] ss:$8 sps:$4 sm:$0xff]   ;;  %v2360_v54 = vld [vmem:[%s3542_s1 + $0xb0] ss:$8 sps:$4 sm:$0xff]   ;;  %v2362_v56 = vld [vmem:[%s3542_s1 + $0xa4] ss:$8 sps:$4 sm:$0xff]   ;;  %v2010_v6 = vcombine.low %v14_v46, %v14_v46  ;;  %v2012_v7 = vcombine.low %v15_v48, %v15_v48 }
  0x13   :  { %1635 = vmatpush1.bf16.msra.mxu0 %v2312_v18  ;;  %v2361_v55 = vld [vmem:[%s3542_s1 + $0x1b0] ss:$8 sps:$4 sm:$0xff]   ;;  %v2364_v57 = vld [vmem:[%s3542_s1 + $0x1a4] ss:$8 sps:$4 sm:$0xff]   ;;  %v2366_v58 = vld [vmem:[%s3542_s1 + $0xa0] ss:$8 sps:$4 sm:$0xff]  }
  0x14   :  { %1676 = vmatpush1.bf16.msra.mxu1 %v2313_v19  ;;  %1636 = vmatprep.subr.bf16.mxu0 %v2314_v20  ;;  %v2367_v59 = vld [vmem:[%s3542_s1 + $0x1a0] ss:$8 sps:$4 sm:$0xff]   ;;  %v2368_v60 = vld [vmem:[%s3542_s1 + $0x94] ss:$8 sps:$4 sm:$0xff]   ;;  %v2372_v62 = vld [vmem:[%s3542_s1 + $0x90] ss:$8 sps:$4 sm:$0xff]  }
  0x15   :  { %1677 = vmatprep.subr.bf16.mxu1 %v2316_v21  ;;  %1658 = vmatprep.mubr.bf16.mxu0 %v2011_v47  ;;  %v2370_v61 = vld [vmem:[%s3542_s1 + $0x194] ss:$8 sps:$4 sm:$0xff]   ;;  %v2373_v63 = vld [vmem:[%s3542_s1 + $0x190] ss:$8 sps:$4 sm:$0xff]   ;;  %v2374_v0 = vld [vmem:[%s3542_s1 + $0x84] ss:$8 sps:$4 sm:$0xff]  }
  0x16   :  { %1699 = vmatprep.mubr.bf16.mxu1 %v2013_v51  ;;  %v2376_v1 = vld [vmem:[%s3542_s1 + $0x184] ss:$8 sps:$4 sm:$0xff]   ;;  %v2378_v2 = vld [vmem:[%s3542_s1 + $0x80] ss:$8 sps:$4 sm:$0xff]   ;;  %v2386_v4 = vld [vmem:[%s3542_s1 + $0x274] ss:$8 sps:$4 sm:$0xff]  }
  0x17   :  { %1637 = vmatpush1.bf16.msra.mxu0 %v2318_v22  ;;  %v2379_v3 = vld [vmem:[%s3542_s1 + $0x180] ss:$8 sps:$4 sm:$0xff]   ;;  %v2389_v5 = vld [vmem:[%s3542_s1 + $0x374] ss:$8 sps:$4 sm:$0xff]   ;;  %v2384_v8 = vld [vmem:[%s3542_s1 + $0x270] ss:$8 sps:$4 sm:$0xff]  }
  0x18   :  { %1678 = vmatpush1.bf16.msra.mxu1 %v2319_v23  ;;  %1638 = vmatprep.subr.bf16.mxu0 %v2320_v24  ;;  %v2387_v9 = vld [vmem:[%s3542_s1 + $0x370] ss:$8 sps:$4 sm:$0xff]   ;;  %v2392_v10 = vld [vmem:[%s3542_s1 + $0x264] ss:$8 sps:$4 sm:$0xff]   ;;  %v2390_v12 = vld [vmem:[%s3542_s1 + $0x260] ss:$8 sps:$4 sm:$0xff]  }
  0x19   :  { %1679 = vmatprep.subr.bf16.mxu1 %v2322_v25  ;;  %v2395_v11 = vld [vmem:[%s3542_s1 + $0x364] ss:$8 sps:$4 sm:$0xff]   ;;  %v2393_v13 = vld [vmem:[%s3542_s1 + $0x360] ss:$8 sps:$4 sm:$0xff]   ;;  %v2398_v14 = vld [vmem:[%s3542_s1 + $0x254] ss:$8 sps:$4 sm:$0xff]  }
  0x1a   :  { %v2401_v15 = vld [vmem:[%s3542_s1 + $0x354] ss:$8 sps:$4 sm:$0xff]   ;;  %v2396_v16 = vld [vmem:[%s3542_s1 + $0x250] ss:$8 sps:$4 sm:$0xff]   ;;  %v2404_v18 = vld [vmem:[%s3542_s1 + $0x244] ss:$8 sps:$4 sm:$0xff]  }
  0x1b   :  { %1639 = vmatpush1.bf16.msra.mxu0 %v2324_v26  ;;  %v2399_v17 = vld [vmem:[%s3542_s1 + $0x350] ss:$8 sps:$4 sm:$0xff]   ;;  %v2407_v19 = vld [vmem:[%s3542_s1 + $0x344] ss:$8 sps:$4 sm:$0xff]   ;;  %v2402_v20 = vld [vmem:[%s3542_s1 + $0x240] ss:$8 sps:$4 sm:$0xff]  }
  0x1c   :  { %1680 = vmatpush1.bf16.msra.mxu1 %v2325_v27  ;;  %1640 = vmatprep.subr.bf16.mxu0 %v2326_v28  ;;  %v2405_v21 = vld [vmem:[%s3542_s1 + $0x340] ss:$8 sps:$4 sm:$0xff]   ;;  %v2410_v22 = vld [vmem:[%s3542_s1 + $0x234] ss:$8 sps:$4 sm:$0xff]   ;;  %v2408_v24 = vld [vmem:[%s3542_s1 + $0x230] ss:$8 sps:$4 sm:$0xff]  }
  0x1d   :  { %1681 = vmatprep.subr.bf16.mxu1 %v2328_v29  ;;  %v2413_v23 = vld [vmem:[%s3542_s1 + $0x334] ss:$8 sps:$4 sm:$0xff]   ;;  %v2411_v25 = vld [vmem:[%s3542_s1 + $0x330] ss:$8 sps:$4 sm:$0xff]   ;;  %v2416_v26 = vld [vmem:[%s3542_s1 + $0x224] ss:$8 sps:$4 sm:$0xff]  }
  0x1e   :  { %v2419_v27 = vld [vmem:[%s3542_s1 + $0x324] ss:$8 sps:$4 sm:$0xff]   ;;  %v2414_v28 = vld [vmem:[%s3542_s1 + $0x220] ss:$8 sps:$4 sm:$0xff]   ;;  %v2449_v51 = vld [vmem:[%s3542_s1 + $0x3d4] ss:$8 sps:$4 sm:$0xff]  }
  0x1f   :  { %1641 = vmatpush1.bf16.msra.mxu0 %v2330_v30  ;;  %v2417_v29 = vld [vmem:[%s3542_s1 + $0x320] ss:$8 sps:$4 sm:$0xff]   ;;  %v2422_v30 = vld [vmem:[%s3542_s1 + $0x214] ss:$8 sps:$4 sm:$0xff]   ;;  %v2440_v46 = vld [vmem:[%s3542_s1 + $0x2e4] ss:$8 sps:$4 sm:$0xff]  }
  0x20   :  { %1682 = vmatpush1.bf16.msra.mxu1 %v2331_v31  ;;  %1642 = vmatprep.subr.bf16.mxu0 %v2332_v32  ;;  %v2425_v31 = vld [vmem:[%s3542_s1 + $0x314] ss:$8 sps:$4 sm:$0xff]   ;;  %v2443_v47 = vld [vmem:[%s3542_s1 + $0x3e4] ss:$8 sps:$4 sm:$0xff]   ;;  %v2438_v48 = vld [vmem:[%s3542_s1 + $0x2e0] ss:$8 sps:$4 sm:$0xff]  }
  0x21   :  { %1683 = vmatprep.subr.bf16.mxu1 %v2334_v33  ;;  %v2987_v32 = vld [vmem:[%s3543_s0 + $0x10] sm:$0xff]  ;;  %v2992_v33 = vld [vmem:[%s3543_s0 + $0x18] sm:$0xff] }
  0x23   :  { %1643 = vmatpush2.bf16.msra.mxu0 %v2336_v34  ;;  %v2420_v34 = vld [vmem:[%s3542_s1 + $0x210] ss:$8 sps:$4 sm:$0xff]  }
  0x24   :  { %1684 = vmatpush2.bf16.msra.mxu1 %v2337_v35  ;;  %1644 = vmatprep.subr.bf16.mxu0 %v2338_v36  ;;  %v2423_v35 = vld [vmem:[%s3542_s1 + $0x310] ss:$8 sps:$4 sm:$0xff]   ;;  %v2015_v36 = vcombine.high %v2987_v32, %v2987_v32 }
  0x25   :  { %1685 = vmatprep.subr.bf16.mxu1 %v2340_v37  ;;  %v2017_v37 = vcombine.high %v2992_v33, %v2992_v33 }
  0x27   :  { %1645 = vmatpush2.bf16.msra.mxu0 %v2342_v38  ;;  %v2428_v38 = vld [vmem:[%s3542_s1 + $0x204] ss:$8 sps:$4 sm:$0xff]  }
  0x28   :  { %1686 = vmatpush2.bf16.msra.mxu1 %v2343_v39  ;;  %1646 = vmatprep.subr.bf16.mxu0 %v2344_v40  ;;  %v2431_v39 = vld [vmem:[%s3542_s1 + $0x304] ss:$8 sps:$4 sm:$0xff]   ;;  %v2426_v40 = vld [vmem:[%s3542_s1 + $0x200] ss:$8 sps:$4 sm:$0xff]  }
  0x29   :  { %1687 = vmatprep.subr.bf16.mxu1 %v2346_v41  ;;  %v2429_v41 = vld [vmem:[%s3542_s1 + $0x300] ss:$8 sps:$4 sm:$0xff]  }
  0x2b   :  { %1647 = vmatpush2.bf16.msra.mxu0 %v2348_v42  ;;  %v2434_v42 = vld [vmem:[%s3542_s1 + $0x2f4] ss:$8 sps:$4 sm:$0xff]  }
  0x2c   :  { %1688 = vmatpush2.bf16.msra.mxu1 %v2349_v43  ;;  %1648 = vmatprep.subr.bf16.mxu0 %v2350_v44  ;;  %v2437_v43 = vld [vmem:[%s3542_s1 + $0x3f4] ss:$8 sps:$4 sm:$0xff]   ;;  %v2432_v44 = vld [vmem:[%s3542_s1 + $0x2f0] ss:$8 sps:$4 sm:$0xff]  }
  0x2d   :  { %1689 = vmatprep.subr.bf16.mxu1 %v2352_v45  ;;  %v2435_v45 = vld [vmem:[%s3542_s1 + $0x3f0] ss:$8 sps:$4 sm:$0xff]  }
  0x2f   :  { %1649 = vmatpush2.bf16.msra.mxu0 %v2354_v49  ;;  %v2441_v49 = vld [vmem:[%s3542_s1 + $0x3e0] ss:$8 sps:$4 sm:$0xff]  }
  0x30   :  { %1690 = vmatpush2.bf16.msra.mxu1 %v2355_v50  ;;  %1650 = vmatprep.subr.bf16.mxu0 %v2356_v52  ;;  %v2446_v50 = vld [vmem:[%s3542_s1 + $0x2d4] ss:$8 sps:$4 sm:$0xff]   ;;  %v2444_v52 = vld [vmem:[%s3542_s1 + $0x2d0] ss:$8 sps:$4 sm:$0xff]  }
  0x31   :  { %1691 = vmatprep.subr.bf16.mxu1 %v2358_v53  ;;  %v2447_v53 = vld [vmem:[%s3542_s1 + $0x3d0] ss:$8 sps:$4 sm:$0xff]  }
  0x33   :  { %1651 = vmatpush2.bf16.msra.mxu0 %v2360_v54  ;;  %v2452_v54 = vld [vmem:[%s3542_s1 + $0x2c4] ss:$8 sps:$4 sm:$0xff]  }
  0x34   :  { %1692 = vmatpush2.bf16.msra.mxu1 %v2361_v55  ;;  %1652 = vmatprep.subr.bf16.mxu0 %v2362_v56  ;;  %v2455_v55 = vld [vmem:[%s3542_s1 + $0x3c4] ss:$8 sps:$4 sm:$0xff]   ;;  %v2450_v56 = vld [vmem:[%s3542_s1 + $0x2c0] ss:$8 sps:$4 sm:$0xff]  }
  0x35   :  { %1693 = vmatprep.subr.bf16.mxu1 %v2364_v57  ;;  %v2453_v57 = vld [vmem:[%s3542_s1 + $0x3c0] ss:$8 sps:$4 sm:$0xff]  }
  0x37   :  { %1653 = vmatpush2.bf16.msra.mxu0 %v2366_v58  ;;  %v2458_v58 = vld [vmem:[%s3542_s1 + $0x2b4] ss:$8 sps:$4 sm:$0xff]  }
  0x38   :  { %1694 = vmatpush2.bf16.msra.mxu1 %v2367_v59  ;;  %1654 = vmatprep.subr.bf16.mxu0 %v2368_v60  ;;  %v2461_v59 = vld [vmem:[%s3542_s1 + $0x3b4] ss:$8 sps:$4 sm:$0xff]   ;;  %v2456_v60 = vld [vmem:[%s3542_s1 + $0x2b0] ss:$8 sps:$4 sm:$0xff]  }
  0x39   :  { %1695 = vmatprep.subr.bf16.mxu1 %v2370_v61  ;;  %v2459_v61 = vld [vmem:[%s3542_s1 + $0x3b0] ss:$8 sps:$4 sm:$0xff]  }
  0x3b   :  { %1655 = vmatpush2.bf16.msra.mxu0 %v2372_v62  ;;  %v2464_v62 = vld [vmem:[%s3542_s1 + $0x2a4] ss:$8 sps:$4 sm:$0xff]  }
  0x3c   :  { %1696 = vmatpush2.bf16.msra.mxu1 %v2373_v63  ;;  %1656 = vmatprep.subr.bf16.mxu0 %v2374_v0  ;;  %v2467_v63 = vld [vmem:[%s3542_s1 + $0x3a4] ss:$8 sps:$4 sm:$0xff]   ;;  %v2462_v0 = vld [vmem:[%s3542_s1 + $0x2a0] ss:$8 sps:$4 sm:$0xff]  }
  0x3d   :  { %1697 = vmatprep.subr.bf16.mxu1 %v2376_v1  ;;  %v2465_v1 = vld [vmem:[%s3542_s1 + $0x3a0] ss:$8 sps:$4 sm:$0xff]  }
  0x3f   :  { %1657 = vmatpush2.bf16.msra.mxu0 %v2378_v2  ;;  %v2470_v2 = vld [vmem:[%s3542_s1 + $0x294] ss:$8 sps:$4 sm:$0xff]  }
  0x40   :  { %1698 = vmatpush2.bf16.msra.mxu1 %v2379_v3  ;;  %1708 = vmatprep.subr.bf16.mxu0 %v2386_v4  ;;  %v2473_v3 = vld [vmem:[%s3542_s1 + $0x394] ss:$8 sps:$4 sm:$0xff]   ;;  %v2468_v4 = vld [vmem:[%s3542_s1 + $0x290] ss:$8 sps:$4 sm:$0xff]  }
  0x41   :  { %1749 = vmatprep.subr.bf16.mxu1 %v2389_v5  ;;  %v2471_v5 = vld [vmem:[%s3542_s1 + $0x390] ss:$8 sps:$4 sm:$0xff]  }
  0x42   :  { %1659 = vmatmul.mubr.bf16.vlgmr.msra.gmra.mxu0 %v2010_v6  ;;  %v2476_v6 = vld [vmem:[%s3542_s1 + $0x284] ss:$8 sps:$4 sm:$0xff]  }
  0x43   :  { %1700 = vmatmul.mubr.bf16.vlgmr.msra.gmra.mxu1 %v2012_v7  ;;  %1709 = vmatpush1.bf16.msra.mxu0 %v2384_v8  ;;  %v2479_v7 = vld [vmem:[%s3542_s1 + $0x384] ss:$8 sps:$4 sm:$0xff]   ;;  %v2474_v8 = vld [vmem:[%s3542_s1 + $0x280] ss:$8 sps:$4 sm:$0xff]  }
  0x44   :  { %1750 = vmatpush1.bf16.msra.mxu1 %v2387_v9  ;;  %1710 = vmatprep.subr.bf16.mxu0 %v2392_v10  ;;  %v2477_v9 = vld [vmem:[%s3542_s1 + $0x380] ss:$8 sps:$4 sm:$0xff]   ;;  %v2486_v10 = vld [vmem:[%s3542_s1 + $0x474] ss:$8 sps:$4 sm:$0xff]  }
  0x45   :  { %1751 = vmatprep.subr.bf16.mxu1 %v2395_v11  ;;  %1740 = vmatprep.mubr.bf16.mxu0 %v2015_v36  ;;  %v2489_v11 = vld [vmem:[%s3542_s1 + $0x574] ss:$8 sps:$4 sm:$0xff]   ;;  %v2516_v36 = vld [vmem:[%s3542_s1 + $0x424] ss:$8 sps:$4 sm:$0xff]  }
  0x46   :  { %1781 = vmatprep.mubr.bf16.mxu1 %v2017_v37  ;;  %v2519_v37 = vld [vmem:[%s3542_s1 + $0x524] ss:$8 sps:$4 sm:$0xff]  }
  0x47   :  { %1711 = vmatpush1.bf16.msra.mxu0 %v2390_v12  ;;  %v2014_v12 = vcombine.low %v2987_v32, %v2987_v32  ;;  %v2510_v32 = vld [vmem:[%s3542_s1 + $0x434] ss:$8 sps:$4 sm:$0xff]  }
  0x48   :  { %1752 = vmatpush1.bf16.msra.mxu1 %v2393_v13  ;;  %1712 = vmatprep.subr.bf16.mxu0 %v2398_v14  ;;  %v2016_v13 = vcombine.low %v2992_v33, %v2992_v33  ;;  %v2484_v14 = vld [vmem:[%s3542_s1 + $0x470] ss:$8 sps:$4 sm:$0xff]   ;;  %v2513_v33 = vld [vmem:[%s3542_s1 + $0x534] ss:$8 sps:$4 sm:$0xff]  }
  0x49   :  { %1753 = vmatprep.subr.bf16.mxu1 %v2401_v15  ;;  %v2487_v15 = vld [vmem:[%s3542_s1 + $0x570] ss:$8 sps:$4 sm:$0xff]  }
  0x4b   :  { %1713 = vmatpush1.bf16.msra.mxu0 %v2396_v16  ;;  %v2492_v16 = vld [vmem:[%s3542_s1 + $0x464] ss:$8 sps:$4 sm:$0xff]  }
  0x4c   :  { %1754 = vmatpush1.bf16.msra.mxu1 %v2399_v17  ;;  %1714 = vmatprep.subr.bf16.mxu0 %v2404_v18  ;;  %v2495_v17 = vld [vmem:[%s3542_s1 + $0x564] ss:$8 sps:$4 sm:$0xff]  }
  0x4d   :  { %1755 = vmatprep.subr.bf16.mxu1 %v2407_v19  ;;  %v3137_v18 = vld [vmem:[%s3543_s0 + $0x20] sm:$0xff]  ;;  %v3142_v19 = vld [vmem:[%s3543_s0 + $0x28] sm:$0xff] }
  0x4f   :  { %1715 = vmatpush1.bf16.msra.mxu0 %v2402_v20  ;;  %v2019_v20 = vcombine.high %v3137_v18, %v3137_v18 }
  0x50   :  { %1756 = vmatpush1.bf16.msra.mxu1 %v2405_v21  ;;  %1716 = vmatprep.subr.bf16.mxu0 %v2410_v22  ;;  %v2021_v21 = vcombine.high %v3142_v19, %v3142_v19  ;;  %v2490_v22 = vld [vmem:[%s3542_s1 + $0x460] ss:$8 sps:$4 sm:$0xff]  }
  0x51   :  { %1757 = vmatprep.subr.bf16.mxu1 %v2413_v23  ;;  %v2493_v23 = vld [vmem:[%s3542_s1 + $0x560] ss:$8 sps:$4 sm:$0xff]  }
  0x53   :  { %1717 = vmatpush1.bf16.msra.mxu0 %v2408_v24  ;;  %v2498_v24 = vld [vmem:[%s3542_s1 + $0x454] ss:$8 sps:$4 sm:$0xff]  }
  0x54   :  { %1758 = vmatpush1.bf16.msra.mxu1 %v2411_v25  ;;  %1718 = vmatprep.subr.bf16.mxu0 %v2416_v26  ;;  %v2501_v25 = vld [vmem:[%s3542_s1 + $0x554] ss:$8 sps:$4 sm:$0xff]   ;;  %v2496_v26 = vld [vmem:[%s3542_s1 + $0x450] ss:$8 sps:$4 sm:$0xff]  }
  0x55   :  { %1759 = vmatprep.subr.bf16.mxu1 %v2419_v27  ;;  %v2499_v27 = vld [vmem:[%s3542_s1 + $0x550] ss:$8 sps:$4 sm:$0xff]  }
  0x57   :  { %1719 = vmatpush1.bf16.msra.mxu0 %v2414_v28  ;;  %v2504_v28 = vld [vmem:[%s3542_s1 + $0x444] ss:$8 sps:$4 sm:$0xff]  }
  0x58   :  { %1760 = vmatpush1.bf16.msra.mxu1 %v2417_v29  ;;  %1720 = vmatprep.subr.bf16.mxu0 %v2422_v30  ;;  %v2507_v29 = vld [vmem:[%s3542_s1 + $0x544] ss:$8 sps:$4 sm:$0xff]   ;;  %v2502_v30 = vld [vmem:[%s3542_s1 + $0x440] ss:$8 sps:$4 sm:$0xff]  }
  0x59   :  { %1761 = vmatprep.subr.bf16.mxu1 %v2425_v31  ;;  %v2505_v31 = vld [vmem:[%s3542_s1 + $0x540] ss:$8 sps:$4 sm:$0xff]  }
  0x5b   :  { %1721 = vmatpush1.bf16.msra.mxu0 %v2420_v34  ;;  %v2508_v34 = vld [vmem:[%s3542_s1 + $0x430] ss:$8 sps:$4 sm:$0xff]  }
  0x5c   :  { %1762 = vmatpush1.bf16.msra.mxu1 %v2423_v35  ;;  %1722 = vmatprep.subr.bf16.mxu0 %v2428_v38  ;;  %v2511_v35 = vld [vmem:[%s3542_s1 + $0x530] ss:$8 sps:$4 sm:$0xff]   ;;  %v2514_v38 = vld [vmem:[%s3542_s1 + $0x420] ss:$8 sps:$4 sm:$0xff]  }
  0x5d   :  { %1763 = vmatprep.subr.bf16.mxu1 %v2431_v39  ;;  %v2517_v39 = vld [vmem:[%s3542_s1 + $0x520] ss:$8 sps:$4 sm:$0xff]  }
  0x5f   :  { %1723 = vmatpush1.bf16.msra.mxu0 %v2426_v40  ;;  %v2522_v40 = vld [vmem:[%s3542_s1 + $0x414] ss:$8 sps:$4 sm:$0xff]  }
  0x60   :  { %1764 = vmatpush1.bf16.msra.mxu1 %v2429_v41  ;;  %1724 = vmatprep.subr.bf16.mxu0 %v2434_v42  ;;  %v2525_v41 = vld [vmem:[%s3542_s1 + $0x514] ss:$8 sps:$4 sm:$0xff]   ;;  %v2520_v42 = vld [vmem:[%s3542_s1 + $0x410] ss:$8 sps:$4 sm:$0xff]  }
  0x61   :  { %1765 = vmatprep.subr.bf16.mxu1 %v2437_v43  ;;  %v2523_v43 = vld [vmem:[%s3542_s1 + $0x510] ss:$8 sps:$4 sm:$0xff]  }
  0x63   :  { %1725 = vmatpush2.bf16.msra.mxu0 %v2432_v44  ;;  %v2528_v44 = vld [vmem:[%s3542_s1 + $0x404] ss:$8 sps:$4 sm:$0xff]  }
  0x64   :  { %1766 = vmatpush2.bf16.msra.mxu1 %v2435_v45  ;;  %1726 = vmatprep.subr.bf16.mxu0 %v2440_v46  ;;  %v2531_v45 = vld [vmem:[%s3542_s1 + $0x504] ss:$8 sps:$4 sm:$0xff]   ;;  %v2526_v46 = vld [vmem:[%s3542_s1 + $0x400] ss:$8 sps:$4 sm:$0xff]  }
  0x65   :  { %1767 = vmatprep.subr.bf16.mxu1 %v2443_v47  ;;  %v2529_v47 = vld [vmem:[%s3542_s1 + $0x500] ss:$8 sps:$4 sm:$0xff]  }
  0x67   :  { %1727 = vmatpush2.bf16.msra.mxu0 %v2438_v48  ;;  %v2534_v48 = vld [vmem:[%s3542_s1 + $0x4f4] ss:$8 sps:$4 sm:$0xff]  }
  0x68   :  { %1768 = vmatpush2.bf16.msra.mxu1 %v2441_v49  ;;  %1728 = vmatprep.subr.bf16.mxu0 %v2446_v50  ;;  %v2537_v49 = vld [vmem:[%s3542_s1 + $0x5f4] ss:$8 sps:$4 sm:$0xff]   ;;  %v2532_v50 = vld [vmem:[%s3542_s1 + $0x4f0] ss:$8 sps:$4 sm:$0xff]  }
  0x69   :  { %1769 = vmatprep.subr.bf16.mxu1 %v2449_v51  ;;  %v2535_v51 = vld [vmem:[%s3542_s1 + $0x5f0] ss:$8 sps:$4 sm:$0xff]  }
  0x6b   :  { %1729 = vmatpush2.bf16.msra.mxu0 %v2444_v52  ;;  %v2540_v52 = vld [vmem:[%s3542_s1 + $0x4e4] ss:$8 sps:$4 sm:$0xff]  }
  0x6c   :  { %1770 = vmatpush2.bf16.msra.mxu1 %v2447_v53  ;;  %1730 = vmatprep.subr.bf16.mxu0 %v2452_v54  ;;  %v2543_v53 = vld [vmem:[%s3542_s1 + $0x5e4] ss:$8 sps:$4 sm:$0xff]   ;;  %v2538_v54 = vld [vmem:[%s3542_s1 + $0x4e0] ss:$8 sps:$4 sm:$0xff]  }
  0x6d   :  { %1771 = vmatprep.subr.bf16.mxu1 %v2455_v55  ;;  %v2541_v55 = vld [vmem:[%s3542_s1 + $0x5e0] ss:$8 sps:$4 sm:$0xff]  }
  0x6f   :  { %1731 = vmatpush2.bf16.msra.mxu0 %v2450_v56  ;;  %v2546_v56 = vld [vmem:[%s3542_s1 + $0x4d4] ss:$8 sps:$4 sm:$0xff]  }
  0x70   :  { %1772 = vmatpush2.bf16.msra.mxu1 %v2453_v57  ;;  %1732 = vmatprep.subr.bf16.mxu0 %v2458_v58  ;;  %v2549_v57 = vld [vmem:[%s3542_s1 + $0x5d4] ss:$8 sps:$4 sm:$0xff]   ;;  %v2544_v58 = vld [vmem:[%s3542_s1 + $0x4d0] ss:$8 sps:$4 sm:$0xff]  }
  0x71   :  { %1773 = vmatprep.subr.bf16.mxu1 %v2461_v59  ;;  %v2547_v59 = vld [vmem:[%s3542_s1 + $0x5d0] ss:$8 sps:$4 sm:$0xff]  }
  0x73   :  { %1733 = vmatpush2.bf16.msra.mxu0 %v2456_v60  ;;  %v2552_v60 = vld [vmem:[%s3542_s1 + $0x4c4] ss:$8 sps:$4 sm:$0xff]  }
  0x74   :  { %1774 = vmatpush2.bf16.msra.mxu1 %v2459_v61  ;;  %1734 = vmatprep.subr.bf16.mxu0 %v2464_v62  ;;  %v2555_v61 = vld [vmem:[%s3542_s1 + $0x5c4] ss:$8 sps:$4 sm:$0xff]   ;;  %v2550_v62 = vld [vmem:[%s3542_s1 + $0x4c0] ss:$8 sps:$4 sm:$0xff]  }
  0x75   :  { %1775 = vmatprep.subr.bf16.mxu1 %v2467_v63  ;;  %v2553_v63 = vld [vmem:[%s3542_s1 + $0x5c0] ss:$8 sps:$4 sm:$0xff]  }
  0x77   :  { %1735 = vmatpush2.bf16.msra.mxu0 %v2462_v0  ;;  %v2558_v0 = vld [vmem:[%s3542_s1 + $0x4b4] ss:$8 sps:$4 sm:$0xff]  }
  0x78   :  { %1776 = vmatpush2.bf16.msra.mxu1 %v2465_v1  ;;  %1736 = vmatprep.subr.bf16.mxu0 %v2470_v2  ;;  %v2561_v1 = vld [vmem:[%s3542_s1 + $0x5b4] ss:$8 sps:$4 sm:$0xff]   ;;  %v2556_v2 = vld [vmem:[%s3542_s1 + $0x4b0] ss:$8 sps:$4 sm:$0xff]  }
  0x79   :  { %1777 = vmatprep.subr.bf16.mxu1 %v2473_v3  ;;  %v2559_v3 = vld [vmem:[%s3542_s1 + $0x5b0] ss:$8 sps:$4 sm:$0xff]  }
  0x7b   :  { %1737 = vmatpush2.bf16.msra.mxu0 %v2468_v4  ;;  %v2564_v4 = vld [vmem:[%s3542_s1 + $0x4a4] ss:$8 sps:$4 sm:$0xff]  }
  0x7c   :  { %1778 = vmatpush2.bf16.msra.mxu1 %v2471_v5  ;;  %1738 = vmatprep.subr.bf16.mxu0 %v2476_v6  ;;  %v2567_v5 = vld [vmem:[%s3542_s1 + $0x5a4] ss:$8 sps:$4 sm:$0xff]   ;;  %v2562_v6 = vld [vmem:[%s3542_s1 + $0x4a0] ss:$8 sps:$4 sm:$0xff]  }
  0x7d   :  { %1779 = vmatprep.subr.bf16.mxu1 %v2479_v7  ;;  %v2565_v7 = vld [vmem:[%s3542_s1 + $0x5a0] ss:$8 sps:$4 sm:$0xff]  }
  0x7f   :  { %1739 = vmatpush2.bf16.msra.mxu0 %v2474_v8  ;;  %v2570_v8 = vld [vmem:[%s3542_s1 + $0x494] ss:$8 sps:$4 sm:$0xff]  }
  0x80   :  { %1780 = vmatpush2.bf16.msra.mxu1 %v2477_v9  ;;  %1790 = vmatprep.subr.bf16.mxu0 %v2486_v10  ;;  %v2573_v9 = vld [vmem:[%s3542_s1 + $0x594] ss:$8 sps:$4 sm:$0xff]   ;;  %v2568_v10 = vld [vmem:[%s3542_s1 + $0x490] ss:$8 sps:$4 sm:$0xff]  }
  0x81   :  { %1831 = vmatprep.subr.bf16.mxu1 %v2489_v11  ;;  %v2571_v11 = vld [vmem:[%s3542_s1 + $0x590] ss:$8 sps:$4 sm:$0xff]  }
  0x82   :  { %1741 = vmatmul.mubr.bf16.vlgmr.msra.gmra.mxu0 %v2014_v12  ;;  %v2576_v12 = vld [vmem:[%s3542_s1 + $0x484] ss:$8 sps:$4 sm:$0xff]  }
  0x83   :  { %1782 = vmatmul.mubr.bf16.vlgmr.msra.gmra.mxu1 %v2016_v13  ;;  %1791 = vmatpush1.bf16.msra.mxu0 %v2484_v14  ;;  %v2579_v13 = vld [vmem:[%s3542_s1 + $0x584] ss:$8 sps:$4 sm:$0xff]   ;;  %v2574_v14 = vld [vmem:[%s3542_s1 + $0x480] ss:$8 sps:$4 sm:$0xff]  }
  0x84   :  { %1832 = vmatpush1.bf16.msra.mxu1 %v2487_v15  ;;  %1792 = vmatprep.subr.bf16.mxu0 %v2492_v16  ;;  %v2577_v15 = vld [vmem:[%s3542_s1 + $0x580] ss:$8 sps:$4 sm:$0xff]   ;;  %v2586_v16 = vld [vmem:[%s3542_s1 + $0x674] ss:$8 sps:$4 sm:$0xff]  }
  0x85   :  { %1833 = vmatprep.subr.bf16.mxu1 %v2495_v17  ;;  %1822 = vmatprep.mubr.bf16.mxu0 %v2019_v20  ;;  %v2589_v17 = vld [vmem:[%s3542_s1 + $0x774] ss:$8 sps:$4 sm:$0xff]   ;;  %v2018_v20 = vcombine.low %v3137_v18, %v3137_v18  ;;  %v2587_v18 = vld [vmem:[%s3542_s1 + $0x770] ss:$8 sps:$4 sm:$0xff]  }
  0x86   :  { %1863 = vmatprep.mubr.bf16.mxu1 %v2021_v21  ;;  %v2020_v21 = vcombine.low %v3142_v19, %v3142_v19  ;;  %v2592_v19 = vld [vmem:[%s3542_s1 + $0x664] ss:$8 sps:$4 sm:$0xff]  }
  0x87   :  { %1793 = vmatpush1.bf16.msra.mxu0 %v2490_v22  ;;  %v3335_v22 = vld [vmem:[%s3543_s0 + $0x30] sm:$0xff] }
  0x88   :  { %1834 = vmatpush1.bf16.msra.mxu1 %v2493_v23  ;;  %1794 = vmatprep.subr.bf16.mxu0 %v2498_v24  ;;  %v3340_v23 = vld [vmem:[%s3543_s0 + $0x38] sm:$0xff] }
  0x89   :  { %1835 = vmatprep.subr.bf16.mxu1 %v2501_v25  ;;  %v2584_v24 = vld [vmem:[%s3542_s1 + $0x670] ss:$8 sps:$4 sm:$0xff]   ;;  %v2595_v25 = vld [vmem:[%s3542_s1 + $0x764] ss:$8 sps:$4 sm:$0xff]  }
  0x8b   :  { %1795 = vmatpush1.bf16.msra.mxu0 %v2496_v26  ;;  %v2023_v26 = vcombine.high %v3335_v22, %v3335_v22 }
  0x8c   :  { %1836 = vmatpush1.bf16.msra.mxu1 %v2499_v27  ;;  %1796 = vmatprep.subr.bf16.mxu0 %v2504_v28  ;;  %v2025_v27 = vcombine.high %v3340_v23, %v3340_v23  ;;  %v2590_v28 = vld [vmem:[%s3542_s1 + $0x660] ss:$8 sps:$4 sm:$0xff]  }
  0x8d   :  { %1837 = vmatprep.subr.bf16.mxu1 %v2507_v29  ;;  %v2593_v29 = vld [vmem:[%s3542_s1 + $0x760] ss:$8 sps:$4 sm:$0xff]  }
  0x8f   :  { %1797 = vmatpush1.bf16.msra.mxu0 %v2502_v30  ;;  %v2598_v30 = vld [vmem:[%s3542_s1 + $0x654] ss:$8 sps:$4 sm:$0xff]  }
  0x90   :  { %1838 = vmatpush1.bf16.msra.mxu1 %v2505_v31  ;;  %1798 = vmatprep.subr.bf16.mxu0 %v2510_v32  ;;  %v2601_v31 = vld [vmem:[%s3542_s1 + $0x754] ss:$8 sps:$4 sm:$0xff]   ;;  %v2596_v32 = vld [vmem:[%s3542_s1 + $0x650] ss:$8 sps:$4 sm:$0xff]  }
  0x91   :  { %1839 = vmatprep.subr.bf16.mxu1 %v2513_v33  ;;  %v2599_v33 = vld [vmem:[%s3542_s1 + $0x750] ss:$8 sps:$4 sm:$0xff]  }
  0x93   :  { %1799 = vmatpush1.bf16.msra.mxu0 %v2508_v34  ;;  %v2604_v34 = vld [vmem:[%s3542_s1 + $0x644] ss:$8 sps:$4 sm:$0xff]  }
  0x94   :  { %1840 = vmatpush1.bf16.msra.mxu1 %v2511_v35  ;;  %1800 = vmatprep.subr.bf16.mxu0 %v2516_v36  ;;  %v2607_v35 = vld [vmem:[%s3542_s1 + $0x744] ss:$8 sps:$4 sm:$0xff]   ;;  %v2602_v36 = vld [vmem:[%s3542_s1 + $0x640] ss:$8 sps:$4 sm:$0xff]  }
  0x95   :  { %1841 = vmatprep.subr.bf16.mxu1 %v2519_v37  ;;  %v2605_v37 = vld [vmem:[%s3542_s1 + $0x740] ss:$8 sps:$4 sm:$0xff]  }
  0x97   :  { %1801 = vmatpush1.bf16.msra.mxu0 %v2514_v38  ;;  %v2610_v38 = vld [vmem:[%s3542_s1 + $0x634] ss:$8 sps:$4 sm:$0xff]  }
  0x98   :  { %1842 = vmatpush1.bf16.msra.mxu1 %v2517_v39  ;;  %1802 = vmatprep.subr.bf16.mxu0 %v2522_v40  ;;  %v2613_v39 = vld [vmem:[%s3542_s1 + $0x734] ss:$8 sps:$4 sm:$0xff]   ;;  %v2608_v40 = vld [vmem:[%s3542_s1 + $0x630] ss:$8 sps:$4 sm:$0xff]  }
  0x99   :  { %1843 = vmatprep.subr.bf16.mxu1 %v2525_v41  ;;  %v2611_v41 = vld [vmem:[%s3542_s1 + $0x730] ss:$8 sps:$4 sm:$0xff]  }
  0x9b   :  { %1803 = vmatpush1.bf16.msra.mxu0 %v2520_v42  ;;  %v2616_v42 = vld [vmem:[%s3542_s1 + $0x624] ss:$8 sps:$4 sm:$0xff]  }
  0x9c   :  { %1844 = vmatpush1.bf16.msra.mxu1 %v2523_v43  ;;  %1804 = vmatprep.subr.bf16.mxu0 %v2528_v44  ;;  %v2619_v43 = vld [vmem:[%s3542_s1 + $0x724] ss:$8 sps:$4 sm:$0xff]   ;;  %v2614_v44 = vld [vmem:[%s3542_s1 + $0x620] ss:$8 sps:$4 sm:$0xff]  }
  0x9d   :  { %1845 = vmatprep.subr.bf16.mxu1 %v2531_v45  ;;  %v2617_v45 = vld [vmem:[%s3542_s1 + $0x720] ss:$8 sps:$4 sm:$0xff]  }
  0x9f   :  { %1805 = vmatpush1.bf16.msra.mxu0 %v2526_v46  ;;  %v2622_v46 = vld [vmem:[%s3542_s1 + $0x614] ss:$8 sps:$4 sm:$0xff]  }
  0xa0   :  { %1846 = vmatpush1.bf16.msra.mxu1 %v2529_v47  ;;  %1806 = vmatprep.subr.bf16.mxu0 %v2534_v48  ;;  %v2625_v47 = vld [vmem:[%s3542_s1 + $0x714] ss:$8 sps:$4 sm:$0xff]   ;;  %v2620_v48 = vld [vmem:[%s3542_s1 + $0x610] ss:$8 sps:$4 sm:$0xff]  }
  0xa1   :  { %1847 = vmatprep.subr.bf16.mxu1 %v2537_v49  ;;  %v2623_v49 = vld [vmem:[%s3542_s1 + $0x710] ss:$8 sps:$4 sm:$0xff]  }
  0xa3   :  { %1807 = vmatpush2.bf16.msra.mxu0 %v2532_v50  ;;  %v2628_v50 = vld [vmem:[%s3542_s1 + $0x604] ss:$8 sps:$4 sm:$0xff]  }
  0xa4   :  { %1848 = vmatpush2.bf16.msra.mxu1 %v2535_v51  ;;  %1808 = vmatprep.subr.bf16.mxu0 %v2540_v52  ;;  %v2631_v51 = vld [vmem:[%s3542_s1 + $0x704] ss:$8 sps:$4 sm:$0xff]   ;;  %v2626_v52 = vld [vmem:[%s3542_s1 + $0x600] ss:$8 sps:$4 sm:$0xff]  }
  0xa5   :  { %1849 = vmatprep.subr.bf16.mxu1 %v2543_v53  ;;  %v2629_v53 = vld [vmem:[%s3542_s1 + $0x700] ss:$8 sps:$4 sm:$0xff]  }
  0xa7   :  { %1809 = vmatpush2.bf16.msra.mxu0 %v2538_v54  ;;  %v2634_v54 = vld [vmem:[%s3542_s1 + $0x6f4] ss:$8 sps:$4 sm:$0xff]  }
  0xa8   :  { %1850 = vmatpush2.bf16.msra.mxu1 %v2541_v55  ;;  %1810 = vmatprep.subr.bf16.mxu0 %v2546_v56  ;;  %v2637_v55 = vld [vmem:[%s3542_s1 + $0x7f4] ss:$8 sps:$4 sm:$0xff]   ;;  %v2632_v56 = vld [vmem:[%s3542_s1 + $0x6f0] ss:$8 sps:$4 sm:$0xff]  }
  0xa9   :  { %1851 = vmatprep.subr.bf16.mxu1 %v2549_v57  ;;  %v2635_v57 = vld [vmem:[%s3542_s1 + $0x7f0] ss:$8 sps:$4 sm:$0xff]  }
  0xab   :  { %1811 = vmatpush2.bf16.msra.mxu0 %v2544_v58  ;;  %v2640_v58 = vld [vmem:[%s3542_s1 + $0x6e4] ss:$8 sps:$4 sm:$0xff]  }
  0xac   :  { %1852 = vmatpush2.bf16.msra.mxu1 %v2547_v59  ;;  %1812 = vmatprep.subr.bf16.mxu0 %v2552_v60  ;;  %v2643_v59 = vld [vmem:[%s3542_s1 + $0x7e4] ss:$8 sps:$4 sm:$0xff]   ;;  %v2638_v60 = vld [vmem:[%s3542_s1 + $0x6e0] ss:$8 sps:$4 sm:$0xff]  }
  0xad   :  { %1853 = vmatprep.subr.bf16.mxu1 %v2555_v61  ;;  %v2641_v61 = vld [vmem:[%s3542_s1 + $0x7e0] ss:$8 sps:$4 sm:$0xff]  }
  0xaf   :  { %1813 = vmatpush2.bf16.msra.mxu0 %v2550_v62  ;;  %v2646_v62 = vld [vmem:[%s3542_s1 + $0x6d4] ss:$8 sps:$4 sm:$0xff]  }
  0xb0   :  { %1854 = vmatpush2.bf16.msra.mxu1 %v2553_v63  ;;  %1814 = vmatprep.subr.bf16.mxu0 %v2558_v0  ;;  %v2649_v63 = vld [vmem:[%s3542_s1 + $0x7d4] ss:$8 sps:$4 sm:$0xff]   ;;  %v2644_v0 = vld [vmem:[%s3542_s1 + $0x6d0] ss:$8 sps:$4 sm:$0xff]  }
  0xb1   :  { %1855 = vmatprep.subr.bf16.mxu1 %v2561_v1  ;;  %v2647_v1 = vld [vmem:[%s3542_s1 + $0x7d0] ss:$8 sps:$4 sm:$0xff]  }
  0xb3   :  { %1815 = vmatpush2.bf16.msra.mxu0 %v2556_v2  ;;  %v2652_v2 = vld [vmem:[%s3542_s1 + $0x6c4] ss:$8 sps:$4 sm:$0xff]  }
  0xb4   :  { %1856 = vmatpush2.bf16.msra.mxu1 %v2559_v3  ;;  %1816 = vmatprep.subr.bf16.mxu0 %v2564_v4  ;;  %v2655_v3 = vld [vmem:[%s3542_s1 + $0x7c4] ss:$8 sps:$4 sm:$0xff]   ;;  %v2650_v4 = vld [vmem:[%s3542_s1 + $0x6c0] ss:$8 sps:$4 sm:$0xff]  }
  0xb5   :  { %1857 = vmatprep.subr.bf16.mxu1 %v2567_v5  ;;  %v2653_v5 = vld [vmem:[%s3542_s1 + $0x7c0] ss:$8 sps:$4 sm:$0xff]  }
  0xb7   :  { %1817 = vmatpush2.bf16.msra.mxu0 %v2562_v6  ;;  %v2658_v6 = vld [vmem:[%s3542_s1 + $0x6b4] ss:$8 sps:$4 sm:$0xff]  }
  0xb8   :  { %1858 = vmatpush2.bf16.msra.mxu1 %v2565_v7  ;;  %1818 = vmatprep.subr.bf16.mxu0 %v2570_v8  ;;  %v2661_v7 = vld [vmem:[%s3542_s1 + $0x7b4] ss:$8 sps:$4 sm:$0xff]   ;;  %v2656_v8 = vld [vmem:[%s3542_s1 + $0x6b0] ss:$8 sps:$4 sm:$0xff]  }
  0xb9   :  { %1859 = vmatprep.subr.bf16.mxu1 %v2573_v9  ;;  %v2659_v9 = vld [vmem:[%s3542_s1 + $0x7b0] ss:$8 sps:$4 sm:$0xff]  }
  0xbb   :  { %1819 = vmatpush2.bf16.msra.mxu0 %v2568_v10  ;;  %v2664_v10 = vld [vmem:[%s3542_s1 + $0x6a4] ss:$8 sps:$4 sm:$0xff]  }
  0xbc   :  { %1860 = vmatpush2.bf16.msra.mxu1 %v2571_v11  ;;  %1820 = vmatprep.subr.bf16.mxu0 %v2576_v12  ;;  %v2667_v11 = vld [vmem:[%s3542_s1 + $0x7a4] ss:$8 sps:$4 sm:$0xff]   ;;  %v2662_v12 = vld [vmem:[%s3542_s1 + $0x6a0] ss:$8 sps:$4 sm:$0xff]  }
  0xbd   :  { %1861 = vmatprep.subr.bf16.mxu1 %v2579_v13  ;;  %v2665_v13 = vld [vmem:[%s3542_s1 + $0x7a0] ss:$8 sps:$4 sm:$0xff]  }
  0xbf   :  { %1821 = vmatpush2.bf16.msra.mxu0 %v2574_v14  ;;  %v280_v14 = vlaneseq }
  0xc0   :  { %1862 = vmatpush2.bf16.msra.mxu1 %v2577_v15  ;;  %1872 = vmatprep.subr.bf16.mxu0 %v2586_v16  ;;  %v2670_v15 = vld [vmem:[%s3542_s1 + $0x694] ss:$8 sps:$4 sm:$0xff]  }
  0xc1   :  { %1913 = vmatprep.subr.bf16.mxu1 %v2589_v17  ;;  %v2673_v16 = vld [vmem:[%s3542_s1 + $0x794] ss:$8 sps:$4 sm:$0xff]   ;;  %v2668_v17 = vld [vmem:[%s3542_s1 + $0x690] ss:$8 sps:$4 sm:$0xff]  }
  0xc2   :  { %1823 = vmatmul.mubr.bf16.vlgmr.msra.gmra.mxu0 %v2018_v20  ;;  %v2671_v20 = vld [vmem:[%s3542_s1 + $0x790] ss:$8 sps:$4 sm:$0xff]  }
  0xc3   :  { %1864 = vmatmul.mubr.bf16.vlgmr.msra.gmra.mxu1 %v2020_v21  ;;  %1873 = vmatpush1.bf16.msra.mxu0 %v2584_v24  ;;  %v281_v21 = vshrl.u32 %v280_v14, 7  ;;  %v2676_v24 = vld [vmem:[%s3542_s1 + $0x684] ss:$8 sps:$4 sm:$0xff]  }
  0xc4   :  { %1914 = vmatpush1.bf16.msra.mxu1 %v2587_v18  ;;  %1874 = vmatprep.subr.bf16.mxu0 %v2592_v19  ;;  %v2679_v18 = vld [vmem:[%s3542_s1 + $0x784] ss:$8 sps:$4 sm:$0xff]   ;;  %v2674_v19 = vld [vmem:[%s3542_s1 + $0x680] ss:$8 sps:$4 sm:$0xff]  }
  0xc5   :  { %1915 = vmatprep.subr.bf16.mxu1 %v2595_v25  ;;  %1904 = vmatprep.mubr.bf16.mxu0 %v2023_v26  ;;  %v2677_v25 = vld [vmem:[%s3542_s1 + $0x780] ss:$8 sps:$4 sm:$0xff]   ;;  %v282_v26 = vsub.s32 0, %v281_v21 }
  0xc6   :  { %1945 = vmatprep.mubr.bf16.mxu1 %v2025_v27  ;;  %v278_v27 = vld [vmem:[%s3544_s2] sm:$0x3] }
  0xc7   :  { %1875 = vmatpush1.bf16.msra.mxu0 %v2590_v28  ;;  %v286_v28 = vsub.s32 1, %v281_v21 }
  0xc8   :  { %1916 = vmatpush1.bf16.msra.mxu1 %v2593_v29  ;;  %1876 = vmatprep.subr.bf16.mxu0 %v2598_v30  ;;  %v2022_v29 = vcombine.low %v3335_v22, %v3335_v22  ;;  %v2024_v30 = vcombine.low %v3340_v23, %v3340_v23 }
  0xc9   :  { %1917 = vmatprep.subr.bf16.mxu1 %v2601_v31  ;;  %v283_v31 = vrot.slane %v278_v27, %v282_v26 }
  0xcb   :  { %1877 = vmatpush1.bf16.msra.mxu0 %v2596_v32  ;;  %v287_v32 = vrot.slane %v278_v27, %v286_v28 }
  0xcc   :  { %1918 = vmatpush1.bf16.msra.mxu1 %v2599_v33  ;;  %1878 = vmatprep.subr.bf16.mxu0 %v2604_v34 }
  0xcd   :  { %1919 = vmatprep.subr.bf16.mxu1 %v2607_v35 }
  0xcf   :  { %1879 = vmatpush1.bf16.msra.mxu0 %v2602_v36 }
  0xd0   :  { %1920 = vmatpush1.bf16.msra.mxu1 %v2605_v37  ;;  %1880 = vmatprep.subr.bf16.mxu0 %v2610_v38 }
  0xd1   :  { %1921 = vmatprep.subr.bf16.mxu1 %v2613_v39 }
  0xd3   :  { %1881 = vmatpush1.bf16.msra.mxu0 %v2608_v40 }
  0xd4   :  { %1922 = vmatpush1.bf16.msra.mxu1 %v2611_v41  ;;  %1882 = vmatprep.subr.bf16.mxu0 %v2616_v42 }
  0xd5   :  { %1923 = vmatprep.subr.bf16.mxu1 %v2619_v43 }
  0xd7   :  { %1883 = vmatpush1.bf16.msra.mxu0 %v2614_v44 }
  0xd8   :  { %1924 = vmatpush1.bf16.msra.mxu1 %v2617_v45  ;;  %1884 = vmatprep.subr.bf16.mxu0 %v2622_v46 }
  0xd9   :  { %1925 = vmatprep.subr.bf16.mxu1 %v2625_v47 }
  0xdb   :  { %1885 = vmatpush1.bf16.msra.mxu0 %v2620_v48 }
  0xdc   :  { %1926 = vmatpush1.bf16.msra.mxu1 %v2623_v49  ;;  %1886 = vmatprep.subr.bf16.mxu0 %v2628_v50 }
  0xdd   :  { %1927 = vmatprep.subr.bf16.mxu1 %v2631_v51 }
  0xdf   :  { %1887 = vmatpush1.bf16.msra.mxu0 %v2626_v52 }
  0xe0   :  { %1928 = vmatpush1.bf16.msra.mxu1 %v2629_v53  ;;  %1888 = vmatprep.subr.bf16.mxu0 %v2634_v54 }
  0xe1   :  { %1929 = vmatprep.subr.bf16.mxu1 %v2637_v55 }
  0xe3   :  { %1889 = vmatpush2.bf16.msra.mxu0 %v2632_v56 }
  0xe4   :  { %1930 = vmatpush2.bf16.msra.mxu1 %v2635_v57  ;;  %1890 = vmatprep.subr.bf16.mxu0 %v2640_v58 }
  0xe5   :  { %1931 = vmatprep.subr.bf16.mxu1 %v2643_v59 }
  0xe7   :  { %1891 = vmatpush2.bf16.msra.mxu0 %v2638_v60 }
  0xe8   :  { %1932 = vmatpush2.bf16.msra.mxu1 %v2641_v61  ;;  %1892 = vmatprep.subr.bf16.mxu0 %v2646_v62 }
  0xe9   :  { %1933 = vmatprep.subr.bf16.mxu1 %v2649_v63 }
  0xeb   :  { %1893 = vmatpush2.bf16.msra.mxu0 %v2644_v0 }
  0xec   :  { %1934 = vmatpush2.bf16.msra.mxu1 %v2647_v1  ;;  %1894 = vmatprep.subr.bf16.mxu0 %v2652_v2 }
  0xed   :  { %1935 = vmatprep.subr.bf16.mxu1 %v2655_v3 }
  0xef   :  { %1895 = vmatpush2.bf16.msra.mxu0 %v2650_v4 }
  0xf0   :  { %1936 = vmatpush2.bf16.msra.mxu1 %v2653_v5  ;;  %1896 = vmatprep.subr.bf16.mxu0 %v2658_v6 }
  0xf1   :  { %1937 = vmatprep.subr.bf16.mxu1 %v2661_v7 }
  0xf3   :  { %1897 = vmatpush2.bf16.msra.mxu0 %v2656_v8 }
  0xf4   :  { %1938 = vmatpush2.bf16.msra.mxu1 %v2659_v9  ;;  %1898 = vmatprep.subr.bf16.mxu0 %v2664_v10 }
  0xf5   :  { %1939 = vmatprep.subr.bf16.mxu1 %v2667_v11 }
  0xf7   :  { %1899 = vmatpush2.bf16.msra.mxu0 %v2662_v12 }
  0xf8   :  { %1940 = vmatpush2.bf16.msra.mxu1 %v2665_v13  ;;  %1900 = vmatprep.subr.bf16.mxu0 %v2670_v15 }
  0xf9   :  { %1941 = vmatprep.subr.bf16.mxu1 %v2673_v16 }
  0xfb   :  { %1901 = vmatpush2.bf16.msra.mxu0 %v2668_v17 }
  0xfc   :  { %1942 = vmatpush2.bf16.msra.mxu1 %v2671_v20  ;;  %1902 = vmatprep.subr.bf16.mxu0 %v2676_v24 }
  0xfd   :  { %1943 = vmatprep.subr.bf16.mxu1 %v2679_v18 }
  0xff   :  { %1903 = vmatpush2.bf16.msra.mxu0 %v2674_v19 }
 0x100   :  { %1944 = vmatpush2.bf16.msra.mxu1 %v2677_v25 }
 0x102   :  { %v1660_v33 = vpop.f32.mrf.mxu0  ;;  %1905 = vmatmul.mubr.bf16.vlgmr.msra.gmra.mxu0 %v2022_v29 }
 0x103   :  { %v1701_v34 = vpop.f32.mrf.mxu1  ;;  %1946 = vmatmul.mubr.bf16.vlgmr.msra.gmra.mxu1 %v2024_v30  ;;  %v1661_v35 = vadd.f32 %v1660_v33, %v283_v31 }
 0x104   :  { %v1662_v36 = vpop.f32.mrf.mxu0 }
 0x105   :  { %v1703_v37 = vpop.f32.mrf.mxu1  ;;  %v1702_v38 = vadd.f32 %v1701_v34, %v1661_v35  ;;  %v1663_v39 = vadd.f32 %v1662_v36, %v287_v32 }
 0x106   :  { %v1664_v40 = vpop.f32.mrf.mxu0 }
 0x107   :  { %v1705_v41 = vpop.f32.mrf.mxu1  ;;  %v1704_v42 = vadd.f32 %v1703_v37, %v1663_v39 }
 0x108   :  { %v1665_v22 = vpop.f32.mrf.mxu0 }
 0x109   :  { %v1706_v43 = vpop.f32.mrf.mxu1 }
 0x142   :  { %v1742_v44 = vpop.f32.mrf.mxu0 }
 0x143   :  { %v1783_v23 = vpop.f32.mrf.mxu1  ;;  %v1743_v45 = vadd.f32 %v1742_v44, %v1702_v38 }
 0x144   :  { %v1744_v46 = vpop.f32.mrf.mxu0 }
 0x145   :  { %v1785_v47 = vpop.f32.mrf.mxu1  ;;  %v1784_v48 = vadd.f32 %v1783_v23, %v1743_v45  ;;  %v1745_v49 = vadd.f32 %v1744_v46, %v1704_v42 }
 0x146   :  { %v1746_v50 = vpop.f32.mrf.mxu0 }
 0x147   :  { %v1787_v51 = vpop.f32.mrf.mxu1  ;;  %v1786_v52 = vadd.f32 %v1785_v47, %v1745_v49 }
 0x148   :  { %v1747_v53 = vpop.f32.mrf.mxu0 }
 0x149   :  { %v1788_v54 = vpop.f32.mrf.mxu1 }
 0x182   :  { %v1824_v55 = vpop.f32.mrf.mxu0 }
 0x183   :  { %v1865_v56 = vpop.f32.mrf.mxu1  ;;  %v1825_v57 = vadd.f32 %v1824_v55, %v1784_v48 }
 0x184   :  { %v1826_v58 = vpop.f32.mrf.mxu0 }
 0x185   :  { %v1867_v59 = vpop.f32.mrf.mxu1  ;;  %v1866_v60 = vadd.f32 %v1865_v56, %v1825_v57  ;;  %v1827_v1 = vadd.f32 %v1826_v58, %v1786_v52 }
 0x186   :  { %v1828_v61 = vpop.f32.mrf.mxu0 }
 0x187   :  { %v1869_v62 = vpop.f32.mrf.mxu1  ;;  %v1868_v4 = vadd.f32 %v1867_v59, %v1827_v1 }
 0x188   :  { %v1829_v63 = vpop.f32.mrf.mxu0 }
 0x189   :  { %v1870_v0 = vpop.f32.mrf.mxu1 }
 0x1c2   :  { %v1906_v2 = vpop.f32.mrf.mxu0 }
 0x1c3   :  { %v1947_v3 = vpop.f32.mrf.mxu1  ;;  %v1907_v5 = vadd.f32 %v1906_v2, %v1866_v60 }
 0x1c4   :  { %v1908_v6 = vpop.f32.mrf.mxu0 }
 0x1c5   :  { %v1949_v7 = vpop.f32.mrf.mxu1  ;;  %v1948_v8 = vadd.f32 %v1947_v3, %v1907_v5  ;;  %v1909_v9 = vadd.f32 %v1908_v6, %v1868_v4 }
 0x1c6   :  { %v1910_v10 = vpop.f32.mrf.mxu0 }
 0x1c7   :  { %v1951_v11 = vpop.f32.mrf.mxu1  ;;  %v1954_v12 = vrot.slane %v1948_v8, 4  ;;  %v1950_v13 = vadd.f32 %v1949_v7, %v1909_v9 }
 0x1c8   :  { %v1911_v14 = vpop.f32.mrf.mxu0 }
 0x1c9   :  { %v1952_v15 = vpop.f32.mrf.mxu1  ;;  %v1955_v16 = vadd.f32 %v1954_v12, %v1948_v8  ;;  %v1960_v17 = vrot.slane %v1950_v13, 4 }
 0x1cb   :  { %v1956_v20 = vrot.slane %v1955_v16, 2  ;;  %v1961_v21 = vadd.f32 %v1960_v17, %v1950_v13 }
 0x1cd   :  { %v1957_v24 = vadd.f32 %v1956_v20, %v1955_v16  ;;  %v1962_v18 = vrot.slane %v1961_v21, 2 }
 0x1cf   :  { %v1958_v19 = vrot.slane %v1957_v24, 1  ;;  %v1963_v25 = vadd.f32 %v1962_v18, %v1961_v21 }
 0x1d1   :  { %v1959_v26 = vadd.f32 %v1958_v19, %v1957_v24  ;;  %v1964_v27 = vrot.slane %v1963_v25, 1 }
 0x1d3   :  { %v1967_v28 = vmul.f32 0.125, %v1959_v26  ;;  %v1965_v29 = vadd.f32 %v1964_v27, %v1963_v25 }
 0x1d5   :  { %v1969_v30 = vsub.f32 %v1948_v8, %v1967_v28  ;;  %v1968_v31 = vmul.f32 0.125, %v1965_v29 }
 0x1d7   :  { %v1971_v32 = vmul.f32 %v1969_v30, %v1969_v30  ;;  %v1970_v33 = vsub.f32 %v1950_v13, %v1968_v31 }
 0x1d9   :  { %v1973_v34 = vrot.slane %v1971_v32, 4  ;;  %v1972_v35 = vmul.f32 %v1970_v33, %v1970_v33 }
 0x1db   :  { %v1974_v36 = vadd.f32 %v1973_v34, %v1971_v32  ;;  %v1979_v37 = vrot.slane %v1972_v35, 4 }
 0x1dd   :  { %v1975_v38 = vrot.slane %v1974_v36, 2  ;;  %v1980_v39 = vadd.f32 %v1979_v37, %v1972_v35 }
 0x1df   :  { %v1976_v40 = vadd.f32 %v1975_v38, %v1974_v36  ;;  %v1981_v41 = vrot.slane %v1980_v39, 2 }
 0x1e1   :  { %v1977_v42 = vrot.slane %v1976_v40, 1  ;;  %v1982_v22 = vadd.f32 %v1981_v41, %v1980_v39 }
 0x1e3   :  { %v1978_v43 = vadd.f32 %v1977_v42, %v1976_v40  ;;  %v1983_v44 = vrot.slane %v1982_v22, 1 }
 0x1e5   :  { %v1985_v23 = vmul.f32 0.125, %v1978_v43  ;;  %v1984_v45 = vadd.f32 %v1983_v44, %v1982_v22 }
 0x1e7   :  { %v1987_v46 = vadd.f32 1e-05, %v1985_v23  ;;  %v1986_v47 = vmul.f32 0.125, %v1984_v45 }
 0x1e9   :  { %2684 = vrsqrt.f32 %v1987_v46  ;;  %v1988_v48 = vadd.f32 1e-05, %v1986_v47 }
 0x1eb   :  { %2686 = vrsqrt.f32 %v1988_v48 }
 0x1f6   :  { %v2685_v49 = vpop.eup %2684 }
 0x1f7   :  { %v1991_v50 = vmul.f32 %v2685_v49, %v1969_v30 }
 0x1f8   :  { %v2687_v51 = vpop.eup %2686 }
 0x1f9   :  { %v1993_v52 = vmul.f32 0.2, %v1991_v50  ;;  %v1992_v53 = vmul.f32 %v2687_v51, %v1970_v33 }
 0x1fb   :  { %v1994_v54 = vmul.f32 0.2, %v1992_v53  ;;  %v1995_v55 = vmax.f32 %v1991_v50, %v1993_v52 }
 0x1fd   :  { %v1996_v56 = vmax.f32 %v1992_v53, %v1994_v54 }
 0x1ff   :  { %v2283_v57 = vpack.c.bf16 %v1996_v56, %v1995_v55 }
 0x201   :  { %2005 = vst [vmem:[%s3545_s3] sm:$0xff] %v2283_v57 }

// kernel: discriminator_forward.9
= control target key start
LH: loop header
LB: loop body
LE: loop exit
PB: predicated region body
PF: predicated region fallthrough
CT: control target
= control target key end

     0   :  { %v3858_v22 = vmov 1966171168   ;;  %v546_v24 = vlaneseq  ;;  %vm2946_vm0 = vcmask 1041408   ;;  %s4711_s1 = inlined_call_operand.vmem [shape: bf16[4096,128], index: 1, kind: input, shape index: {}]   ;;  %s4712_s0 = inlined_call_operand.vmem [shape: bf16[2,4096], index: 0, kind: input, shape index: {}]   ;;  %s4713_s2 = inlined_call_operand.vmem [shape: f32[1,128], index: 2, kind: input, shape index: {}]   ;;  %s4714_s3 = inlined_call_operand.vmem [shape: f32[2,128], index: 3, kind: output, shape index: {}]  }
   0x1   :  { %v3592_v0 = vld [vmem:[%s4711_s1 + $0x78] sm:$0xff]   ;;  %v3596_v4 = vld [vmem:[%s4711_s1 + $0x70] sm:$0xff]   ;;  %v3600_v8 = vld [vmem:[%s4711_s1 + $0x68] sm:$0xff]   ;;  %v544_v23 = vunpack.c.l.s4 %v3858_v22 }
   0x2   :  { %v3593_v1 = vld [vmem:[%s4711_s1 + $0xf8] sm:$0xff]   ;;  %3239 = vmatprep.subr.bf16.mxu0 %v3592_v0  ;;  %v3597_v5 = vld [vmem:[%s4711_s1 + $0xf0] sm:$0xff]   ;;  %v3601_v9 = vld [vmem:[%s4711_s1 + $0xe8] sm:$0xff]   ;;  %v547_v30 = vshrl.u32 %v546_v24, 7 }
   0x3   :  { %v3594_v2 = vld [vmem:[%s4711_s1 + $0x38] sm:$0xff]   ;;  %3261 = vmatprep.subr.bf16.mxu1 %v3593_v1  ;;  %v3598_v6 = vld [vmem:[%s4711_s1 + $0x30] sm:$0xff]   ;;  %v3602_v10 = vld [vmem:[%s4711_s1 + $0x28] sm:$0xff]   ;;  %v545_v29 = vunpack.c.0.s8 %v544_v23 }
   0x4   :  { %v3595_v3 = vld [vmem:[%s4711_s1 + $0xb8] sm:$0xff]   ;;  %3240 = vmatpush3.bf16.msra.mxu0 %v3594_v2  ;;  %v3599_v7 = vld [vmem:[%s4711_s1 + $0xb0] sm:$0xff]   ;;  %v3603_v11 = vld [vmem:[%s4711_s1 + $0xa8] sm:$0xff]  }
   0x5   :  { %3262 = vmatpush3.bf16.msra.mxu1 %v3595_v3  ;;  %3241 = vmatprep.subr.bf16.mxu0 %v3596_v4  ;;  %v3604_v12 = vld [vmem:[%s4711_s1 + $0x60] sm:$0xff]   ;;  %v3608_v16 = vld [vmem:[%s4711_s1 + $0x58] sm:$0xff]   ;;  %v3612_v20 = vld [vmem:[%s4711_s1 + $0x50] sm:$0xff]   ;;  %v3969_v35 = vsub.s32 %v545_v29, %v547_v30 }
   0x6   :  { %3263 = vmatprep.subr.bf16.mxu1 %v3597_v5  ;;  %v3605_v13 = vld [vmem:[%s4711_s1 + $0xe0] sm:$0xff]   ;;  %v3609_v17 = vld [vmem:[%s4711_s1 + $0xd8] sm:$0xff]   ;;  %v3613_v21 = vld [vmem:[%s4711_s1 + $0xd0] sm:$0xff]  }
   0x7   :  { %v3606_v14 = vld [vmem:[%s4711_s1 + $0x20] sm:$0xff]   ;;  %v3610_v18 = vld [vmem:[%s4711_s1 + $0x18] sm:$0xff]   ;;  %v3614_v25 = vld [vmem:[%s4711_s1 + $0x10] sm:$0xff]  }
   0x8   :  { %3242 = vmatpush3.bf16.msra.mxu0 %v3598_v6  ;;  %v3607_v15 = vld [vmem:[%s4711_s1 + $0xa0] sm:$0xff]   ;;  %v3611_v19 = vld [vmem:[%s4711_s1 + $0x98] sm:$0xff]   ;;  %v3615_v26 = vld [vmem:[%s4711_s1 + $0x90] sm:$0xff]  }
   0x9   :  { %3264 = vmatpush3.bf16.msra.mxu1 %v3599_v7  ;;  %3243 = vmatprep.subr.bf16.mxu0 %v3600_v8  ;;  %v3616_v27 = vld [vmem:[%s4711_s1 + $0x48] sm:$0xff]   ;;  %v3620_v33 = vld [vmem:[%s4711_s1 + $0x40] sm:$0xff]   ;;  %v3625_v41 = vld [vmem:[%s4711_s1 + $0x178] sm:$0xff]  }
   0xa   :  { %3265 = vmatprep.subr.bf16.mxu1 %v3601_v9  ;;  %v3617_v28 = vld [vmem:[%s4711_s1 + $0xc8] sm:$0xff]   ;;  %v3621_v34 = vld [vmem:[%s4711_s1 + $0xc0] sm:$0xff]   ;;  %v3626_v42 = vld [vmem:[%s4711_s1 + $0x1f8] sm:$0xff]  }
   0xb   :  { %v3618_v31 = vld [vmem:[%s4711_s1 + $0x8] sm:$0xff]   ;;  %v3622_v36 = vld [vmem:[%s4711_s1] sm:$0xff]   ;;  %v3627_v46 = vld [vmem:[%s4711_s1 + $0x138] sm:$0xff]  }
   0xc   :  { %3244 = vmatpush3.bf16.msra.mxu0 %v3602_v10  ;;  %v3619_v32 = vld [vmem:[%s4711_s1 + $0x88] sm:$0xff]   ;;  %v3623_v37 = vld [vmem:[%s4711_s1 + $0x80] sm:$0xff]   ;;  %v3628_v48 = vld [vmem:[%s4711_s1 + $0x1b8] sm:$0xff]  }
   0xd   :  { %3266 = vmatpush3.bf16.msra.mxu1 %v3603_v11  ;;  %3245 = vmatprep.subr.bf16.mxu0 %v3604_v12  ;;  %v15_v38 = vld [vmem:[%s4712_s0] sm:$0xff]  ;;  %v3629_v51 = vld [vmem:[%s4711_s1 + $0x170] sm:$0xff]   ;;  %v3633_v58 = vld [vmem:[%s4711_s1 + $0x168] sm:$0xff]  }
   0xe   :  { %3267 = vmatprep.subr.bf16.mxu1 %v3605_v13  ;;  %v542_v39 = vcombine.high %v15_v38, %v15_v38  ;;  %v549_v40 = vrot.slane %v15_v38, %v3969_v35  ;;  %v3630_v53 = vld [vmem:[%s4711_s1 + $0x1f0] sm:$0xff]   ;;  %v3634_v59 = vld [vmem:[%s4711_s1 + $0x1e8] sm:$0xff]   ;;  %v3637_v62 = vld [vmem:[%s4711_s1 + $0x160] sm:$0xff]  }
   0xf   :  { %v3631_v55 = vld [vmem:[%s4711_s1 + $0x130] sm:$0xff]   ;;  %v3635_v60 = vld [vmem:[%s4711_s1 + $0x128] sm:$0xff]   ;;  %v3638_v63 = vld [vmem:[%s4711_s1 + $0x1e0] sm:$0xff]  }
  0x10   :  { %3246 = vmatpush3.bf16.msra.mxu0 %v3606_v14  ;;  %v557_v43 = vcombine.high %v549_v40, %v549_v40  ;;  %v565_v44 = vrot.slane %v549_v40, %v3969_v35  ;;  %v3989_v45 = vrot.slane %v542_v39, %v3969_v35  ;;  %v3632_v56 = vld [vmem:[%s4711_s1 + $0x1b0] sm:$0xff]   ;;  %v3636_v61 = vld [vmem:[%s4711_s1 + $0x1a8] sm:$0xff]   ;;  %v3639_v0 = vld [vmem:[%s4711_s1 + $0x120] sm:$0xff]  }
  0x11   :  { %3268 = vmatpush3.bf16.msra.mxu1 %v3607_v15  ;;  %3247 = vmatprep.subr.bf16.mxu0 %v3608_v16  ;;  %v3640_v1 = vld [vmem:[%s4711_s1 + $0x1a0] sm:$0xff]   ;;  %v3641_v2 = vld [vmem:[%s4711_s1 + $0x158] sm:$0xff]   ;;  %v3645_v6 = vld [vmem:[%s4711_s1 + $0x150] sm:$0xff]  }
  0x12   :  { %3269 = vmatprep.subr.bf16.mxu1 %v3609_v17  ;;  %v579_v47 = vrot.slane %v557_v43, %v3969_v35  ;;  %v558_v49 = vcombine.high %v3989_v45, %v3989_v45  ;;  %v587_v50 = vcombine.high %v565_v44, %v565_v44  ;;  %v3642_v3 = vld [vmem:[%s4711_s1 + $0x1d8] sm:$0xff]   ;;  %v3646_v7 = vld [vmem:[%s4711_s1 + $0x1d0] sm:$0xff]   ;;  %v3649_v10 = vld [vmem:[%s4711_s1 + $0x148] sm:$0xff]  }
  0x13   :  { %v3643_v4 = vld [vmem:[%s4711_s1 + $0x118] sm:$0xff]   ;;  %v3647_v8 = vld [vmem:[%s4711_s1 + $0x110] sm:$0xff]   ;;  %v3650_v11 = vld [vmem:[%s4711_s1 + $0x1c8] sm:$0xff]  }
  0x14   :  { %3248 = vmatpush3.bf16.msra.mxu0 %v3610_v18  ;;  %2338 = vmatprep.mubr.bf16.mxu0 %v579_v47  ;;  %v589_v52 = vcombine.high %v579_v47, %v579_v47  ;;  %v586_v54 = vrot.slane %v558_v49, %v3969_v35  ;;  %v3644_v5 = vld [vmem:[%s4711_s1 + $0x198] sm:$0xff]   ;;  %v3648_v9 = vld [vmem:[%s4711_s1 + $0x190] sm:$0xff]   ;;  %v3651_v12 = vld [vmem:[%s4711_s1 + $0x108] sm:$0xff]   ;;  %v572_v18 = vrot.slane %v3989_v45, %v3969_v35 }
  0x15   :  { %3270 = vmatpush3.bf16.msra.mxu1 %v3611_v19  ;;  %3249 = vmatprep.subr.bf16.mxu0 %v3612_v20  ;;  %v3652_v13 = vld [vmem:[%s4711_s1 + $0x188] sm:$0xff]   ;;  %v3653_v14 = vld [vmem:[%s4711_s1 + $0x140] sm:$0xff]   ;;  %v3657_v19 = vld [vmem:[%s4711_s1 + $0x278] sm:$0xff]  }
  0x16   :  { %3271 = vmatprep.subr.bf16.mxu1 %v3613_v21  ;;  %2378 = vmatprep.mubr.bf16.mxu1 %v589_v52  ;;  %v590_v57 = vcombine.high %v586_v54, %v586_v54  ;;  %v3654_v15 = vld [vmem:[%s4711_s1 + $0x1c0] sm:$0xff]   ;;  %v3658_v20 = vld [vmem:[%s4711_s1 + $0x2f8] sm:$0xff]   ;;  %v588_v23 = vcombine.high %v572_v18, %v572_v18  ;;  %v3661_v24 = vld [vmem:[%s4711_s1 + $0x270] sm:$0xff]  }
  0x17   :  { %v3655_v16 = vld [vmem:[%s4711_s1 + $0x100] sm:$0xff]   ;;  %v3659_v21 = vld [vmem:[%s4711_s1 + $0x238] sm:$0xff]   ;;  %v3666_v29 = vld [vmem:[%s4711_s1 + $0x2e8] sm:$0xff]  }
  0x18   :  { %3250 = vmatpush3.bf16.msra.mxu0 %v3614_v25  ;;  %v3656_v17 = vld [vmem:[%s4711_s1 + $0x180] sm:$0xff]   ;;  %v3660_v22 = vld [vmem:[%s4711_s1 + $0x2b8] sm:$0xff]   ;;  %v3662_v25 = vld [vmem:[%s4711_s1 + $0x2f0] sm:$0xff]  }
  0x19   :  { %3272 = vmatpush3.bf16.msra.mxu1 %v3615_v26  ;;  %3251 = vmatprep.subr.bf16.mxu0 %v3616_v27  ;;  %v3663_v26 = vld [vmem:[%s4711_s1 + $0x230] sm:$0xff]   ;;  %v3667_v30 = vld [vmem:[%s4711_s1 + $0x228] sm:$0xff]   ;;  %v3674_v38 = vld [vmem:[%s4711_s1 + $0x2d8] sm:$0xff]  }
  0x1a   :  { %3273 = vmatprep.subr.bf16.mxu1 %v3617_v28  ;;  %v3664_v27 = vld [vmem:[%s4711_s1 + $0x2b0] sm:$0xff]   ;;  %v3665_v28 = vld [vmem:[%s4711_s1 + $0x268] sm:$0xff]   ;;  %v3675_v39 = vld [vmem:[%s4711_s1 + $0x218] sm:$0xff]  }
  0x1b   :  { %v3676_v40 = vld [vmem:[%s4711_s1 + $0x298] sm:$0xff]   ;;  %v3679_v43 = vld [vmem:[%s4711_s1 + $0x210] sm:$0xff]   ;;  %v3681_v45 = vld [vmem:[%s4711_s1 + $0x248] sm:$0xff]  }
  0x1c   :  { %3252 = vmatpush3.bf16.msra.mxu0 %v3618_v31  ;;  %v3668_v31 = vld [vmem:[%s4711_s1 + $0x2a8] sm:$0xff]   ;;  %v3685_v49 = vld [vmem:[%s4711_s1 + $0x240] sm:$0xff]  }
  0x1d   :  { %3274 = vmatpush3.bf16.msra.mxu1 %v3619_v32  ;;  %3253 = vmatprep.subr.bf16.mxu0 %v3620_v33  ;;  %v3669_v32 = vld [vmem:[%s4711_s1 + $0x260] sm:$0xff]   ;;  %v3683_v47 = vld [vmem:[%s4711_s1 + $0x208] sm:$0xff]  }
  0x1e   :  { %3275 = vmatprep.subr.bf16.mxu1 %v3621_v34  ;;  %v3670_v33 = vld [vmem:[%s4711_s1 + $0x2e0] sm:$0xff]   ;;  %v16_v52 = vld [vmem:[%s4712_s0 + $0x8] sm:$0xff] }
  0x1f   :  { %v3671_v34 = vld [vmem:[%s4711_s1 + $0x220] sm:$0xff]  }
  0x20   :  { %3254 = vmatpush3.bf16.msra.mxu0 %v3622_v36  ;;  %v3672_v36 = vld [vmem:[%s4711_s1 + $0x2a0] sm:$0xff]  }
  0x21   :  { %3276 = vmatpush3.bf16.msra.mxu1 %v3623_v37  ;;  %3283 = vmatprep.subr.bf16.mxu0 %v3625_v41  ;;  %v3673_v37 = vld [vmem:[%s4711_s1 + $0x258] sm:$0xff]   ;;  %v3677_v41 = vld [vmem:[%s4711_s1 + $0x250] sm:$0xff]  }
  0x22   :  { %3305 = vmatprep.subr.bf16.mxu1 %v3626_v42  ;;  %v3678_v42 = vld [vmem:[%s4711_s1 + $0x2d0] sm:$0xff]  }
  0x23   :  { %2339 = vmatmul.mubr.bf16.vlgmr.msra.gmra.mxu0 %v565_v44  ;;  %v3680_v44 = vld [vmem:[%s4711_s1 + $0x290] sm:$0xff]  }
  0x24   :  { %3284 = vmatpush3.bf16.msra.mxu0 %v3627_v46  ;;  %2379 = vmatmul.mubr.bf16.vlgmr.msra.gmra.mxu1 %v587_v50  ;;  %v3682_v46 = vld [vmem:[%s4711_s1 + $0x2c8] sm:$0xff]   ;;  %v3686_v50 = vld [vmem:[%s4711_s1 + $0x2c0] sm:$0xff]  }
  0x25   :  { %3285 = vmatprep.subr.bf16.mxu0 %v3629_v51  ;;  %3306 = vmatpush3.bf16.msra.mxu1 %v3628_v48  ;;  %v3684_v48 = vld [vmem:[%s4711_s1 + $0x288] sm:$0xff]   ;;  %v3687_v51 = vld [vmem:[%s4711_s1 + $0x200] sm:$0xff]  }
  0x26   :  { %2418 = vmatprep.mubr.bf16.mxu0 %v586_v54  ;;  %3307 = vmatprep.subr.bf16.mxu1 %v3630_v53  ;;  %v3688_v53 = vld [vmem:[%s4711_s1 + $0x280] sm:$0xff]   ;;  %v598_v54 = vrot.slane %v16_v52, %v3969_v35 }
  0x27   :  { %2458 = vmatprep.mubr.bf16.mxu1 %v590_v57 }
  0x28   :  { %3286 = vmatpush3.bf16.msra.mxu0 %v3631_v55  ;;  %v591_v55 = vcombine.high %v16_v52, %v16_v52  ;;  %v606_v57 = vcombine.high %v598_v54, %v598_v54  ;;  %v3738_v52 = vld [vmem:[%s4711_s1 + $0x458] sm:$0xff]  }
  0x29   :  { %3287 = vmatprep.subr.bf16.mxu0 %v3633_v58  ;;  %3308 = vmatpush3.bf16.msra.mxu1 %v3632_v56  ;;  %v3689_v56 = vld [vmem:[%s4711_s1 + $0x378] sm:$0xff]   ;;  %v614_v58 = vrot.slane %v598_v54, %v3969_v35 }
  0x2a   :  { %3309 = vmatprep.subr.bf16.mxu1 %v3634_v59  ;;  %v3690_v59 = vld [vmem:[%s4711_s1 + $0x3f8] sm:$0xff]  }
  0x2b   :  { %v3740_v54 = vld [vmem:[%s4711_s1 + $0x418] sm:$0xff]  }
  0x2c   :  { %3288 = vmatpush3.bf16.msra.mxu0 %v3635_v60  ;;  %v4195_v60 = vrot.slane %v591_v55, %v3969_v35  ;;  %v3741_v55 = vld [vmem:[%s4711_s1 + $0x498] sm:$0xff]  }
  0x2d   :  { %3289 = vmatprep.subr.bf16.mxu0 %v3637_v62  ;;  %3310 = vmatpush3.bf16.msra.mxu1 %v3636_v61  ;;  %v3691_v61 = vld [vmem:[%s4711_s1 + $0x338] sm:$0xff]   ;;  %v628_v62 = vrot.slane %v606_v57, %v3969_v35  ;;  %v3743_v57 = vld [vmem:[%s4711_s1 + $0x4d0] sm:$0xff]  }
  0x2e   :  { %3311 = vmatprep.subr.bf16.mxu1 %v3638_v63  ;;  %v3692_v63 = vld [vmem:[%s4711_s1 + $0x3b8] sm:$0xff]  }
  0x30   :  { %3290 = vmatpush3.bf16.msra.mxu0 %v3639_v0  ;;  %v607_v0 = vcombine.high %v4195_v60, %v4195_v60 }
  0x31   :  { %3291 = vmatprep.subr.bf16.mxu0 %v3641_v2  ;;  %3312 = vmatpush3.bf16.msra.mxu1 %v3640_v1  ;;  %v636_v1 = vcombine.high %v614_v58, %v614_v58  ;;  %v3693_v2 = vld [vmem:[%s4711_s1 + $0x370] sm:$0xff]  }
  0x32   :  { %3313 = vmatprep.subr.bf16.mxu1 %v3642_v3  ;;  %v638_v3 = vcombine.high %v628_v62, %v628_v62 }
  0x34   :  { %3292 = vmatpush3.bf16.msra.mxu0 %v3643_v4  ;;  %v3694_v4 = vld [vmem:[%s4711_s1 + $0x3f0] sm:$0xff]  }
  0x35   :  { %3293 = vmatprep.subr.bf16.mxu0 %v3645_v6  ;;  %3314 = vmatpush3.bf16.msra.mxu1 %v3644_v5  ;;  %v635_v5 = vrot.slane %v607_v0, %v3969_v35  ;;  %v3695_v6 = vld [vmem:[%s4711_s1 + $0x330] sm:$0xff]   ;;  %v3750_v0 = vld [vmem:[%s4711_s1 + $0x440] sm:$0xff]  }
  0x36   :  { %3315 = vmatprep.subr.bf16.mxu1 %v3646_v7  ;;  %v3696_v7 = vld [vmem:[%s4711_s1 + $0x3b0] sm:$0xff]  }
  0x38   :  { %3294 = vmatpush3.bf16.msra.mxu0 %v3647_v8  ;;  %v639_v8 = vcombine.high %v635_v5, %v635_v5 }
  0x39   :  { %3295 = vmatprep.subr.bf16.mxu0 %v3649_v10  ;;  %3316 = vmatpush3.bf16.msra.mxu1 %v3648_v9  ;;  %v3697_v9 = vld [vmem:[%s4711_s1 + $0x368] sm:$0xff]  }
  0x3a   :  { %3317 = vmatprep.subr.bf16.mxu1 %v3650_v11  ;;  %v3698_v10 = vld [vmem:[%s4711_s1 + $0x3e8] sm:$0xff]  }
  0x3b   :  { %v3699_v11 = vld [vmem:[%s4711_s1 + $0x328] sm:$0xff]  }
  0x3c   :  { %3296 = vmatpush3.bf16.msra.mxu0 %v3651_v12  ;;  %v3700_v12 = vld [vmem:[%s4711_s1 + $0x3a8] sm:$0xff]  }
  0x3d   :  { %3297 = vmatprep.subr.bf16.mxu0 %v3653_v14  ;;  %3318 = vmatpush3.bf16.msra.mxu1 %v3652_v13  ;;  %v3701_v13 = vld [vmem:[%s4711_s1 + $0x360] sm:$0xff]  }
  0x3e   :  { %3319 = vmatprep.subr.bf16.mxu1 %v3654_v15  ;;  %v3702_v14 = vld [vmem:[%s4711_s1 + $0x3e0] sm:$0xff]  }
  0x3f   :  { %v3703_v15 = vld [vmem:[%s4711_s1 + $0x320] sm:$0xff]  }
  0x40   :  { %3298 = vmatpush3.bf16.msra.mxu0 %v3655_v16  ;;  %v3704_v16 = vld [vmem:[%s4711_s1 + $0x3a0] sm:$0xff]  }
  0x41   :  { %3327 = vmatprep.subr.bf16.mxu0 %v3657_v19  ;;  %3320 = vmatpush3.bf16.msra.mxu1 %v3656_v17  ;;  %v3705_v17 = vld [vmem:[%s4711_s1 + $0x358] sm:$0xff]  }
  0x42   :  { %3349 = vmatprep.subr.bf16.mxu1 %v3658_v20  ;;  %v3707_v19 = vld [vmem:[%s4711_s1 + $0x318] sm:$0xff]  }
  0x43   :  { %2419 = vmatmul.mubr.bf16.vlgmr.msra.gmra.mxu0 %v572_v18  ;;  %v3706_v18 = vld [vmem:[%s4711_s1 + $0x3d8] sm:$0xff]  }
  0x44   :  { %3328 = vmatpush3.bf16.msra.mxu0 %v3659_v21  ;;  %2459 = vmatmul.mubr.bf16.vlgmr.msra.gmra.mxu1 %v588_v23  ;;  %v3708_v20 = vld [vmem:[%s4711_s1 + $0x398] sm:$0xff]   ;;  %v3709_v21 = vld [vmem:[%s4711_s1 + $0x350] sm:$0xff]  }
  0x45   :  { %3329 = vmatprep.subr.bf16.mxu0 %v3661_v24  ;;  %3350 = vmatpush3.bf16.msra.mxu1 %v3660_v22  ;;  %v3710_v22 = vld [vmem:[%s4711_s1 + $0x3d0] sm:$0xff]  }
  0x46   :  { %3351 = vmatprep.subr.bf16.mxu1 %v3662_v25  ;;  %2498 = vmatprep.mubr.bf16.mxu0 %v628_v62  ;;  %v3711_v23 = vld [vmem:[%s4711_s1 + $0x310] sm:$0xff]   ;;  %v3713_v25 = vld [vmem:[%s4711_s1 + $0x348] sm:$0xff]  }
  0x47   :  { %2538 = vmatprep.mubr.bf16.mxu1 %v638_v3  ;;  %v3712_v24 = vld [vmem:[%s4711_s1 + $0x390] sm:$0xff]   ;;  %v3748_v62 = vld [vmem:[%s4711_s1 + $0x408] sm:$0xff]  }
  0x48   :  { %3330 = vmatpush3.bf16.msra.mxu0 %v3663_v26  ;;  %v3714_v26 = vld [vmem:[%s4711_s1 + $0x3c8] sm:$0xff]   ;;  %v17_v3 = vld [vmem:[%s4712_s0 + $0x10] sm:$0xff] }
  0x49   :  { %3331 = vmatprep.subr.bf16.mxu0 %v3665_v28  ;;  %3352 = vmatpush3.bf16.msra.mxu1 %v3664_v27  ;;  %v3715_v27 = vld [vmem:[%s4711_s1 + $0x308] sm:$0xff]  }
  0x4a   :  { %3353 = vmatprep.subr.bf16.mxu1 %v3666_v29  ;;  %v3716_v28 = vld [vmem:[%s4711_s1 + $0x388] sm:$0xff]   ;;  %v3717_v29 = vld [vmem:[%s4711_s1 + $0x340] sm:$0xff]  }
  0x4c   :  { %3332 = vmatpush3.bf16.msra.mxu0 %v3667_v30  ;;  %v3718_v30 = vld [vmem:[%s4711_s1 + $0x3c0] sm:$0xff]  }
  0x4d   :  { %3333 = vmatprep.subr.bf16.mxu0 %v3669_v32  ;;  %3354 = vmatpush3.bf16.msra.mxu1 %v3668_v31  ;;  %v3719_v31 = vld [vmem:[%s4711_s1 + $0x300] sm:$0xff]  }
  0x4e   :  { %3355 = vmatprep.subr.bf16.mxu1 %v3670_v33  ;;  %v3720_v32 = vld [vmem:[%s4711_s1 + $0x380] sm:$0xff]   ;;  %v621_v33 = vrot.slane %v4195_v60, %v3969_v35  ;;  %v3746_v60 = vld [vmem:[%s4711_s1 + $0x448] sm:$0xff]  }
  0x50   :  { %3334 = vmatpush3.bf16.msra.mxu0 %v3671_v34  ;;  %v3722_v34 = vld [vmem:[%s4711_s1 + $0x478] sm:$0xff]  }
  0x51   :  { %3335 = vmatprep.subr.bf16.mxu0 %v3673_v37  ;;  %3356 = vmatpush3.bf16.msra.mxu1 %v3672_v36  ;;  %v3723_v36 = vld [vmem:[%s4711_s1 + $0x4f8] sm:$0xff]  }
  0x52   :  { %3357 = vmatprep.subr.bf16.mxu1 %v3674_v38  ;;  %v3724_v37 = vld [vmem:[%s4711_s1 + $0x438] sm:$0xff]  }
  0x53   :  { %v3725_v38 = vld [vmem:[%s4711_s1 + $0x4b8] sm:$0xff]  }
  0x54   :  { %3336 = vmatpush3.bf16.msra.mxu0 %v3675_v39  ;;  %v637_v39 = vcombine.high %v621_v33, %v621_v33 }
  0x55   :  { %3337 = vmatprep.subr.bf16.mxu0 %v3677_v41  ;;  %3358 = vmatpush3.bf16.msra.mxu1 %v3676_v40  ;;  %v3726_v40 = vld [vmem:[%s4711_s1 + $0x470] sm:$0xff]  }
  0x56   :  { %3359 = vmatprep.subr.bf16.mxu1 %v3678_v42  ;;  %v3727_v41 = vld [vmem:[%s4711_s1 + $0x4f0] sm:$0xff]  }
  0x57   :  { %v3728_v42 = vld [vmem:[%s4711_s1 + $0x430] sm:$0xff]  }
  0x58   :  { %3338 = vmatpush3.bf16.msra.mxu0 %v3679_v43  ;;  %v3729_v43 = vld [vmem:[%s4711_s1 + $0x4b0] sm:$0xff]  }
  0x59   :  { %3339 = vmatprep.subr.bf16.mxu0 %v3681_v45  ;;  %3360 = vmatpush3.bf16.msra.mxu1 %v3680_v44  ;;  %v3730_v44 = vld [vmem:[%s4711_s1 + $0x468] sm:$0xff]  }
  0x5a   :  { %3361 = vmatprep.subr.bf16.mxu1 %v3682_v46  ;;  %v3731_v45 = vld [vmem:[%s4711_s1 + $0x4e8] sm:$0xff]  }
  0x5b   :  { %v3732_v46 = vld [vmem:[%s4711_s1 + $0x428] sm:$0xff]  }
  0x5c   :  { %3340 = vmatpush3.bf16.msra.mxu0 %v3683_v47  ;;  %v3733_v47 = vld [vmem:[%s4711_s1 + $0x4a8] sm:$0xff]  }
  0x5d   :  { %3341 = vmatprep.subr.bf16.mxu0 %v3685_v49  ;;  %3362 = vmatpush3.bf16.msra.mxu1 %v3684_v48  ;;  %v3734_v48 = vld [vmem:[%s4711_s1 + $0x460] sm:$0xff]  }
  0x5e   :  { %3363 = vmatprep.subr.bf16.mxu1 %v3686_v50  ;;  %v3735_v49 = vld [vmem:[%s4711_s1 + $0x4e0] sm:$0xff]  }
  0x5f   :  { %v3736_v50 = vld [vmem:[%s4711_s1 + $0x420] sm:$0xff]  }
  0x60   :  { %3342 = vmatpush3.bf16.msra.mxu0 %v3687_v51  ;;  %v3737_v51 = vld [vmem:[%s4711_s1 + $0x4a0] sm:$0xff]  }
  0x61   :  { %3371 = vmatprep.subr.bf16.mxu0 %v3689_v56  ;;  %3364 = vmatpush3.bf16.msra.mxu1 %v3688_v53  ;;  %v3739_v53 = vld [vmem:[%s4711_s1 + $0x4d8] sm:$0xff]   ;;  %v3742_v56 = vld [vmem:[%s4711_s1 + $0x450] sm:$0xff]  }
  0x62   :  { %3393 = vmatprep.subr.bf16.mxu1 %v3690_v59  ;;  %v3745_v59 = vld [vmem:[%s4711_s1 + $0x490] sm:$0xff]  }
  0x63   :  { %2499 = vmatmul.mubr.bf16.vlgmr.msra.gmra.mxu0 %v614_v58  ;;  %v3744_v58 = vld [vmem:[%s4711_s1 + $0x410] sm:$0xff]  }
  0x64   :  { %3372 = vmatpush3.bf16.msra.mxu0 %v3691_v61  ;;  %2539 = vmatmul.mubr.bf16.vlgmr.msra.gmra.mxu1 %v636_v1  ;;  %v3747_v61 = vld [vmem:[%s4711_s1 + $0x4c8] sm:$0xff]   ;;  %v3751_v1 = vld [vmem:[%s4711_s1 + $0x4c0] sm:$0xff]  }
  0x65   :  { %3373 = vmatprep.subr.bf16.mxu0 %v3693_v2  ;;  %3394 = vmatpush3.bf16.msra.mxu1 %v3692_v63  ;;  %v3749_v63 = vld [vmem:[%s4711_s1 + $0x488] sm:$0xff]   ;;  %v3752_v2 = vld [vmem:[%s4711_s1 + $0x400] sm:$0xff]  }
  0x66   :  { %2578 = vmatprep.mubr.bf16.mxu0 %v635_v5  ;;  %3395 = vmatprep.subr.bf16.mxu1 %v3694_v4  ;;  %v3753_v4 = vld [vmem:[%s4711_s1 + $0x480] sm:$0xff]   ;;  %v647_v5 = vrot.slane %v17_v3, %v3969_v35 }
  0x67   :  { %2618 = vmatprep.mubr.bf16.mxu1 %v639_v8 }
  0x68   :  { %3374 = vmatpush3.bf16.msra.mxu0 %v3695_v6  ;;  %v640_v6 = vcombine.high %v17_v3, %v17_v3  ;;  %v655_v8 = vcombine.high %v647_v5, %v647_v5  ;;  %v3803_v3 = vld [vmem:[%s4711_s1 + $0x658] sm:$0xff]  }
  0x69   :  { %3375 = vmatprep.subr.bf16.mxu0 %v3697_v9  ;;  %3396 = vmatpush3.bf16.msra.mxu1 %v3696_v7  ;;  %v3754_v7 = vld [vmem:[%s4711_s1 + $0x578] sm:$0xff]   ;;  %v663_v9 = vrot.slane %v647_v5, %v3969_v35 }
  0x6a   :  { %3397 = vmatprep.subr.bf16.mxu1 %v3698_v10  ;;  %v3755_v10 = vld [vmem:[%s4711_s1 + $0x5f8] sm:$0xff]  }
  0x6b   :  { %v3805_v5 = vld [vmem:[%s4711_s1 + $0x618] sm:$0xff]  }
  0x6c   :  { %3376 = vmatpush3.bf16.msra.mxu0 %v3699_v11  ;;  %v4401_v11 = vrot.slane %v640_v6, %v3969_v35  ;;  %v3806_v6 = vld [vmem:[%s4711_s1 + $0x698] sm:$0xff]  }
  0x6d   :  { %3377 = vmatprep.subr.bf16.mxu0 %v3701_v13  ;;  %3398 = vmatpush3.bf16.msra.mxu1 %v3700_v12  ;;  %v3756_v12 = vld [vmem:[%s4711_s1 + $0x538] sm:$0xff]   ;;  %v677_v13 = vrot.slane %v655_v8, %v3969_v35  ;;  %v3808_v8 = vld [vmem:[%s4711_s1 + $0x6d0] sm:$0xff]  }
  0x6e   :  { %3399 = vmatprep.subr.bf16.mxu1 %v3702_v14  ;;  %v3757_v14 = vld [vmem:[%s4711_s1 + $0x5b8] sm:$0xff]  }
  0x70   :  { %3378 = vmatpush3.bf16.msra.mxu0 %v3703_v15  ;;  %v656_v15 = vcombine.high %v4401_v11, %v4401_v11 }
  0x71   :  { %3379 = vmatprep.subr.bf16.mxu0 %v3705_v17  ;;  %3400 = vmatpush3.bf16.msra.mxu1 %v3704_v16  ;;  %v685_v16 = vcombine.high %v663_v9, %v663_v9  ;;  %v3758_v17 = vld [vmem:[%s4711_s1 + $0x570] sm:$0xff]  }
  0x72   :  { %3401 = vmatprep.subr.bf16.mxu1 %v3706_v18  ;;  %v687_v18 = vcombine.high %v677_v13, %v677_v13 }
  0x74   :  { %3380 = vmatpush3.bf16.msra.mxu0 %v3707_v19  ;;  %v3759_v19 = vld [vmem:[%s4711_s1 + $0x5f0] sm:$0xff]  }
  0x75   :  { %3381 = vmatprep.subr.bf16.mxu0 %v3709_v21  ;;  %3402 = vmatpush3.bf16.msra.mxu1 %v3708_v20  ;;  %v684_v20 = vrot.slane %v656_v15, %v3969_v35  ;;  %v3760_v21 = vld [vmem:[%s4711_s1 + $0x530] sm:$0xff]   ;;  %v3815_v15 = vld [vmem:[%s4711_s1 + $0x640] sm:$0xff]  }
  0x76   :  { %3403 = vmatprep.subr.bf16.mxu1 %v3710_v22  ;;  %v3761_v22 = vld [vmem:[%s4711_s1 + $0x5b0] sm:$0xff]  }
  0x78   :  { %3382 = vmatpush3.bf16.msra.mxu0 %v3711_v23  ;;  %v688_v23 = vcombine.high %v684_v20, %v684_v20 }
  0x79   :  { %3383 = vmatprep.subr.bf16.mxu0 %v3713_v25  ;;  %3404 = vmatpush3.bf16.msra.mxu1 %v3712_v24  ;;  %v3762_v24 = vld [vmem:[%s4711_s1 + $0x568] sm:$0xff]  }
  0x7a   :  { %3405 = vmatprep.subr.bf16.mxu1 %v3714_v26  ;;  %v3763_v25 = vld [vmem:[%s4711_s1 + $0x5e8] sm:$0xff]  }
  0x7b   :  { %v3764_v26 = vld [vmem:[%s4711_s1 + $0x528] sm:$0xff]  }
  0x7c   :  { %3384 = vmatpush3.bf16.msra.mxu0 %v3715_v27  ;;  %v3765_v27 = vld [vmem:[%s4711_s1 + $0x5a8] sm:$0xff]  }
  0x7d   :  { %3385 = vmatprep.subr.bf16.mxu0 %v3717_v29  ;;  %3406 = vmatpush3.bf16.msra.mxu1 %v3716_v28  ;;  %v3766_v28 = vld [vmem:[%s4711_s1 + $0x560] sm:$0xff]  }
  0x7e   :  { %3407 = vmatprep.subr.bf16.mxu1 %v3718_v30  ;;  %v3767_v29 = vld [vmem:[%s4711_s1 + $0x5e0] sm:$0xff]  }
  0x7f   :  { %v3768_v30 = vld [vmem:[%s4711_s1 + $0x520] sm:$0xff]  }
  0x80   :  { %3386 = vmatpush3.bf16.msra.mxu0 %v3719_v31  ;;  %v3769_v31 = vld [vmem:[%s4711_s1 + $0x5a0] sm:$0xff]  }
  0x81   :  { %3415 = vmatprep.subr.bf16.mxu0 %v3722_v34  ;;  %3408 = vmatpush3.bf16.msra.mxu1 %v3720_v32  ;;  %v3770_v32 = vld [vmem:[%s4711_s1 + $0x558] sm:$0xff]  }
  0x82   :  { %3437 = vmatprep.subr.bf16.mxu1 %v3723_v36  ;;  %v3772_v34 = vld [vmem:[%s4711_s1 + $0x518] sm:$0xff]  }
  0x83   :  { %2579 = vmatmul.mubr.bf16.vlgmr.msra.gmra.mxu0 %v621_v33  ;;  %v3771_v33 = vld [vmem:[%s4711_s1 + $0x5d8] sm:$0xff]  }
  0x84   :  { %3416 = vmatpush3.bf16.msra.mxu0 %v3724_v37  ;;  %2619 = vmatmul.mubr.bf16.vlgmr.msra.gmra.mxu1 %v637_v39  ;;  %v3773_v36 = vld [vmem:[%s4711_s1 + $0x598] sm:$0xff]   ;;  %v3774_v37 = vld [vmem:[%s4711_s1 + $0x550] sm:$0xff]  }
  0x85   :  { %3417 = vmatprep.subr.bf16.mxu0 %v3726_v40  ;;  %3438 = vmatpush3.bf16.msra.mxu1 %v3725_v38  ;;  %v3775_v38 = vld [vmem:[%s4711_s1 + $0x5d0] sm:$0xff]  }
  0x86   :  { %3439 = vmatprep.subr.bf16.mxu1 %v3727_v41  ;;  %2658 = vmatprep.mubr.bf16.mxu0 %v677_v13  ;;  %v3776_v39 = vld [vmem:[%s4711_s1 + $0x510] sm:$0xff]   ;;  %v3778_v41 = vld [vmem:[%s4711_s1 + $0x548] sm:$0xff]  }
  0x87   :  { %2698 = vmatprep.mubr.bf16.mxu1 %v687_v18  ;;  %v3777_v40 = vld [vmem:[%s4711_s1 + $0x590] sm:$0xff]   ;;  %v3813_v13 = vld [vmem:[%s4711_s1 + $0x608] sm:$0xff]   ;;  %v18_v18 = vld [vmem:[%s4712_s0 + $0x18] sm:$0xff] }
  0x88   :  { %3418 = vmatpush3.bf16.msra.mxu0 %v3728_v42  ;;  %v3779_v42 = vld [vmem:[%s4711_s1 + $0x5c8] sm:$0xff]  }
  0x89   :  { %3419 = vmatprep.subr.bf16.mxu0 %v3730_v44  ;;  %3440 = vmatpush3.bf16.msra.mxu1 %v3729_v43  ;;  %v3780_v43 = vld [vmem:[%s4711_s1 + $0x508] sm:$0xff]  }
  0x8a   :  { %3441 = vmatprep.subr.bf16.mxu1 %v3731_v45  ;;  %v3781_v44 = vld [vmem:[%s4711_s1 + $0x588] sm:$0xff]   ;;  %v3782_v45 = vld [vmem:[%s4711_s1 + $0x540] sm:$0xff]  }
  0x8c   :  { %3420 = vmatpush3.bf16.msra.mxu0 %v3732_v46  ;;  %v3783_v46 = vld [vmem:[%s4711_s1 + $0x5c0] sm:$0xff]  }
  0x8d   :  { %3421 = vmatprep.subr.bf16.mxu0 %v3734_v48  ;;  %3442 = vmatpush3.bf16.msra.mxu1 %v3733_v47  ;;  %v3784_v47 = vld [vmem:[%s4711_s1 + $0x500] sm:$0xff]  }
  0x8e   :  { %3443 = vmatprep.subr.bf16.mxu1 %v3735_v49  ;;  %v3785_v48 = vld [vmem:[%s4711_s1 + $0x580] sm:$0xff]   ;;  %v670_v49 = vrot.slane %v4401_v11, %v3969_v35  ;;  %v3811_v11 = vld [vmem:[%s4711_s1 + $0x648] sm:$0xff]  }
  0x90   :  { %3422 = vmatpush3.bf16.msra.mxu0 %v3736_v50  ;;  %v3787_v50 = vld [vmem:[%s4711_s1 + $0x678] sm:$0xff]  }
  0x91   :  { %3423 = vmatprep.subr.bf16.mxu0 %v3738_v52  ;;  %3444 = vmatpush3.bf16.msra.mxu1 %v3737_v51  ;;  %v3788_v51 = vld [vmem:[%s4711_s1 + $0x6f8] sm:$0xff]  }
  0x92   :  { %3445 = vmatprep.subr.bf16.mxu1 %v3739_v53  ;;  %v3789_v52 = vld [vmem:[%s4711_s1 + $0x638] sm:$0xff]  }
  0x93   :  { %v3790_v53 = vld [vmem:[%s4711_s1 + $0x6b8] sm:$0xff]  }
  0x94   :  { %3424 = vmatpush3.bf16.msra.mxu0 %v3740_v54  ;;  %v686_v54 = vcombine.high %v670_v49, %v670_v49 }
  0x95   :  { %3425 = vmatprep.subr.bf16.mxu0 %v3742_v56  ;;  %3446 = vmatpush3.bf16.msra.mxu1 %v3741_v55  ;;  %v3791_v55 = vld [vmem:[%s4711_s1 + $0x670] sm:$0xff]  }
  0x96   :  { %3447 = vmatprep.subr.bf16.mxu1 %v3743_v57  ;;  %v3792_v56 = vld [vmem:[%s4711_s1 + $0x6f0] sm:$0xff]  }
  0x97   :  { %v3793_v57 = vld [vmem:[%s4711_s1 + $0x630] sm:$0xff]  }
  0x98   :  { %3426 = vmatpush3.bf16.msra.mxu0 %v3744_v58  ;;  %v3794_v58 = vld [vmem:[%s4711_s1 + $0x6b0] sm:$0xff]  }
  0x99   :  { %3427 = vmatprep.subr.bf16.mxu0 %v3746_v60  ;;  %3448 = vmatpush3.bf16.msra.mxu1 %v3745_v59  ;;  %v3795_v59 = vld [vmem:[%s4711_s1 + $0x668] sm:$0xff]  }
  0x9a   :  { %3449 = vmatprep.subr.bf16.mxu1 %v3747_v61  ;;  %v3796_v60 = vld [vmem:[%s4711_s1 + $0x6e8] sm:$0xff]  }
  0x9b   :  { %v3797_v61 = vld [vmem:[%s4711_s1 + $0x628] sm:$0xff]  }
  0x9c   :  { %3428 = vmatpush3.bf16.msra.mxu0 %v3748_v62  ;;  %v3798_v62 = vld [vmem:[%s4711_s1 + $0x6a8] sm:$0xff]  }
  0x9d   :  { %3429 = vmatprep.subr.bf16.mxu0 %v3750_v0  ;;  %3450 = vmatpush3.bf16.msra.mxu1 %v3749_v63  ;;  %v3799_v63 = vld [vmem:[%s4711_s1 + $0x660] sm:$0xff]  }
  0x9e   :  { %3451 = vmatprep.subr.bf16.mxu1 %v3751_v1  ;;  %v3800_v0 = vld [vmem:[%s4711_s1 + $0x6e0] sm:$0xff]  }
  0x9f   :  { %v3801_v1 = vld [vmem:[%s4711_s1 + $0x620] sm:$0xff]  }
  0xa0   :  { %3430 = vmatpush3.bf16.msra.mxu0 %v3752_v2  ;;  %v3802_v2 = vld [vmem:[%s4711_s1 + $0x6a0] sm:$0xff]  }
  0xa1   :  { %3459 = vmatprep.subr.bf16.mxu0 %v3754_v7  ;;  %3452 = vmatpush3.bf16.msra.mxu1 %v3753_v4  ;;  %v3804_v4 = vld [vmem:[%s4711_s1 + $0x6d8] sm:$0xff]   ;;  %v3807_v7 = vld [vmem:[%s4711_s1 + $0x650] sm:$0xff]  }
  0xa2   :  { %3481 = vmatprep.subr.bf16.mxu1 %v3755_v10  ;;  %v3810_v10 = vld [vmem:[%s4711_s1 + $0x690] sm:$0xff]  }
  0xa3   :  { %2659 = vmatmul.mubr.bf16.vlgmr.msra.gmra.mxu0 %v663_v9  ;;  %v3809_v9 = vld [vmem:[%s4711_s1 + $0x610] sm:$0xff]  }
  0xa4   :  { %3460 = vmatpush3.bf16.msra.mxu0 %v3756_v12  ;;  %2699 = vmatmul.mubr.bf16.vlgmr.msra.gmra.mxu1 %v685_v16  ;;  %v3812_v12 = vld [vmem:[%s4711_s1 + $0x6c8] sm:$0xff]   ;;  %v3816_v16 = vld [vmem:[%s4711_s1 + $0x6c0] sm:$0xff]  }
  0xa5   :  { %3461 = vmatprep.subr.bf16.mxu0 %v3758_v17  ;;  %3482 = vmatpush3.bf16.msra.mxu1 %v3757_v14  ;;  %v3814_v14 = vld [vmem:[%s4711_s1 + $0x688] sm:$0xff]   ;;  %v3817_v17 = vld [vmem:[%s4711_s1 + $0x600] sm:$0xff]  }
  0xa6   :  { %2738 = vmatprep.mubr.bf16.mxu0 %v684_v20  ;;  %3483 = vmatprep.subr.bf16.mxu1 %v3759_v19  ;;  %v696_v19 = vrot.slane %v18_v18, %v3969_v35  ;;  %v3819_v20 = vld [vmem:[%s4711_s1 + $0x778] sm:$0xff]  }
  0xa7   :  { %2778 = vmatprep.mubr.bf16.mxu1 %v688_v23 }
  0xa8   :  { %3462 = vmatpush3.bf16.msra.mxu0 %v3760_v21  ;;  %v689_v21 = vcombine.high %v18_v18, %v18_v18  ;;  %v704_v23 = vcombine.high %v696_v19, %v696_v19 }
  0xa9   :  { %3463 = vmatprep.subr.bf16.mxu0 %v3762_v24  ;;  %3484 = vmatpush3.bf16.msra.mxu1 %v3761_v22  ;;  %v3818_v22 = vld [vmem:[%s4711_s1 + $0x680] sm:$0xff]   ;;  %v712_v24 = vrot.slane %v696_v19, %v3969_v35 }
  0xaa   :  { %3485 = vmatprep.subr.bf16.mxu1 %v3763_v25  ;;  %v3820_v25 = vld [vmem:[%s4711_s1 + $0x7f8] sm:$0xff]  }
  0xac   :  { %3464 = vmatpush3.bf16.msra.mxu0 %v3764_v26  ;;  %v4607_v26 = vrot.slane %v689_v21, %v3969_v35 }
  0xad   :  { %3465 = vmatprep.subr.bf16.mxu0 %v3766_v28  ;;  %3486 = vmatpush3.bf16.msra.mxu1 %v3765_v27  ;;  %v3821_v27 = vld [vmem:[%s4711_s1 + $0x738] sm:$0xff]   ;;  %v726_v28 = vrot.slane %v704_v23, %v3969_v35 }
  0xae   :  { %3487 = vmatprep.subr.bf16.mxu1 %v3767_v29  ;;  %v3822_v29 = vld [vmem:[%s4711_s1 + $0x7b8] sm:$0xff]  }
  0xb0   :  { %3466 = vmatpush3.bf16.msra.mxu0 %v3768_v30  ;;  %v705_v30 = vcombine.high %v4607_v26, %v4607_v26 }
  0xb1   :  { %3467 = vmatprep.subr.bf16.mxu0 %v3770_v32  ;;  %3488 = vmatpush3.bf16.msra.mxu1 %v3769_v31  ;;  %v734_v31 = vcombine.high %v712_v24, %v712_v24  ;;  %v3823_v32 = vld [vmem:[%s4711_s1 + $0x770] sm:$0xff]  }
  0xb2   :  { %3489 = vmatprep.subr.bf16.mxu1 %v3771_v33  ;;  %v736_v33 = vcombine.high %v726_v28, %v726_v28 }
  0xb4   :  { %3468 = vmatpush3.bf16.msra.mxu0 %v3772_v34 }
  0xb5   :  { %3469 = vmatprep.subr.bf16.mxu0 %v3774_v37  ;;  %3490 = vmatpush3.bf16.msra.mxu1 %v3773_v36  ;;  %v2982_v36 = vld [vmem:[%s4713_s2] ss:$0 sm:$0xff]  ;;  %v733_v37 = vrot.slane %v705_v30, %v3969_v35 }
  0xb6   :  { %3491 = vmatprep.subr.bf16.mxu1 %v3775_v38  ;;  %v3824_v38 = vld [vmem:[%s4711_s1 + $0x7f0] sm:$0xff]  }
  0xb8   :  { %3470 = vmatpush3.bf16.msra.mxu0 %v3776_v39 }
  0xb9   :  { %3471 = vmatprep.subr.bf16.mxu0 %v3778_v41  ;;  %3492 = vmatpush3.bf16.msra.mxu1 %v3777_v40  ;;  %v3825_v41 = vld [vmem:[%s4711_s1 + $0x730] sm:$0xff]  }
  0xba   :  { %3493 = vmatprep.subr.bf16.mxu1 %v3779_v42  ;;  %v737_v42 = vcombine.high %v733_v37, %v733_v37 }
  0xbc   :  { %3472 = vmatpush3.bf16.msra.mxu0 %v3780_v43 }
  0xbd   :  { %3473 = vmatprep.subr.bf16.mxu0 %v3782_v45  ;;  %3494 = vmatpush3.bf16.msra.mxu1 %v3781_v44  ;;  %v3827_v44 = vld [vmem:[%s4711_s1 + $0x768] sm:$0xff]  }
  0xbe   :  { %3495 = vmatprep.subr.bf16.mxu1 %v3783_v46 }
  0xc0   :  { %3474 = vmatpush3.bf16.msra.mxu0 %v3784_v47  ;;  %v3826_v47 = vld [vmem:[%s4711_s1 + $0x7b0] sm:$0xff]  }
  0xc1   :  { %3503 = vmatprep.subr.bf16.mxu0 %v3787_v50  ;;  %3496 = vmatpush3.bf16.msra.mxu1 %v3785_v48  ;;  %v3828_v50 = vld [vmem:[%s4711_s1 + $0x7e8] sm:$0xff]  }
  0xc2   :  { %3525 = vmatprep.subr.bf16.mxu1 %v3788_v51 }
  0xc3   :  { %2739 = vmatmul.mubr.bf16.vlgmr.msra.gmra.mxu0 %v670_v49 }
  0xc4   :  { %3504 = vmatpush3.bf16.msra.mxu0 %v3789_v52  ;;  %2779 = vmatmul.mubr.bf16.vlgmr.msra.gmra.mxu1 %v686_v54 }
  0xc5   :  { %3505 = vmatprep.subr.bf16.mxu0 %v3791_v55  ;;  %3526 = vmatpush3.bf16.msra.mxu1 %v3790_v53  ;;  %v3829_v53 = vld [vmem:[%s4711_s1 + $0x728] sm:$0xff]   ;;  %v3831_v55 = vld [vmem:[%s4711_s1 + $0x760] sm:$0xff]  }
  0xc6   :  { %3527 = vmatprep.subr.bf16.mxu1 %v3792_v56  ;;  %2818 = vmatprep.mubr.bf16.mxu0 %v726_v28 }
  0xc7   :  { %2858 = vmatprep.mubr.bf16.mxu1 %v736_v33 }
  0xc8   :  { %3506 = vmatpush3.bf16.msra.mxu0 %v3793_v57  ;;  %v3830_v57 = vld [vmem:[%s4711_s1 + $0x7a8] sm:$0xff]  }
  0xc9   :  { %3507 = vmatprep.subr.bf16.mxu0 %v3795_v59  ;;  %3528 = vmatpush3.bf16.msra.mxu1 %v3794_v58  ;;  %v3832_v58 = vld [vmem:[%s4711_s1 + $0x7e0] sm:$0xff]  }
  0xca   :  { %3529 = vmatprep.subr.bf16.mxu1 %v3796_v60  ;;  %v3833_v59 = vld [vmem:[%s4711_s1 + $0x720] sm:$0xff]   ;;  %v3835_v60 = vld [vmem:[%s4711_s1 + $0x758] sm:$0xff]  }
  0xcc   :  { %3508 = vmatpush3.bf16.msra.mxu0 %v3797_v61  ;;  %v3834_v61 = vld [vmem:[%s4711_s1 + $0x7a0] sm:$0xff]  }
  0xcd   :  { %3509 = vmatprep.subr.bf16.mxu0 %v3799_v63  ;;  %3530 = vmatpush3.bf16.msra.mxu1 %v3798_v62  ;;  %v3836_v62 = vld [vmem:[%s4711_s1 + $0x7d8] sm:$0xff]  }
  0xce   :  { %3531 = vmatprep.subr.bf16.mxu1 %v3800_v0  ;;  %v3837_v63 = vld [vmem:[%s4711_s1 + $0x718] sm:$0xff]   ;;  %v3839_v0 = vld [vmem:[%s4711_s1 + $0x750] sm:$0xff]  }
  0xd0   :  { %3510 = vmatpush3.bf16.msra.mxu0 %v3801_v1  ;;  %v3838_v1 = vld [vmem:[%s4711_s1 + $0x798] sm:$0xff]  }
  0xd1   :  { %3511 = vmatprep.subr.bf16.mxu0 %v3803_v3  ;;  %3532 = vmatpush3.bf16.msra.mxu1 %v3802_v2  ;;  %v3840_v2 = vld [vmem:[%s4711_s1 + $0x7d0] sm:$0xff]  }
  0xd2   :  { %3533 = vmatprep.subr.bf16.mxu1 %v3804_v4  ;;  %v3841_v3 = vld [vmem:[%s4711_s1 + $0x710] sm:$0xff]   ;;  %v3843_v4 = vld [vmem:[%s4711_s1 + $0x748] sm:$0xff]  }
  0xd4   :  { %3512 = vmatpush3.bf16.msra.mxu0 %v3805_v5  ;;  %v3842_v5 = vld [vmem:[%s4711_s1 + $0x790] sm:$0xff]  }
  0xd5   :  { %3513 = vmatprep.subr.bf16.mxu0 %v3807_v7  ;;  %3534 = vmatpush3.bf16.msra.mxu1 %v3806_v6  ;;  %v3844_v6 = vld [vmem:[%s4711_s1 + $0x7c8] sm:$0xff]  }
  0xd6   :  { %3535 = vmatprep.subr.bf16.mxu1 %v3808_v8  ;;  %v3845_v7 = vld [vmem:[%s4711_s1 + $0x708] sm:$0xff]   ;;  %v3847_v8 = vld [vmem:[%s4711_s1 + $0x740] sm:$0xff]  }
  0xd8   :  { %3514 = vmatpush3.bf16.msra.mxu0 %v3809_v9  ;;  %v3846_v9 = vld [vmem:[%s4711_s1 + $0x788] sm:$0xff]  }
  0xd9   :  { %3515 = vmatprep.subr.bf16.mxu0 %v3811_v11  ;;  %3536 = vmatpush3.bf16.msra.mxu1 %v3810_v10  ;;  %v3848_v10 = vld [vmem:[%s4711_s1 + $0x7c0] sm:$0xff]  }
  0xda   :  { %3537 = vmatprep.subr.bf16.mxu1 %v3812_v12  ;;  %v3849_v11 = vld [vmem:[%s4711_s1 + $0x700] sm:$0xff]   ;;  %v719_v12 = vrot.slane %v4607_v26, %v3969_v35 }
  0xdc   :  { %3516 = vmatpush3.bf16.msra.mxu0 %v3813_v13  ;;  %v3850_v13 = vld [vmem:[%s4711_s1 + $0x780] sm:$0xff]  }
  0xdd   :  { %3517 = vmatprep.subr.bf16.mxu0 %v3815_v15  ;;  %3538 = vmatpush3.bf16.msra.mxu1 %v3814_v14  ;;  %v735_v14 = vcombine.high %v719_v12, %v719_v12 }
  0xde   :  { %3539 = vmatprep.subr.bf16.mxu1 %v3816_v16 }
  0xe0   :  { %3518 = vmatpush3.bf16.msra.mxu0 %v3817_v17 }
  0xe1   :  { %3547 = vmatprep.subr.bf16.mxu0 %v3819_v20  ;;  %3540 = vmatpush3.bf16.msra.mxu1 %v3818_v22 }
  0xe2   :  { %3569 = vmatprep.subr.bf16.mxu1 %v3820_v25 }
  0xe3   :  { %v3255_v34 = vpop.f32.mrf.mxu0  ;;  %2819 = vmatmul.mubr.bf16.vlgmr.msra.gmra.mxu0 %v712_v24 }
  0xe4   :  { %v3277_v39 = vpop.f32.mrf.mxu1  ;;  %3548 = vmatpush3.bf16.msra.mxu0 %v3821_v27  ;;  %2859 = vmatmul.mubr.bf16.vlgmr.msra.gmra.mxu1 %v734_v31 }
  0xe5   :  { %v3256_v40 = vpop.f32.mrf.mxu0  ;;  %3549 = vmatprep.subr.bf16.mxu0 %v3823_v32  ;;  %3570 = vmatpush3.bf16.msra.mxu1 %v3822_v29 }
  0xe6   :  { %v3257_v43 = vadd.f32 %v3256_v40, %v3255_v34  ;;  %v3278_v45 = vpop.f32.mrf.mxu1  ;;  %2898 = vmatprep.mubr.bf16.mxu0 %v733_v37  ;;  %3571 = vmatprep.subr.bf16.mxu1 %v3824_v38 }
  0xe7   :  { %v3258_v46 = vpop.f32.mrf.mxu0  ;;  %v3279_v49 = vadd.f32 %v3278_v45, %v3277_v39  ;;  %2938 = vmatprep.mubr.bf16.mxu1 %v737_v42 }
  0xe8   :  { %v2341_v48 = vadd.f32 %v3257_v43, %v2982_v36  ;;  %v3280_v51 = vpop.f32.mrf.mxu1  ;;  %3550 = vmatpush3.bf16.msra.mxu0 %v3825_v41 }
  0xe9   :  { %v3259_v52 = vpop.f32.mrf.mxu0  ;;  %3551 = vmatprep.subr.bf16.mxu0 %v3827_v44  ;;  %3572 = vmatpush3.bf16.msra.mxu1 %v3826_v47 }
  0xea   :  { %v2381_v54 = vadd.f32 %v3279_v49, %v2341_v48  ;;  %v3281_v56 = vpop.f32.mrf.mxu1  ;;  %3573 = vmatprep.subr.bf16.mxu1 %v3828_v50 }
  0xec   :  { %3552 = vmatpush3.bf16.msra.mxu0 %v3829_v53 }
  0xed   :  { %3553 = vmatprep.subr.bf16.mxu0 %v3831_v55  ;;  %3574 = vmatpush3.bf16.msra.mxu1 %v3830_v57 }
  0xee   :  { %3575 = vmatprep.subr.bf16.mxu1 %v3832_v58 }
  0xf0   :  { %3554 = vmatpush3.bf16.msra.mxu0 %v3833_v59 }
  0xf1   :  { %3555 = vmatprep.subr.bf16.mxu0 %v3835_v60  ;;  %3576 = vmatpush3.bf16.msra.mxu1 %v3834_v61 }
  0xf2   :  { %3577 = vmatprep.subr.bf16.mxu1 %v3836_v62 }
  0xf4   :  { %3556 = vmatpush3.bf16.msra.mxu0 %v3837_v63 }
  0xf5   :  { %3557 = vmatprep.subr.bf16.mxu0 %v3839_v0  ;;  %3578 = vmatpush3.bf16.msra.mxu1 %v3838_v1 }
  0xf6   :  { %3579 = vmatprep.subr.bf16.mxu1 %v3840_v2 }
  0xf8   :  { %3558 = vmatpush3.bf16.msra.mxu0 %v3841_v3 }
  0xf9   :  { %3559 = vmatprep.subr.bf16.mxu0 %v3843_v4  ;;  %3580 = vmatpush3.bf16.msra.mxu1 %v3842_v5 }
  0xfa   :  { %3581 = vmatprep.subr.bf16.mxu1 %v3844_v6 }
  0xfc   :  { %3560 = vmatpush3.bf16.msra.mxu0 %v3845_v7 }
  0xfd   :  { %3561 = vmatprep.subr.bf16.mxu0 %v3847_v8  ;;  %3582 = vmatpush3.bf16.msra.mxu1 %v3846_v9 }
  0xfe   :  { %3583 = vmatprep.subr.bf16.mxu1 %v3848_v10 }
 0x100   :  { %3562 = vmatpush3.bf16.msra.mxu0 %v3849_v11 }
 0x101   :  { %3584 = vmatpush3.bf16.msra.mxu1 %v3850_v13 }
 0x103   :  { %v3299_v15 = vpop.f32.mrf.mxu0  ;;  %2899 = vmatmul.mubr.bf16.vlgmr.msra.gmra.mxu0 %v719_v12 }
 0x104   :  { %v3321_v16 = vpop.f32.mrf.mxu1  ;;  %2939 = vmatmul.mubr.bf16.vlgmr.msra.gmra.mxu1 %v735_v14 }
 0x105   :  { %v3300_v17 = vpop.f32.mrf.mxu0 }
 0x106   :  { %v3301_v18 = vadd.f32 %v3300_v17, %v3299_v15  ;;  %v3322_v19 = vpop.f32.mrf.mxu1 }
 0x107   :  { %v3302_v20 = vpop.f32.mrf.mxu0  ;;  %v3323_v22 = vadd.f32 %v3322_v19, %v3321_v16 }
 0x108   :  { %v2421_v21 = vadd.f32 %v3301_v18, %v2381_v54  ;;  %v3324_v35 = vpop.f32.mrf.mxu1 }
 0x109   :  { %v3303_v23 = vpop.f32.mrf.mxu0 }
 0x10a   :  { %v2461_v24 = vadd.f32 %v3323_v22, %v2421_v21  ;;  %v3325_v25 = vpop.f32.mrf.mxu1 }
 0x123   :  { %v3343_v26 = vpop.f32.mrf.mxu0 }
 0x124   :  { %v3365_v27 = vpop.f32.mrf.mxu1 }
 0x125   :  { %v3344_v28 = vpop.f32.mrf.mxu0 }
 0x126   :  { %v3345_v29 = vadd.f32 %v3344_v28, %v3343_v26  ;;  %v3366_v30 = vpop.f32.mrf.mxu1 }
 0x127   :  { %v3346_v31 = vpop.f32.mrf.mxu0  ;;  %v3367_v33 = vadd.f32 %v3366_v30, %v3365_v27 }
 0x128   :  { %v2501_v32 = vadd.f32 %v3345_v29, %v2461_v24  ;;  %v3368_v34 = vpop.f32.mrf.mxu1 }
 0x129   :  { %v3347_v36 = vpop.f32.mrf.mxu0 }
 0x12a   :  { %v2541_v37 = vadd.f32 %v3367_v33, %v2501_v32  ;;  %v3369_v38 = vpop.f32.mrf.mxu1 }
 0x143   :  { %v3387_v39 = vpop.f32.mrf.mxu0 }
 0x144   :  { %v3409_v40 = vpop.f32.mrf.mxu1 }
 0x145   :  { %v3388_v41 = vpop.f32.mrf.mxu0 }
 0x146   :  { %v3389_v42 = vadd.f32 %v3388_v41, %v3387_v39  ;;  %v3410_v43 = vpop.f32.mrf.mxu1 }
 0x147   :  { %v3390_v44 = vpop.f32.mrf.mxu0  ;;  %v3411_v46 = vadd.f32 %v3410_v43, %v3409_v40 }
 0x148   :  { %v2581_v45 = vadd.f32 %v3389_v42, %v2541_v37  ;;  %v3412_v47 = vpop.f32.mrf.mxu1 }
 0x149   :  { %v3391_v48 = vpop.f32.mrf.mxu0 }
 0x14a   :  { %v2621_v49 = vadd.f32 %v3411_v46, %v2581_v45  ;;  %v3413_v50 = vpop.f32.mrf.mxu1 }
 0x163   :  { %v3431_v51 = vpop.f32.mrf.mxu0 }
 0x164   :  { %v3453_v52 = vpop.f32.mrf.mxu1 }
 0x165   :  { %v3432_v53 = vpop.f32.mrf.mxu0 }
 0x166   :  { %v3433_v54 = vadd.f32 %v3432_v53, %v3431_v51  ;;  %v3454_v55 = vpop.f32.mrf.mxu1 }
 0x167   :  { %v3434_v56 = vpop.f32.mrf.mxu0  ;;  %v3455_v58 = vadd.f32 %v3454_v55, %v3453_v52 }
 0x168   :  { %v2661_v57 = vadd.f32 %v3433_v54, %v2621_v49  ;;  %v3456_v59 = vpop.f32.mrf.mxu1 }
 0x169   :  { %v3435_v60 = vpop.f32.mrf.mxu0 }
 0x16a   :  { %v2701_v61 = vadd.f32 %v3455_v58, %v2661_v57  ;;  %v3457_v62 = vpop.f32.mrf.mxu1 }
 0x183   :  { %v3475_v63 = vpop.f32.mrf.mxu0 }
 0x184   :  { %v3497_v0 = vpop.f32.mrf.mxu1 }
 0x185   :  { %v3476_v1 = vpop.f32.mrf.mxu0 }
 0x186   :  { %v3498_v2 = vpop.f32.mrf.mxu1  ;;  %v3477_v15 = vadd.f32 %v3476_v1, %v3475_v63 }
 0x187   :  { %v3478_v3 = vpop.f32.mrf.mxu0  ;;  %v3499_v17 = vadd.f32 %v3498_v2, %v3497_v0 }
 0x188   :  { %v3500_v4 = vpop.f32.mrf.mxu1  ;;  %v2741_v16 = vadd.f32 %v3477_v15, %v2701_v61 }
 0x189   :  { %v3479_v5 = vpop.f32.mrf.mxu0 }
 0x18a   :  { %v3501_v6 = vpop.f32.mrf.mxu1  ;;  %v2781_v19 = vadd.f32 %v3499_v17, %v2741_v16 }
 0x1a3   :  { %v3519_v7 = vpop.f32.mrf.mxu0 }
 0x1a4   :  { %v3541_v8 = vpop.f32.mrf.mxu1 }
 0x1a5   :  { %v3520_v9 = vpop.f32.mrf.mxu0 }
 0x1a6   :  { %v3542_v10 = vpop.f32.mrf.mxu1  ;;  %v3521_v18 = vadd.f32 %v3520_v9, %v3519_v7 }
 0x1a7   :  { %v3522_v11 = vpop.f32.mrf.mxu0  ;;  %v3543_v21 = vadd.f32 %v3542_v10, %v3541_v8 }
 0x1a8   :  { %v3544_v12 = vpop.f32.mrf.mxu1  ;;  %v2821_v20 = vadd.f32 %v3521_v18, %v2781_v19 }
 0x1a9   :  { %v3523_v13 = vpop.f32.mrf.mxu0 }
 0x1aa   :  { %v3545_v14 = vpop.f32.mrf.mxu1  ;;  %v2861_v24 = vadd.f32 %v3543_v21, %v2821_v20 }
 0x1c3   :  { %v3563_v22 = vpop.f32.mrf.mxu0 }
 0x1c4   :  { %v3585_v35 = vpop.f32.mrf.mxu1 }
 0x1c5   :  { %v3564_v23 = vpop.f32.mrf.mxu0 }
 0x1c6   :  { %v3565_v25 = vadd.f32 %v3564_v23, %v3563_v22  ;;  %v3586_v26 = vpop.f32.mrf.mxu1 }
 0x1c7   :  { %v3566_v27 = vpop.f32.mrf.mxu0  ;;  %v3587_v29 = vadd.f32 %v3586_v26, %v3585_v35 }
 0x1c8   :  { %v2901_v28 = vadd.f32 %v3565_v25, %v2861_v24  ;;  %v3588_v30 = vpop.f32.mrf.mxu1 }
 0x1c9   :  { %v3567_v31 = vpop.f32.mrf.mxu0 }
 0x1ca   :  { %v2941_v32 = vadd.f32 %v3587_v29, %v2901_v28  ;;  %v3589_v33 = vpop.f32.mrf.mxu1 }
 0x1cc   :  { %v2947_v34 = vsel %vm2946_vm0, %v2941_v32, 0.0 }
 0x1cd   :  { %v2948_v36 = vrot.slane %v2947_v34, 4 }
 0x1cf   :  { %v2949_v37 = vadd.f32 %v2948_v36, %v2947_v34 }
 0x1d1   :  { %v2950_v38 = vrot.slane %v2949_v37, 2 }
 0x1d3   :  { %v2951_v39 = vadd.f32 %v2950_v38, %v2949_v37 }
 0x1d5   :  { %v2952_v40 = vrot.slane %v2951_v39, 1 }
 0x1d7   :  { %v2953_v41 = vadd.f32 %v2952_v40, %v2951_v39 }
 0x1d9   :  { %v2955_v42 = vmul.f32 0.5, %v2953_v41 }
 0x1db   :  { %v2956_v43 = vsub.f32 %v2941_v32, %v2955_v42 }
 0x1dd   :  { %v2957_v44 = vmul.f32 %v2956_v43, %v2956_v43 }
 0x1df   :  { %v2958_v45 = vsel %vm2946_vm0, %v2957_v44, 0.0 }
 0x1e0   :  { %v2959_v46 = vrot.slane %v2958_v45, 4 }
 0x1e2   :  { %v2960_v47 = vadd.f32 %v2959_v46, %v2958_v45 }
 0x1e4   :  { %v2961_v48 = vrot.slane %v2960_v47, 2 }
 0x1e6   :  { %v2962_v49 = vadd.f32 %v2961_v48, %v2960_v47 }
 0x1e8   :  { %v2963_v50 = vrot.slane %v2962_v49, 1 }
 0x1ea   :  { %v2964_v51 = vadd.f32 %v2963_v50, %v2962_v49 }
 0x1ec   :  { %v2965_v52 = vmul.f32 0.5, %v2964_v51 }
 0x1ee   :  { %v2966_v53 = vadd.f32 1e-05, %v2965_v52 }
 0x1f0   :  { %3852 = vrsqrt.f32 %v2966_v53 }
 0x1fd   :  { %v3853_v54 = vpop.eup %3852 }
 0x1fe   :  { %v2968_v55 = vmul.f32 %v3853_v54, %v2956_v43 }
 0x200   :  { %v2969_v56 = vmul.f32 0.2, %v2968_v55 }
 0x202   :  { %v2970_v57 = vmax.f32 %v2968_v55, %v2969_v56 }
 0x204   :  { %v2971_v58 = vsub.f32 0.0, %v2970_v57 }
 0x206   :  { %v2972_v59 = vmul.f32 1.442695, %v2971_v58 }
 0x208   :  { %3854 = vpow2.f32 %v2972_v59 }
 0x215   :  { %v3855_v60 = vpop.eup %3854 }
 0x216   :  { %v2974_v61 = vadd.f32 1.0, %v3855_v60 }
 0x218   :  { %3856 = vrcp.f32 %v2974_v61 }
 0x225   :  { %v3857_v62 = vpop.eup %3856 }
 0x226   :  { %2977 = vst [vmem:[%s4714_s3] sm:$0x3] %v3857_v62 }

</bundles_post_ra>
